<compile_context>
chip_gen: v5e
topology: v5e:2x2
jax: 0.10.0
libtpu: 0.0.40
codegen_flags: <defaults>
</compile_context>

<pallas_src>
import math

import jax
import jax.numpy as jnp
from jax.experimental import pallas as pl
from jax.experimental.pallas import tpu as pltpu

H1, H2, H3 = 512, 128, 64          # fc1/fc2/fc3 widths (fixed by the module)
LSTM_H = 64                        # lstm hidden size (fixed by the module)
GP = 128                           # per-gate padded lane block (vreg lane width)
LOG_SQRT_2PI = 0.5 * math.log(2.0 * math.pi)


# --------------------------------------------------------------------------- #
# Kernel
# --------------------------------------------------------------------------- #
def actor_kernel(state_ref, prev_ref, eps_ref,
                 w1_ref, b1_ref, w2_ref, b2_ref, w3_ref, b3_ref,
                 wih_ref, whh_ref, bl_ref,
                 whx_ref, whhd_ref, bh_ref,
                 act_ref, stats_ref):
    f32 = jnp.float32
    B = state_ref.shape[0]
    A = act_ref.shape[1]
    T = prev_ref.shape[0] // B

    # ---- MLP trunk: relu(fc1) -> relu(fc2) -> relu(fc3) ----
    x = state_ref[...]
    x = jnp.maximum(
        jnp.dot(x, w1_ref[...], preferred_element_type=f32) + b1_ref[...], 0.0)
    x = jnp.maximum(
        jnp.dot(x, w2_ref[...], preferred_element_type=f32) + b2_ref[...], 0.0)
    x = jnp.maximum(
        jnp.dot(x, w3_ref[...], preferred_element_type=f32) + b3_ref[...], 0.0)  # (B, 64)

    # ---- LSTM over prev_actions, keep last hidden state ----
    # Hoisted input projection: one MXU call for all timesteps, bias folded in once.
    # prev_ref is time-major 2-D: rows [t*B : (t+1)*B] hold timestep t.
    xp = jnp.dot(prev_ref[...], wih_ref[...], preferred_element_type=f32) + bl_ref[...]

    whh = whh_ref[...]                              # (128, 512), rows 64: are zero
    h = jnp.zeros((B, 2 * LSTM_H), f32)             # 128 lanes; upper 64 stay exactly 0
    c = jnp.zeros((B, 2 * LSTM_H), f32)
    for t in range(T):                              # small static T -> unrolled recurrence
        gates = xp[t * B:(t + 1) * B, :] + jnp.dot(h, whh, preferred_element_type=f32)
        s = jax.nn.sigmoid(gates[:, :3 * GP])       # i | f | o in one EUP pass
        i_g = s[:, 0 * GP:1 * GP]
        f_g = s[:, 1 * GP:2 * GP]
        o_g = s[:, 2 * GP:3 * GP]
        g_g = jnp.tanh(gates[:, 3 * GP:4 * GP])
        c = f_g * c + i_g * g_g
        h = o_g * jnp.tanh(c)                       # (B, 128), pad lanes remain 0

    # ---- fused heads (no concat): mean in lanes [0:A], std_logit in [GP:GP+A] ----
    head = (jnp.dot(x, whx_ref[...], preferred_element_type=f32)
            + jnp.dot(h, whhd_ref[...], preferred_element_type=f32)
            + bh_ref[...])                          # (B, 256)
    mean = head[:, 0:A]
    std = jax.nn.softplus(head[:, GP:GP + A])       # std_offset = std_controlling_minimal = 0

    # ---- sample, log_prob, entropy (Normal(mean, std)) ----
    action = jnp.tanh(mean + std * eps_ref[...])
    act_ref[...] = action

    log_std = jnp.log(std)
    inv_var = pl.reciprocal(std * std, approx=True)
    diff = action - mean
    logp = -0.5 * diff * diff * inv_var - log_std - LOG_SQRT_2PI
    ent = 0.5 + LOG_SQRT_2PI + log_std
    stats_ref[...] = jnp.concatenate(
        [jnp.sum(logp, axis=1, keepdims=True),
         jnp.sum(ent, axis=1, keepdims=True)], axis=1)          # (B, 2)


# --------------------------------------------------------------------------- #
# Host-side weight packing (PyTorch layout -> kernel layout)
# --------------------------------------------------------------------------- #
def pack_params(p, action_size):
    """Repack PyTorch-layout params into the lane-aligned kernel layout."""
    A = action_size
    f32 = jnp.float32

    def place_gates(w, rows):
        # w: (rows, 4*LSTM_H) packed (i, f, g, o) -> (rows, 4*GP) packed (i, f, o, g),
        # each gate at a 128-lane aligned offset, padded with zeros.
        out = jnp.zeros((rows, 4 * GP), f32)
        for dst, src in ((0, 0), (1, 1), (2, 3), (3, 2)):   # i, f, o, g
            out = out.at[:, dst * GP:dst * GP + LSTM_H].set(
                w[:, src * LSTM_H:(src + 1) * LSTM_H])
        return out

    wih_p = place_gates(p["wih"], A)                               # (A, 512)
    whh_p = jnp.zeros((2 * LSTM_H, 4 * GP), f32).at[:LSTM_H].set(
        place_gates(p["whh"], LSTM_H))                             # (128, 512)
    bl_p = place_gates(p["bl"], 1)                                 # (1, 512)

    # fused heads: fc4 (mean) in lanes [0:A], fc5 (std_logit) in lanes [GP:GP+A]
    whx = jnp.zeros((H3, 2 * GP), f32)
    whx = whx.at[:, 0:A].set(p["w4"][:H3]).at[:, GP:GP + A].set(p["w5"][:H3])
    whhd = jnp.zeros((2 * LSTM_H, 2 * GP), f32)
    whhd = whhd.at[:LSTM_H, 0:A].set(p["w4"][H3:]).at[:LSTM_H, GP:GP + A].set(p["w5"][H3:])
    bh = jnp.zeros((1, 2 * GP), f32)
    bh = bh.at[:, 0:A].set(p["b4"]).at[:, GP:GP + A].set(p["b5"])

    return {
        "w1": p["w1"], "b1": p["b1"],
        "w2": p["w2"], "b2": p["b2"],
        "w3": p["w3"], "b3": p["b3"],
        "wih_p": wih_p, "whh_p": whh_p, "bl_p": bl_p,
        "whx": whx, "whhd": whhd, "bh": bh,
    }


# --------------------------------------------------------------------------- #
# Wrapper
# --------------------------------------------------------------------------- #
def _pad_rows(a, rows):
    pad = rows - a.shape[0]
    if pad == 0:
        return a
    return jnp.pad(a, ((0, pad),) + ((0, 0),) * (a.ndim - 1))


@jax.jit
def actor_forward(state, prev_actions, eps, packed):
    B = state.shape[0]
    T, A = prev_actions.shape[1], prev_actions.shape[2]
    Bp = max(8, ((B + 7) // 8) * 8)          # pad batch to a full f32 sublane tile

    state_p = _pad_rows(state, Bp)
    eps_p = _pad_rows(eps, Bp)
    prev_p = _pad_rows(prev_actions, Bp)
    # time-major 2-D layout so the LSTM input projection is one MXU call in-kernel
    prev2d = jnp.transpose(prev_p, (1, 0, 2)).reshape(T * Bp, A)

    args = (state_p, prev2d, eps_p,
            packed["w1"], packed["b1"], packed["w2"], packed["b2"],
            packed["w3"], packed["b3"],
            packed["wih_p"], packed["whh_p"], packed["bl_p"],
            packed["whx"], packed["whhd"], packed["bh"])

    vmem = pl.BlockSpec(memory_space=pltpu.MemorySpace.VMEM)   # whole-array blocks in VMEM
    act, stats = pl.pallas_call(
        actor_kernel,
        out_shape=(jax.ShapeDtypeStruct((Bp, A), jnp.float32),
                   jax.ShapeDtypeStruct((Bp, 2), jnp.float32)),
        in_specs=[vmem] * len(args),
        out_specs=(vmem, vmem),
    )(*args)
    return act[:B], stats[:B, 0], stats[:B, 1]


# --------------------------------------------------------------------------- #
# Pure-JAX reference (PyTorch-layout weights, identical semantics)
# --------------------------------------------------------------------------- #
def actor_forward_ref(state, prev_actions, eps, params):
    x = jnp.maximum(state @ params["w1"] + params["b1"], 0.0)
    x = jnp.maximum(x @ params["w2"] + params["b2"], 0.0)
    x = jnp.maximum(x @ params["w3"] + params["b3"], 0.0)
    B, T, A = prev_actions.shape
    h = jnp.zeros((B, LSTM_H), jnp.float32)
    c = jnp.zeros((B, LSTM_H), jnp.float32)
    for t in range(T):
        gates = prev_actions[:, t, :] @ params["wih"] + h @ params["whh"] + params["bl"]
        i = jax.nn.sigmoid(gates[:, 0 * LSTM_H:1 * LSTM_H])
        f = jax.nn.sigmoid(gates[:, 1 * LSTM_H:2 * LSTM_H])
        g = jnp.tanh(gates[:, 2 * LSTM_H:3 * LSTM_H])
        o = jax.nn.sigmoid(gates[:, 3 * LSTM_H:4 * LSTM_H])
        c = f * c + i * g
        h = o * jnp.tanh(c)
    z = jnp.concatenate([x, h], axis=1)
    mean = z @ params["w4"] + params["b4"]
    std = jax.nn.softplus(z @ params["w5"] + params["b5"])
    action = jnp.tanh(mean + std * eps)
    logp = (-0.5 * (action - mean) ** 2 / (std * std) - jnp.log(std) - LOG_SQRT_2PI).sum(axis=1)
    ent = (0.5 + LOG_SQRT_2PI + jnp.log(std)).sum(axis=1)
    return action, logp, ent


def make_params(key, state_size, action_size):
    ks = jax.random.split(key, 10)

    def w(k, shape, scale=0.1):
        return (scale * jax.random.normal(k, shape)).astype(jnp.float32)

    return {
        "w1": w(ks[0], (state_size, H1)),  "b1": jnp.zeros((1, H1), jnp.float32),
        "w2": w(ks[1], (H1, H2)),          "b2": jnp.zeros((1, H2), jnp.float32),
        "w3": w(ks[2], (H2, H3)),          "b3": jnp.zeros((1, H3), jnp.float32),
        "w4": w(ks[3], (H2, action_size)), "b4": w(ks[4], (1, action_size), 0.05),
        "w5": w(ks[5], (H2, action_size)), "b5": w(ks[6], (1, action_size), 0.05),
        # LSTM: weight_ih^T (A, 4H), weight_hh^T (H, 4H), combined bias b_ih + b_hh
        "wih": w(ks[7], (action_size, 4 * LSTM_H)),
        "whh": w(ks[8], (LSTM_H, 4 * LSTM_H)),
        "bl":  w(ks[9], (1, 4 * LSTM_H), 0.05),
    }


if __name__ == "__main__":
    B, T = 4, 8
    state_size, action_size = 8, 4

    key = jax.random.PRNGKey(0)
    k_state, k_prev, k_eps, k_par = jax.random.split(key, 4)

    state = jax.random.normal(k_state, (B, state_size), jnp.float32)
    prev_actions = jax.random.normal(k_prev, (B, T, action_size), jnp.float32)
    eps = jax.random.normal(k_eps, (B, action_size), jnp.float32)   # Normal.sample noise
    params = make_params(k_par, state_size, action_size)
    packed = pack_params(params, action_size)

    action, log_prob, entropy = actor_forward(state, prev_actions, eps, packed)
    jax.block_until_ready((action, log_prob, entropy))

    a_ref, lp_ref, en_ref = actor_forward_ref(state, prev_actions, eps, params)
    assert jnp.allclose(action, a_ref, atol=1e-3, rtol=1e-3)
    # slightly looser bound for log_prob: inv_var uses the EUP approximate reciprocal
    assert jnp.allclose(log_prob, lp_ref, atol=5e-3, rtol=5e-3)
    assert jnp.allclose(entropy, en_ref, atol=1e-3, rtol=1e-3)

    print("KERNEL_OK")
</pallas_src>

<mosaic_0001>
module attributes {stable_mosaic.version = 11 : i64} {
  func.func @actor_kernel(%arg0: memref<8x8xf32, #tpu.memory_space<vmem>>, %arg1: memref<64x4xf32, #tpu.memory_space<vmem>>, %arg2: memref<8x4xf32, #tpu.memory_space<vmem>>, %arg3: memref<8x512xf32, #tpu.memory_space<vmem>>, %arg4: memref<1x512xf32, #tpu.memory_space<vmem>>, %arg5: memref<512x128xf32, #tpu.memory_space<vmem>>, %arg6: memref<1x128xf32, #tpu.memory_space<vmem>>, %arg7: memref<128x64xf32, #tpu.memory_space<vmem>>, %arg8: memref<1x64xf32, #tpu.memory_space<vmem>>, %arg9: memref<4x512xf32, #tpu.memory_space<vmem>>, %arg10: memref<128x512xf32, #tpu.memory_space<vmem>>, %arg11: memref<1x512xf32, #tpu.memory_space<vmem>>, %arg12: memref<64x256xf32, #tpu.memory_space<vmem>>, %arg13: memref<128x256xf32, #tpu.memory_space<vmem>>, %arg14: memref<1x256xf32, #tpu.memory_space<vmem>>, %arg15: memref<8x4xf32, #tpu.memory_space<vmem>>, %arg16: memref<8x2xf32, #tpu.memory_space<vmem>>) attributes {dimension_semantics = [], scalar_prefetch = 0 : i64, scratch_operands = 0 : i64, tpu.core_type = #tpu.core_type<tc>} {
    %c0 = arith.constant 0 : index
    %c0_0 = arith.constant 0 : index
    %0 = vector.load %arg0[%c0, %c0_0] : memref<8x8xf32, #tpu.memory_space<vmem>>, vector<8x8xf32>
    %c0_1 = arith.constant 0 : index
    %c0_2 = arith.constant 0 : index
    %1 = vector.load %arg3[%c0_1, %c0_2] : memref<8x512xf32, #tpu.memory_space<vmem>>, vector<8x512xf32>
    %cst = arith.constant dense<0.000000e+00> : vector<8x512xf32>
    %2 = tpu.matmul %0, %1, %cst {dimension_numbers = #tpu.dot_dimension_numbers<[1], [0], [0], [1], [0, 0, 1, 1], [], []>} : vector<8x8xf32>, vector<8x512xf32>, vector<8x512xf32> -> vector<8x512xf32>
    %c0_3 = arith.constant 0 : index
    %c0_4 = arith.constant 0 : index
    %3 = vector.load %arg4[%c0_3, %c0_4] : memref<1x512xf32, #tpu.memory_space<vmem>>, vector<1x512xf32>
    %4 = vector.broadcast %3 : vector<1x512xf32> to vector<8x512xf32>
    %5 = arith.addf %2, %4 : vector<8x512xf32>
    %cst_5 = arith.constant 0.000000e+00 : f32
    %6 = vector.broadcast %cst_5 : f32 to vector<8x512xf32>
    %7 = arith.maximumf %5, %6 : vector<8x512xf32>
    %c0_6 = arith.constant 0 : index
    %c0_7 = arith.constant 0 : index
    %8 = vector.load %arg5[%c0_6, %c0_7] : memref<512x128xf32, #tpu.memory_space<vmem>>, vector<512x128xf32>
    %cst_8 = arith.constant dense<0.000000e+00> : vector<8x128xf32>
    %9 = tpu.matmul %7, %8, %cst_8 {dimension_numbers = #tpu.dot_dimension_numbers<[1], [0], [0], [1], [0, 0, 1, 1], [], []>} : vector<8x512xf32>, vector<512x128xf32>, vector<8x128xf32> -> vector<8x128xf32>
    %c0_9 = arith.constant 0 : index
    %c0_10 = arith.constant 0 : index
    %10 = vector.load %arg6[%c0_9, %c0_10] : memref<1x128xf32, #tpu.memory_space<vmem>>, vector<1x128xf32>
    %11 = vector.broadcast %10 : vector<1x128xf32> to vector<8x128xf32>
    %12 = arith.addf %9, %11 : vector<8x128xf32>
    %cst_11 = arith.constant 0.000000e+00 : f32
    %13 = vector.broadcast %cst_11 : f32 to vector<8x128xf32>
    %14 = arith.maximumf %12, %13 : vector<8x128xf32>
    %c0_12 = arith.constant 0 : index
    %c0_13 = arith.constant 0 : index
    %15 = vector.load %arg7[%c0_12, %c0_13] : memref<128x64xf32, #tpu.memory_space<vmem>>, vector<128x64xf32>
    %cst_14 = arith.constant dense<0.000000e+00> : vector<8x64xf32>
    %16 = tpu.matmul %14, %15, %cst_14 {dimension_numbers = #tpu.dot_dimension_numbers<[1], [0], [0], [1], [0, 0, 1, 1], [], []>} : vector<8x128xf32>, vector<128x64xf32>, vector<8x64xf32> -> vector<8x64xf32>
    %c0_15 = arith.constant 0 : index
    %c0_16 = arith.constant 0 : index
    %17 = vector.load %arg8[%c0_15, %c0_16] : memref<1x64xf32, #tpu.memory_space<vmem>>, vector<1x64xf32>
    %18 = vector.broadcast %17 : vector<1x64xf32> to vector<8x64xf32>
    %19 = arith.addf %16, %18 : vector<8x64xf32>
    %cst_17 = arith.constant 0.000000e+00 : f32
    %20 = vector.broadcast %cst_17 : f32 to vector<8x64xf32>
    %21 = arith.maximumf %19, %20 : vector<8x64xf32>
    %c0_18 = arith.constant 0 : index
    %c0_19 = arith.constant 0 : index
    %22 = vector.load %arg1[%c0_18, %c0_19] : memref<64x4xf32, #tpu.memory_space<vmem>>, vector<64x4xf32>
    %c0_20 = arith.constant 0 : index
    %c0_21 = arith.constant 0 : index
    %23 = vector.load %arg9[%c0_20, %c0_21] : memref<4x512xf32, #tpu.memory_space<vmem>>, vector<4x512xf32>
    %cst_22 = arith.constant dense<0.000000e+00> : vector<64x512xf32>
    %24 = tpu.matmul %22, %23, %cst_22 {dimension_numbers = #tpu.dot_dimension_numbers<[1], [0], [0], [1], [0, 0, 1, 1], [], []>} : vector<64x4xf32>, vector<4x512xf32>, vector<64x512xf32> -> vector<64x512xf32>
    %c0_23 = arith.constant 0 : index
    %c0_24 = arith.constant 0 : index
    %25 = vector.load %arg11[%c0_23, %c0_24] : memref<1x512xf32, #tpu.memory_space<vmem>>, vector<1x512xf32>
    %26 = vector.broadcast %25 : vector<1x512xf32> to vector<64x512xf32>
    %27 = arith.addf %24, %26 : vector<64x512xf32>
    %c0_25 = arith.constant 0 : index
    %c0_26 = arith.constant 0 : index
    %28 = vector.load %arg10[%c0_25, %c0_26] : memref<128x512xf32, #tpu.memory_space<vmem>>, vector<128x512xf32>
    %cst_27 = arith.constant 0.000000e+00 : f32
    %29 = vector.broadcast %cst_27 : f32 to vector<8x128xf32>
    %cst_28 = arith.constant 0.000000e+00 : f32
    %30 = vector.broadcast %cst_28 : f32 to vector<8x128xf32>
    %31 = vector.extract_strided_slice %27 {offsets = [0, 0], sizes = [8, 512], strides = [1, 1]} : vector<64x512xf32> to vector<8x512xf32>
    %cst_29 = arith.constant dense<0.000000e+00> : vector<8x512xf32>
    %32 = tpu.matmul %29, %28, %cst_29 {dimension_numbers = #tpu.dot_dimension_numbers<[1], [0], [0], [1], [0, 0, 1, 1], [], []>} : vector<8x128xf32>, vector<128x512xf32>, vector<8x512xf32> -> vector<8x512xf32>
    %33 = arith.addf %31, %32 : vector<8x512xf32>
    %34 = vector.extract_strided_slice %33 {offsets = [0, 0], sizes = [8, 384], strides = [1, 1]} : vector<8x512xf32> to vector<8x384xf32>
    %35 = arith.negf %34 : vector<8x384xf32>
    %36 = math.exp %35 : vector<8x384xf32>
    %cst_30 = arith.constant 1.000000e+00 : f32
    %37 = vector.broadcast %cst_30 : f32 to vector<8x384xf32>
    %38 = arith.addf %37, %36 : vector<8x384xf32>
    %39 = arith.divf %37, %38 : vector<8x384xf32>
    %40 = vector.extract_strided_slice %39 {offsets = [0, 0], sizes = [8, 128], strides = [1, 1]} : vector<8x384xf32> to vector<8x128xf32>
    %41 = vector.extract_strided_slice %39 {offsets = [0, 128], sizes = [8, 128], strides = [1, 1]} : vector<8x384xf32> to vector<8x128xf32>
    %42 = vector.extract_strided_slice %39 {offsets = [0, 256], sizes = [8, 128], strides = [1, 1]} : vector<8x384xf32> to vector<8x128xf32>
    %43 = vector.extract_strided_slice %33 {offsets = [0, 384], sizes = [8, 128], strides = [1, 1]} : vector<8x512xf32> to vector<8x128xf32>
    %44 = math.tanh %43 : vector<8x128xf32>
    %45 = arith.mulf %41, %30 : vector<8x128xf32>
    %46 = arith.mulf %40, %44 : vector<8x128xf32>
    %47 = arith.addf %45, %46 : vector<8x128xf32>
    %48 = math.tanh %47 : vector<8x128xf32>
    %49 = arith.mulf %42, %48 : vector<8x128xf32>
    %50 = vector.extract_strided_slice %27 {offsets = [8, 0], sizes = [8, 512], strides = [1, 1]} : vector<64x512xf32> to vector<8x512xf32>
    %cst_31 = arith.constant dense<0.000000e+00> : vector<8x512xf32>
    %51 = tpu.matmul %49, %28, %cst_31 {dimension_numbers = #tpu.dot_dimension_numbers<[1], [0], [0], [1], [0, 0, 1, 1], [], []>} : vector<8x128xf32>, vector<128x512xf32>, vector<8x512xf32> -> vector<8x512xf32>
    %52 = arith.addf %50, %51 : vector<8x512xf32>
    %53 = vector.extract_strided_slice %52 {offsets = [0, 0], sizes = [8, 384], strides = [1, 1]} : vector<8x512xf32> to vector<8x384xf32>
    %54 = arith.negf %53 : vector<8x384xf32>
    %55 = math.exp %54 : vector<8x384xf32>
    %cst_32 = arith.constant 1.000000e+00 : f32
    %56 = vector.broadcast %cst_32 : f32 to vector<8x384xf32>
    %57 = arith.addf %56, %55 : vector<8x384xf32>
    %58 = arith.divf %56, %57 : vector<8x384xf32>
    %59 = vector.extract_strided_slice %58 {offsets = [0, 0], sizes = [8, 128], strides = [1, 1]} : vector<8x384xf32> to vector<8x128xf32>
    %60 = vector.extract_strided_slice %58 {offsets = [0, 128], sizes = [8, 128], strides = [1, 1]} : vector<8x384xf32> to vector<8x128xf32>
    %61 = vector.extract_strided_slice %58 {offsets = [0, 256], sizes = [8, 128], strides = [1, 1]} : vector<8x384xf32> to vector<8x128xf32>
    %62 = vector.extract_strided_slice %52 {offsets = [0, 384], sizes = [8, 128], strides = [1, 1]} : vector<8x512xf32> to vector<8x128xf32>
    %63 = math.tanh %62 : vector<8x128xf32>
    %64 = arith.mulf %60, %47 : vector<8x128xf32>
    %65 = arith.mulf %59, %63 : vector<8x128xf32>
    %66 = arith.addf %64, %65 : vector<8x128xf32>
    %67 = math.tanh %66 : vector<8x128xf32>
    %68 = arith.mulf %61, %67 : vector<8x128xf32>
    %69 = vector.extract_strided_slice %27 {offsets = [16, 0], sizes = [8, 512], strides = [1, 1]} : vector<64x512xf32> to vector<8x512xf32>
    %cst_33 = arith.constant dense<0.000000e+00> : vector<8x512xf32>
    %70 = tpu.matmul %68, %28, %cst_33 {dimension_numbers = #tpu.dot_dimension_numbers<[1], [0], [0], [1], [0, 0, 1, 1], [], []>} : vector<8x128xf32>, vector<128x512xf32>, vector<8x512xf32> -> vector<8x512xf32>
    %71 = arith.addf %69, %70 : vector<8x512xf32>
    %72 = vector.extract_strided_slice %71 {offsets = [0, 0], sizes = [8, 384], strides = [1, 1]} : vector<8x512xf32> to vector<8x384xf32>
    %73 = arith.negf %72 : vector<8x384xf32>
    %74 = math.exp %73 : vector<8x384xf32>
    %cst_34 = arith.constant 1.000000e+00 : f32
    %75 = vector.broadcast %cst_34 : f32 to vector<8x384xf32>
    %76 = arith.addf %75, %74 : vector<8x384xf32>
    %77 = arith.divf %75, %76 : vector<8x384xf32>
    %78 = vector.extract_strided_slice %77 {offsets = [0, 0], sizes = [8, 128], strides = [1, 1]} : vector<8x384xf32> to vector<8x128xf32>
    %79 = vector.extract_strided_slice %77 {offsets = [0, 128], sizes = [8, 128], strides = [1, 1]} : vector<8x384xf32> to vector<8x128xf32>
    %80 = vector.extract_strided_slice %77 {offsets = [0, 256], sizes = [8, 128], strides = [1, 1]} : vector<8x384xf32> to vector<8x128xf32>
    %81 = vector.extract_strided_slice %71 {offsets = [0, 384], sizes = [8, 128], strides = [1, 1]} : vector<8x512xf32> to vector<8x128xf32>
    %82 = math.tanh %81 : vector<8x128xf32>
    %83 = arith.mulf %79, %66 : vector<8x128xf32>
    %84 = arith.mulf %78, %82 : vector<8x128xf32>
    %85 = arith.addf %83, %84 : vector<8x128xf32>
    %86 = math.tanh %85 : vector<8x128xf32>
    %87 = arith.mulf %80, %86 : vector<8x128xf32>
    %88 = vector.extract_strided_slice %27 {offsets = [24, 0], sizes = [8, 512], strides = [1, 1]} : vector<64x512xf32> to vector<8x512xf32>
    %cst_35 = arith.constant dense<0.000000e+00> : vector<8x512xf32>
    %89 = tpu.matmul %87, %28, %cst_35 {dimension_numbers = #tpu.dot_dimension_numbers<[1], [0], [0], [1], [0, 0, 1, 1], [], []>} : vector<8x128xf32>, vector<128x512xf32>, vector<8x512xf32> -> vector<8x512xf32>
    %90 = arith.addf %88, %89 : vector<8x512xf32>
    %91 = vector.extract_strided_slice %90 {offsets = [0, 0], sizes = [8, 384], strides = [1, 1]} : vector<8x512xf32> to vector<8x384xf32>
    %92 = arith.negf %91 : vector<8x384xf32>
    %93 = math.exp %92 : vector<8x384xf32>
    %cst_36 = arith.constant 1.000000e+00 : f32
    %94 = vector.broadcast %cst_36 : f32 to vector<8x384xf32>
    %95 = arith.addf %94, %93 : vector<8x384xf32>
    %96 = arith.divf %94, %95 : vector<8x384xf32>
    %97 = vector.extract_strided_slice %96 {offsets = [0, 0], sizes = [8, 128], strides = [1, 1]} : vector<8x384xf32> to vector<8x128xf32>
    %98 = vector.extract_strided_slice %96 {offsets = [0, 128], sizes = [8, 128], strides = [1, 1]} : vector<8x384xf32> to vector<8x128xf32>
    %99 = vector.extract_strided_slice %96 {offsets = [0, 256], sizes = [8, 128], strides = [1, 1]} : vector<8x384xf32> to vector<8x128xf32>
    %100 = vector.extract_strided_slice %90 {offsets = [0, 384], sizes = [8, 128], strides = [1, 1]} : vector<8x512xf32> to vector<8x128xf32>
    %101 = math.tanh %100 : vector<8x128xf32>
    %102 = arith.mulf %98, %85 : vector<8x128xf32>
    %103 = arith.mulf %97, %101 : vector<8x128xf32>
    %104 = arith.addf %102, %103 : vector<8x128xf32>
    %105 = math.tanh %104 : vector<8x128xf32>
    %106 = arith.mulf %99, %105 : vector<8x128xf32>
    %107 = vector.extract_strided_slice %27 {offsets = [32, 0], sizes = [8, 512], strides = [1, 1]} : vector<64x512xf32> to vector<8x512xf32>
    %cst_37 = arith.constant dense<0.000000e+00> : vector<8x512xf32>
    %108 = tpu.matmul %106, %28, %cst_37 {dimension_numbers = #tpu.dot_dimension_numbers<[1], [0], [0], [1], [0, 0, 1, 1], [], []>} : vector<8x128xf32>, vector<128x512xf32>, vector<8x512xf32> -> vector<8x512xf32>
    %109 = arith.addf %107, %108 : vector<8x512xf32>
    %110 = vector.extract_strided_slice %109 {offsets = [0, 0], sizes = [8, 384], strides = [1, 1]} : vector<8x512xf32> to vector<8x384xf32>
    %111 = arith.negf %110 : vector<8x384xf32>
    %112 = math.exp %111 : vector<8x384xf32>
    %cst_38 = arith.constant 1.000000e+00 : f32
    %113 = vector.broadcast %cst_38 : f32 to vector<8x384xf32>
    %114 = arith.addf %113, %112 : vector<8x384xf32>
    %115 = arith.divf %113, %114 : vector<8x384xf32>
    %116 = vector.extract_strided_slice %115 {offsets = [0, 0], sizes = [8, 128], strides = [1, 1]} : vector<8x384xf32> to vector<8x128xf32>
    %117 = vector.extract_strided_slice %115 {offsets = [0, 128], sizes = [8, 128], strides = [1, 1]} : vector<8x384xf32> to vector<8x128xf32>
    %118 = vector.extract_strided_slice %115 {offsets = [0, 256], sizes = [8, 128], strides = [1, 1]} : vector<8x384xf32> to vector<8x128xf32>
    %119 = vector.extract_strided_slice %109 {offsets = [0, 384], sizes = [8, 128], strides = [1, 1]} : vector<8x512xf32> to vector<8x128xf32>
    %120 = math.tanh %119 : vector<8x128xf32>
    %121 = arith.mulf %117, %104 : vector<8x128xf32>
    %122 = arith.mulf %116, %120 : vector<8x128xf32>
    %123 = arith.addf %121, %122 : vector<8x128xf32>
    %124 = math.tanh %123 : vector<8x128xf32>
    %125 = arith.mulf %118, %124 : vector<8x128xf32>
    %126 = vector.extract_strided_slice %27 {offsets = [40, 0], sizes = [8, 512], strides = [1, 1]} : vector<64x512xf32> to vector<8x512xf32>
    %cst_39 = arith.constant dense<0.000000e+00> : vector<8x512xf32>
    %127 = tpu.matmul %125, %28, %cst_39 {dimension_numbers = #tpu.dot_dimension_numbers<[1], [0], [0], [1], [0, 0, 1, 1], [], []>} : vector<8x128xf32>, vector<128x512xf32>, vector<8x512xf32> -> vector<8x512xf32>
    %128 = arith.addf %126, %127 : vector<8x512xf32>
    %129 = vector.extract_strided_slice %128 {offsets = [0, 0], sizes = [8, 384], strides = [1, 1]} : vector<8x512xf32> to vector<8x384xf32>
    %130 = arith.negf %129 : vector<8x384xf32>
    %131 = math.exp %130 : vector<8x384xf32>
    %cst_40 = arith.constant 1.000000e+00 : f32
    %132 = vector.broadcast %cst_40 : f32 to vector<8x384xf32>
    %133 = arith.addf %132, %131 : vector<8x384xf32>
    %134 = arith.divf %132, %133 : vector<8x384xf32>
    %135 = vector.extract_strided_slice %134 {offsets = [0, 0], sizes = [8, 128], strides = [1, 1]} : vector<8x384xf32> to vector<8x128xf32>
    %136 = vector.extract_strided_slice %134 {offsets = [0, 128], sizes = [8, 128], strides = [1, 1]} : vector<8x384xf32> to vector<8x128xf32>
    %137 = vector.extract_strided_slice %134 {offsets = [0, 256], sizes = [8, 128], strides = [1, 1]} : vector<8x384xf32> to vector<8x128xf32>
    %138 = vector.extract_strided_slice %128 {offsets = [0, 384], sizes = [8, 128], strides = [1, 1]} : vector<8x512xf32> to vector<8x128xf32>
    %139 = math.tanh %138 : vector<8x128xf32>
    %140 = arith.mulf %136, %123 : vector<8x128xf32>
    %141 = arith.mulf %135, %139 : vector<8x128xf32>
    %142 = arith.addf %140, %141 : vector<8x128xf32>
    %143 = math.tanh %142 : vector<8x128xf32>
    %144 = arith.mulf %137, %143 : vector<8x128xf32>
    %145 = vector.extract_strided_slice %27 {offsets = [48, 0], sizes = [8, 512], strides = [1, 1]} : vector<64x512xf32> to vector<8x512xf32>
    %cst_41 = arith.constant dense<0.000000e+00> : vector<8x512xf32>
    %146 = tpu.matmul %144, %28, %cst_41 {dimension_numbers = #tpu.dot_dimension_numbers<[1], [0], [0], [1], [0, 0, 1, 1], [], []>} : vector<8x128xf32>, vector<128x512xf32>, vector<8x512xf32> -> vector<8x512xf32>
    %147 = arith.addf %145, %146 : vector<8x512xf32>
    %148 = vector.extract_strided_slice %147 {offsets = [0, 0], sizes = [8, 384], strides = [1, 1]} : vector<8x512xf32> to vector<8x384xf32>
    %149 = arith.negf %148 : vector<8x384xf32>
    %150 = math.exp %149 : vector<8x384xf32>
    %cst_42 = arith.constant 1.000000e+00 : f32
    %151 = vector.broadcast %cst_42 : f32 to vector<8x384xf32>
    %152 = arith.addf %151, %150 : vector<8x384xf32>
    %153 = arith.divf %151, %152 : vector<8x384xf32>
    %154 = vector.extract_strided_slice %153 {offsets = [0, 0], sizes = [8, 128], strides = [1, 1]} : vector<8x384xf32> to vector<8x128xf32>
    %155 = vector.extract_strided_slice %153 {offsets = [0, 128], sizes = [8, 128], strides = [1, 1]} : vector<8x384xf32> to vector<8x128xf32>
    %156 = vector.extract_strided_slice %153 {offsets = [0, 256], sizes = [8, 128], strides = [1, 1]} : vector<8x384xf32> to vector<8x128xf32>
    %157 = vector.extract_strided_slice %147 {offsets = [0, 384], sizes = [8, 128], strides = [1, 1]} : vector<8x512xf32> to vector<8x128xf32>
    %158 = math.tanh %157 : vector<8x128xf32>
    %159 = arith.mulf %155, %142 : vector<8x128xf32>
    %160 = arith.mulf %154, %158 : vector<8x128xf32>
    %161 = arith.addf %159, %160 : vector<8x128xf32>
    %162 = math.tanh %161 : vector<8x128xf32>
    %163 = arith.mulf %156, %162 : vector<8x128xf32>
    %164 = vector.extract_strided_slice %27 {offsets = [56, 0], sizes = [8, 512], strides = [1, 1]} : vector<64x512xf32> to vector<8x512xf32>
    %cst_43 = arith.constant dense<0.000000e+00> : vector<8x512xf32>
    %165 = tpu.matmul %163, %28, %cst_43 {dimension_numbers = #tpu.dot_dimension_numbers<[1], [0], [0], [1], [0, 0, 1, 1], [], []>} : vector<8x128xf32>, vector<128x512xf32>, vector<8x512xf32> -> vector<8x512xf32>
    %166 = arith.addf %164, %165 : vector<8x512xf32>
    %167 = vector.extract_strided_slice %166 {offsets = [0, 0], sizes = [8, 384], strides = [1, 1]} : vector<8x512xf32> to vector<8x384xf32>
    %168 = arith.negf %167 : vector<8x384xf32>
    %169 = math.exp %168 : vector<8x384xf32>
    %cst_44 = arith.constant 1.000000e+00 : f32
    %170 = vector.broadcast %cst_44 : f32 to vector<8x384xf32>
    %171 = arith.addf %170, %169 : vector<8x384xf32>
    %172 = arith.divf %170, %171 : vector<8x384xf32>
    %173 = vector.extract_strided_slice %172 {offsets = [0, 0], sizes = [8, 128], strides = [1, 1]} : vector<8x384xf32> to vector<8x128xf32>
    %174 = vector.extract_strided_slice %172 {offsets = [0, 128], sizes = [8, 128], strides = [1, 1]} : vector<8x384xf32> to vector<8x128xf32>
    %175 = vector.extract_strided_slice %172 {offsets = [0, 256], sizes = [8, 128], strides = [1, 1]} : vector<8x384xf32> to vector<8x128xf32>
    %176 = vector.extract_strided_slice %166 {offsets = [0, 384], sizes = [8, 128], strides = [1, 1]} : vector<8x512xf32> to vector<8x128xf32>
    %177 = math.tanh %176 : vector<8x128xf32>
    %178 = arith.mulf %174, %161 : vector<8x128xf32>
    %179 = arith.mulf %173, %177 : vector<8x128xf32>
    %180 = arith.addf %178, %179 : vector<8x128xf32>
    %181 = math.tanh %180 : vector<8x128xf32>
    %182 = arith.mulf %175, %181 : vector<8x128xf32>
    %c0_45 = arith.constant 0 : index
    %c0_46 = arith.constant 0 : index
    %183 = vector.load %arg12[%c0_45, %c0_46] : memref<64x256xf32, #tpu.memory_space<vmem>>, vector<64x256xf32>
    %cst_47 = arith.constant dense<0.000000e+00> : vector<8x256xf32>
    %184 = tpu.matmul %21, %183, %cst_47 {dimension_numbers = #tpu.dot_dimension_numbers<[1], [0], [0], [1], [0, 0, 1, 1], [], []>} : vector<8x64xf32>, vector<64x256xf32>, vector<8x256xf32> -> vector<8x256xf32>
    %c0_48 = arith.constant 0 : index
    %c0_49 = arith.constant 0 : index
    %185 = vector.load %arg13[%c0_48, %c0_49] : memref<128x256xf32, #tpu.memory_space<vmem>>, vector<128x256xf32>
    %cst_50 = arith.constant dense<0.000000e+00> : vector<8x256xf32>
    %186 = tpu.matmul %182, %185, %cst_50 {dimension_numbers = #tpu.dot_dimension_numbers<[1], [0], [0], [1], [0, 0, 1, 1], [], []>} : vector<8x128xf32>, vector<128x256xf32>, vector<8x256xf32> -> vector<8x256xf32>
    %187 = arith.addf %184, %186 : vector<8x256xf32>
    %c0_51 = arith.constant 0 : index
    %c0_52 = arith.constant 0 : index
    %188 = vector.load %arg14[%c0_51, %c0_52] : memref<1x256xf32, #tpu.memory_space<vmem>>, vector<1x256xf32>
    %189 = vector.broadcast %188 : vector<1x256xf32> to vector<8x256xf32>
    %190 = arith.addf %187, %189 : vector<8x256xf32>
    %191 = vector.extract_strided_slice %190 {offsets = [0, 0], sizes = [8, 4], strides = [1, 1]} : vector<8x256xf32> to vector<8x4xf32>
    %192 = vector.extract_strided_slice %190 {offsets = [0, 128], sizes = [8, 4], strides = [1, 1]} : vector<8x256xf32> to vector<8x4xf32>
    %cst_53 = arith.constant 0.000000e+00 : f32
    %193 = vector.broadcast %cst_53 : f32 to vector<8x4xf32>
    %194 = arith.maximumf %192, %193 : vector<8x4xf32>
    %195 = vector.broadcast %cst_53 : f32 to vector<8x4xf32>
    %196 = arith.subf %192, %195 : vector<8x4xf32>
    %197 = arith.cmpf one, %196, %196 : vector<8x4xf32>
    %198 = vector.broadcast %cst_53 : f32 to vector<8x4xf32>
    %199 = arith.addf %192, %198 : vector<8x4xf32>
    %200 = math.absf %196 : vector<8x4xf32>
    %cst_54 = arith.constant 0.000000e+00 : f32
    %201 = vector.broadcast %cst_54 : f32 to vector<8x4xf32>
    %202 = arith.subf %201, %200 : vector<8x4xf32>
    %203 = math.exp %202 : vector<8x4xf32>
    %204 = math.log1p %203 : vector<8x4xf32>
    %205 = arith.addf %194, %204 : vector<8x4xf32>
    %206 = arith.select %197, %199, %205 : vector<8x4xi1>, vector<8x4xf32>
    %c0_55 = arith.constant 0 : index
    %c0_56 = arith.constant 0 : index
    %207 = vector.load %arg2[%c0_55, %c0_56] : memref<8x4xf32, #tpu.memory_space<vmem>>, vector<8x4xf32>
    %208 = arith.mulf %206, %207 : vector<8x4xf32>
    %209 = arith.addf %191, %208 : vector<8x4xf32>
    %210 = math.tanh %209 : vector<8x4xf32>
    %c0_57 = arith.constant 0 : index
    %c0_58 = arith.constant 0 : index
    %211 = vector.load %arg15[%c0_57, %c0_58] : memref<8x4xf32, #tpu.memory_space<vmem>>, vector<8x4xf32>
    tpu.vector_store %arg15[%c0_57, %c0_58], %210 {strides = array<i32>} : memref<8x4xf32, #tpu.memory_space<vmem>>, vector<8x4xf32>,
    %212 = math.log %206 : vector<8x4xf32>
    %213 = arith.mulf %206, %206 : vector<8x4xf32>
    %214 = tpu.reciprocal %213 {approx = true} : vector<8x4xf32> -> vector<8x4xf32>
    %215 = arith.subf %210, %191 : vector<8x4xf32>
    %cst_59 = arith.constant -5.000000e-01 : f32
    %216 = vector.broadcast %cst_59 : f32 to vector<8x4xf32>
    %217 = arith.mulf %216, %215 : vector<8x4xf32>
    %218 = arith.mulf %217, %215 : vector<8x4xf32>
    %219 = arith.mulf %218, %214 : vector<8x4xf32>
    %220 = arith.subf %219, %212 : vector<8x4xf32>
    %cst_60 = arith.constant 0.918938517 : f32
    %221 = vector.broadcast %cst_60 : f32 to vector<8x4xf32>
    %222 = arith.subf %220, %221 : vector<8x4xf32>
    %cst_61 = arith.constant 1.41893852 : f32
    %223 = vector.broadcast %cst_61 : f32 to vector<8x4xf32>
    %224 = arith.addf %223, %212 : vector<8x4xf32>
    %cst_62 = arith.constant dense<0.000000e+00> : vector<8xf32>
    %225 = vector.multi_reduction <add>, %222, %cst_62 [1] : vector<8x4xf32> to vector<8xf32>
    %226 = vector.shape_cast %225 : vector<8xf32> to vector<8x1xf32>
    %cst_63 = arith.constant dense<0.000000e+00> : vector<8xf32>
    %227 = vector.multi_reduction <add>, %224, %cst_63 [1] : vector<8x4xf32> to vector<8xf32>
    %228 = vector.shape_cast %227 : vector<8xf32> to vector<8x1xf32>
    %229 = tpu.concatenate %226, %228 in 1 : vector<8x1xf32>, vector<8x1xf32> -> vector<8x2xf32>
    %c0_64 = arith.constant 0 : index
    %c0_65 = arith.constant 0 : index
    %230 = vector.load %arg16[%c0_64, %c0_65] : memref<8x2xf32, #tpu.memory_space<vmem>>, vector<8x2xf32>
    tpu.vector_store %arg16[%c0_64, %c0_65], %229 {strides = array<i32>} : memref<8x2xf32, #tpu.memory_space<vmem>>, vector<8x2xf32>,
    return
  }
}

</mosaic_0001>

<bundles_post_ra>
// kernel: actor_forward.1
= control target key start
LH: loop header
LB: loop body
LE: loop exit
PB: predicated region body
PF: predicated region fallthrough
CT: control target
= control target key end

     0   :  { %s3866_s0 = inlined_call_operand.vmem [shape: f32[8,8], index: 0, kind: input, shape index: {}]   ;;  %s3867_s1 = inlined_call_operand.vmem [shape: f32[64,4], index: 1, kind: input, shape index: {}]   ;;  %s3868_s2 = inlined_call_operand.vmem [shape: f32[8,4], index: 2, kind: input, shape index: {}]   ;;  %s3869_s3 = inlined_call_operand.hbm [shape: f32[8,512], index: 3, kind: input, shape index: {}]   ;;  %s3870_s4 = inlined_call_operand.vmem [shape: f32[1,512], index: 4, kind: input, shape index: {}]   ;;  %s3871_s5 = inlined_call_operand.hbm [shape: f32[512,128], index: 5, kind: input, shape index: {}]   ;;  %s3872_s6 = inlined_call_operand.hbm [shape: f32[1,128], index: 6, kind: input, shape index: {}]   ;;  %s3873_s7 = inlined_call_operand.vmem [shape: f32[128,64], index: 7, kind: input, shape index: {}]   ;;  %s3874_s8 = inlined_call_operand.hbm [shape: f32[1,64], index: 8, kind: input, shape index: {}]   ;;  %s3875_s9 = inlined_call_operand.vmem [shape: f32[4,512], index: 9, kind: input, shape index: {}]   ;;  %s3876_s10 = inlined_call_operand.hbm [shape: f32[128,512], index: 10, kind: input, shape index: {}]   ;;  %s3877_s11 = inlined_call_operand.vmem [shape: f32[1,512], index: 11, kind: input, shape index: {}]   ;;  %s3878_s12 = inlined_call_operand.hbm [shape: f32[64,256], index: 12, kind: input, shape index: {}]   ;;  %s3879_s13 = inlined_call_operand.vmem [shape: f32[128,256], index: 13, kind: input, shape index: {}]   ;;  %s3880_s14 = inlined_call_operand.vmem [shape: f32[1,256], index: 14, kind: input, shape index: {}]   ;;  %s3881_s15 = inlined_call_operand.vmem [shape: f32[8,4], index: 15, kind: output, shape index: {0}]   ;;  %s3882_s16 = inlined_call_operand.vmem [shape: f32[8,2], index: 16, kind: output, shape index: {1}]  }
   0x1   :  { %3977 = sst [smem:[#allocation72_spill]] %s3866_s0 }
   0x2   :  { %22 = vsyncpa [#allocation3], 0 }
   0x3   :  { %23 = vsyncpa [#allocation5], 0 }
   0x4   :  { %24 = vsyncpa [#allocation8], 0  ;;  %s49_s23 = sshll.u32 %s3871_s5, 4  ;;  %s50_s23 = int_to_ptr.hbm [resolvable:$true] %s49_s23 }
   0x5   :  { %25 = vsyncpa [#allocation11], 0  ;;  %s2532_s24 = smov [#allocation4]   ;;  %s76_s28 = sshll.u32 %s3874_s8, 4  ;;  %s77_s28 = int_to_ptr.hbm [resolvable:$true] %s76_s28 }
   0x6   :  { %s51_s25 = sshll.u32 %s2532_s24, 4  ;;  %s2533_s29 = smov 128   ;;  %s52_s25 = int_to_ptr.vmem [resolvable:$true] %s51_s25 }
   0x7   :  { %s2534_s30 = smov 8   ;;  %s2535_s0 = smov [#allocation7]  }
   0x8   :  { %57 = dma.hbm_to_vmem [thread:$0]  %s50_s23, 8192, %s52_s25, [#allocation5], %s2533_s29, %s2533_s29, %s2534_s30  }
   0x9   :  { %s78_s17 = sshll.u32 %s2535_s0, 4  ;;  %s37_s20 = sshll.u32 %s3869_s3, 4  ;;  %s79_s17 = int_to_ptr.vmem [resolvable:$true] %s78_s17  ;;  %s38_s20 = int_to_ptr.hbm [resolvable:$true] %s37_s20 }
   0xa   :  { %81 = dma.hbm_to_vmem [thread:$0]  %s77_s28, 16, %s79_s17, [#allocation8]  }
   0xb   :  { %s63_s22 = sshll.u32 %s3872_s6, 4  ;;  %s2536_s24 = smov [#allocation2]   ;;  %s64_s22 = int_to_ptr.hbm [resolvable:$true] %s63_s22 }
   0xc   :  { %s39_s26 = sshll.u32 %s2536_s24, 4  ;;  %s2537_s8 = smov [#allocation6]   ;;  %s40_s26 = int_to_ptr.vmem [resolvable:$true] %s39_s26 }
   0xd   :  { %42 = dma.hbm_to_vmem [thread:$0]  %s38_s20, 512, %s40_s26, [#allocation3]  }
   0xe   :  { %s65_s23 = sshll.u32 %s2537_s8, 4  ;;  %s88_s29 = sshll.u32 %s3876_s10, 4  ;;  %s66_s23 = int_to_ptr.vmem [resolvable:$true] %s65_s23  ;;  %s89_s29 = int_to_ptr.hbm [resolvable:$true] %s88_s29 }
   0xf   :  { %68 = dma.hbm_to_vmem [thread:$0]  %s64_s22, 16, %s66_s23, [#allocation5]  }
  0x10   :  { %s2538_s3 = smov [#allocation9]   ;;  %s103_s6 = sshll.u32 %s3878_s12, 4  ;;  %s104_s6 = int_to_ptr.hbm [resolvable:$true] %s103_s6 }
  0x11   :  { %s90_s28 = sshll.u32 %s2538_s3, 4  ;;  %s2539_s17 = smov 512   ;;  %s91_s28 = int_to_ptr.vmem [resolvable:$true] %s90_s28 }
  0x12   :  { %s2540_s18 = smov 32   ;;  %s2541_s19 = smov [#allocation10]  }
  0x13   :  { %96 = dma.hbm_to_vmem [thread:$0]  %s89_s29, 8192, %s91_s28, [#allocation8], %s2539_s17, %s2539_s17, %s2540_s18  }
  0x14   :  { %s105_s20 = sshll.u32 %s2541_s19, 4  ;;  %s2542_s5 = smov 256   ;;  %s106_s20 = int_to_ptr.vmem [resolvable:$true] %s105_s20 }
  0x15   :  { %s2543_s21 = smov 16  }
  0x16   :  { %111 = dma.hbm_to_vmem [thread:$0]  %s104_s6, 2048, %s106_s20, [#allocation11], %s2542_s5, %s2542_s5, %s2543_s21  }
  0x17   :  { %2524 = dma.done.wait [#allocation3], 512  }
  0x18   :  { %2525 = vsyncadd [#allocation3], 4294966784 }
  0x19   :  { %2526 = dma.done.wait [#allocation5], 8208  }
  0x1a   :  { %2527 = vsyncadd [#allocation5], 4294959088 }
  0x1b   :  { %2528 = dma.done.wait [#allocation8], 8208  }
  0x1c   :  { %2529 = vsyncadd [#allocation8], 4294959088 }
  0x1d   :  { %2530 = dma.done.wait [#allocation11], 2048  }
  0x1e   :  { %2531 = vsyncadd [#allocation11], 4294965248  ;;  %vm155_vm0 = vcmask 64512   ;;  %v143_v0 = vld [vmem:[#allocation2 + $0x10] sm:$0xff]  ;;  %s3978_s22 = sld [smem:[#allocation72_spill]]  ;;  %v144_v2 = vld [vmem:[#allocation2 + $0x18] sm:$0xff] }
  0x1f   :  { %214 = vmatpush.msra.mxu2 %v143_v0  ;;  %234 = vmatpush.msra.mxu3 %v144_v2  ;;  %v141_v3 = vld [vmem:[#allocation2] sm:$0xff]  ;;  %v142_v4 = vld [vmem:[#allocation2 + $0x8] sm:$0xff]  ;;  %v290_v5 = vld [vmem:[#allocation4 + $0x178] sm:$0xff]  ;;  %vm487_vm1 = vcmask 1043456   ;;  %vm462_vm2 = vcmask 31744  }
  0x20   :  { %v258_v6 = vld [vmem:[#allocation4 + $0x78] sm:$0xff]  ;;  %174 = vmatpush.msra.mxu0 %v141_v3  ;;  %194 = vmatpush.msra.mxu1 %v142_v4  ;;  %v289_v9 = vld [vmem:[#allocation4 + $0x170] sm:$0xff]  ;;  %v288_v13 = vld [vmem:[#allocation4 + $0x168] sm:$0xff] }
  0x21   :  { %v306_v7 = vld [vmem:[#allocation4 + $0x1f8] sm:$0xff]  ;;  %v257_v10 = vld [vmem:[#allocation4 + $0x70] sm:$0xff]  ;;  %351 = vmatpush.msrb.mxu2 %v290_v5  ;;  %v256_v14 = vld [vmem:[#allocation4 + $0x68] sm:$0xff] }
  0x22   :  { %v274_v8 = vld [vmem:[#allocation4 + $0xf8] sm:$0xff]  ;;  %311 = vmatpush.msrb.mxu0 %v258_v6  ;;  %v305_v11 = vld [vmem:[#allocation4 + $0x1f0] sm:$0xff]  ;;  %371 = vmatpush.msrb.mxu3 %v306_v7  ;;  %v304_v15 = vld [vmem:[#allocation4 + $0x1e8] sm:$0xff] }
  0x23   :  { %v273_v12 = vld [vmem:[#allocation4 + $0xf0] sm:$0xff]  ;;  %331 = vmatpush.msrb.mxu1 %v274_v8  ;;  %352 = vmatpush.msrb.mxu2 %v289_v9  ;;  %v272_v16 = vld [vmem:[#allocation4 + $0xe8] sm:$0xff]  ;;  %v287_v17 = vld [vmem:[#allocation4 + $0x160] sm:$0xff] }
  0x24   :  { %v140_v1 = vld [vmem:[%s3978_s22] sm:$0xff]  ;;  %312 = vmatpush.msrb.mxu0 %v257_v10  ;;  %372 = vmatpush.msrb.mxu3 %v305_v11  ;;  %v255_v18 = vld [vmem:[#allocation4 + $0x60] sm:$0xff]  ;;  %v285_v25 = vld [vmem:[#allocation4 + $0x150] sm:$0xff] }
  0x25   :  { %2098 = vmatmul.msk.f32.vlgmr.msra.gmra.mxu2 %vm155_vm0, %v140_v1  ;;  %2099 = vmatmul.msk.f32.vlgmr.msra.gmra.mxu3 %vm155_vm0, %v140_v1  ;;  %v303_v19 = vld [vmem:[#allocation4 + $0x1e0] sm:$0xff]  ;;  %v286_v21 = vld [vmem:[#allocation4 + $0x158] sm:$0xff]  ;;  %v253_v26 = vld [vmem:[#allocation4 + $0x50] sm:$0xff] }
  0x26   :  { %2096 = vmatmul.msk.f32.vlgmr.msra.gmra.mxu0 %vm155_vm0, %v140_v1  ;;  %2097 = vmatmul.msk.f32.vlgmr.msra.gmra.mxu1 %vm155_vm0, %v140_v1  ;;  %v271_v20 = vld [vmem:[#allocation4 + $0xe0] sm:$0xff]  ;;  %v254_v22 = vld [vmem:[#allocation4 + $0x58] sm:$0xff]  ;;  %v301_v27 = vld [vmem:[#allocation4 + $0x1d0] sm:$0xff] }
  0x27   :  { %332 = vmatpush.msrb.mxu1 %v273_v12  ;;  %353 = vmatpush.msrb.mxu2 %v288_v13  ;;  %v302_v23 = vld [vmem:[#allocation4 + $0x1d8] sm:$0xff]  ;;  %v269_v28 = vld [vmem:[#allocation4 + $0xd0] sm:$0xff]  ;;  %v284_v29 = vld [vmem:[#allocation4 + $0x148] sm:$0xff] }
  0x28   :  { %313 = vmatpush.msrb.mxu0 %v256_v14  ;;  %373 = vmatpush.msrb.mxu3 %v304_v15  ;;  %v270_v24 = vld [vmem:[#allocation4 + $0xd8] sm:$0xff]  ;;  %v252_v30 = vld [vmem:[#allocation4 + $0x48] sm:$0xff]  ;;  %v283_v33 = vld [vmem:[#allocation4 + $0x140] sm:$0xff] }
  0x29   :  { %333 = vmatpush.msrb.mxu1 %v272_v16  ;;  %354 = vmatpush.msrb.mxu2 %v287_v17  ;;  %v300_v31 = vld [vmem:[#allocation4 + $0x1c8] sm:$0xff]  ;;  %v251_v34 = vld [vmem:[#allocation4 + $0x40] sm:$0xff]  ;;  %v282_v35 = vld [vmem:[#allocation4 + $0x138] sm:$0xff] }
  0x2a   :  { %314 = vmatpush.msrb.mxu0 %v255_v18  ;;  %374 = vmatpush.msrb.mxu3 %v303_v19  ;;  %v268_v32 = vld [vmem:[#allocation4 + $0xc8] sm:$0xff]  ;;  %v299_v36 = vld [vmem:[#allocation4 + $0x1c0] sm:$0xff]  ;;  %v250_v38 = vld [vmem:[#allocation4 + $0x38] sm:$0xff] }
  0x2b   :  { %334 = vmatpush.msrb.mxu1 %v271_v20  ;;  %355 = vmatpush.msrb.mxu2 %v286_v21  ;;  %v267_v37 = vld [vmem:[#allocation4 + $0xc0] sm:$0xff]  ;;  %v298_v39 = vld [vmem:[#allocation4 + $0x1b8] sm:$0xff]  ;;  %v281_v41 = vld [vmem:[#allocation4 + $0x130] sm:$0xff] }
  0x2c   :  { %315 = vmatpush.msrb.mxu0 %v254_v22  ;;  %375 = vmatpush.msrb.mxu3 %v302_v23  ;;  %v266_v40 = vld [vmem:[#allocation4 + $0xb8] sm:$0xff]  ;;  %v249_v42 = vld [vmem:[#allocation4 + $0x30] sm:$0xff]  ;;  %v280_v45 = vld [vmem:[#allocation4 + $0x128] sm:$0xff] }
  0x2d   :  { %335 = vmatpush.msrb.mxu1 %v270_v24  ;;  %356 = vmatpush.msrb.mxu2 %v285_v25  ;;  %v297_v43 = vld [vmem:[#allocation4 + $0x1b0] sm:$0xff]  ;;  %v248_v46 = vld [vmem:[#allocation4 + $0x28] sm:$0xff]  ;;  %v279_v49 = vld [vmem:[#allocation4 + $0x120] sm:$0xff] }
  0x2e   :  { %316 = vmatpush.msrb.mxu0 %v253_v26  ;;  %376 = vmatpush.msrb.mxu3 %v301_v27  ;;  %v265_v44 = vld [vmem:[#allocation4 + $0xb0] sm:$0xff]  ;;  %v296_v47 = vld [vmem:[#allocation4 + $0x1a8] sm:$0xff]  ;;  %v247_v50 = vld [vmem:[#allocation4 + $0x20] sm:$0xff] }
  0x2f   :  { %336 = vmatpush.msrb.mxu1 %v269_v28  ;;  %357 = vmatpush.msrb.mxu2 %v284_v29  ;;  %v264_v48 = vld [vmem:[#allocation4 + $0xa8] sm:$0xff]  ;;  %v295_v51 = vld [vmem:[#allocation4 + $0x1a0] sm:$0xff]  ;;  %v278_v52 = vld [vmem:[#allocation4 + $0x118] sm:$0xff] }
  0x30   :  { %317 = vmatpush.msrb.mxu0 %v252_v30  ;;  %377 = vmatpush.msrb.mxu3 %v300_v31  ;;  %v246_v53 = vld [vmem:[#allocation4 + $0x18] sm:$0xff]  ;;  %v263_v54 = vld [vmem:[#allocation4 + $0xa0] sm:$0xff]  ;;  %v277_v55 = vld [vmem:[#allocation4 + $0x110] sm:$0xff] }
  0x31   :  { %337 = vmatpush.msrb.mxu1 %v268_v32  ;;  %358 = vmatpush.msrb.mxu2 %v283_v33  ;;  %v294_v56 = vld [vmem:[#allocation4 + $0x198] sm:$0xff]  ;;  %v245_v57 = vld [vmem:[#allocation4 + $0x10] sm:$0xff]  ;;  %v276_v59 = vld [vmem:[#allocation4 + $0x108] sm:$0xff] }
  0x32   :  { %318 = vmatpush.msrb.mxu0 %v251_v34  ;;  %378 = vmatpush.msrb.mxu3 %v299_v36  ;;  %v262_v58 = vld [vmem:[#allocation4 + $0x98] sm:$0xff]  ;;  %v293_v60 = vld [vmem:[#allocation4 + $0x190] sm:$0xff]  ;;  %v244_v61 = vld [vmem:[#allocation4 + $0x8] sm:$0xff] }
  0x33   :  { %338 = vmatpush.msrb.mxu1 %v267_v37  ;;  %359 = vmatpush.msrb.mxu2 %v282_v35  ;;  %v261_v62 = vld [vmem:[#allocation4 + $0x90] sm:$0xff]  ;;  %v275_v63 = vld [vmem:[#allocation4 + $0x100] sm:$0xff]  ;;  %v292_v0 = vld [vmem:[#allocation4 + $0x188] sm:$0xff] }
  0x34   :  { %319 = vmatpush.msrb.mxu0 %v250_v38  ;;  %379 = vmatpush.msrb.mxu3 %v298_v39  ;;  %v243_v1 = vld [vmem:[#allocation4] sm:$0xff]  ;;  %v260_v2 = vld [vmem:[#allocation4 + $0x88] sm:$0xff]  ;;  %v441_v5 = vld [vmem:[%s3875_s9] sm:$0xff] }
  0x35   :  { %339 = vmatpush.msrb.mxu1 %v266_v40  ;;  %360 = vmatpush.msrb.mxu2 %v281_v41  ;;  %v291_v3 = vld [vmem:[#allocation4 + $0x180] sm:$0xff]  ;;  %455 = vst [vmem:[#allocation1] ss:$2 sm:$0xff] %v441_v5  ;;  %v145_v9 = vld [vmem:[%s3870_s4] sm:$0xf]  ;;  %v2678_v28 = vld [vmem:[#allocation9 + $0x1e8] sm:$0xff] }
  0x36   :  { %320 = vmatpush.msrb.mxu0 %v249_v42  ;;  %380 = vmatpush.msrb.mxu3 %v297_v43  ;;  %v259_v4 = vld [vmem:[#allocation4 + $0x80] sm:$0xff]  ;;  %v147_v10 = vperm.slane %v145_v9, 0  ;;  %v148_v11 = vperm.slane %v145_v9, 1  ;;  %v149_v14 = vperm.slane %v145_v9, 2  ;;  %v150_v16 = vperm.slane %v145_v9, 3  ;;  %v2670_v27 = vld [vmem:[%s3867_s1] sm:$0xff] }
  0x37   :  { %340 = vmatpush.msrb.mxu1 %v265_v44  ;;  %361 = vmatpush.msrb.mxu2 %v280_v45  ;;  %v442_v8 = vld [vmem:[%s3875_s9 + $0x8] sm:$0xff]  ;;  %v2680_v29 = vld [vmem:[#allocation9 + $0x1c8] sm:$0xff]  ;;  %v2714_v38 = vld [vmem:[#allocation9 + $0x1f0] sm:$0xff] }
  0x38   :  { %321 = vmatpush.msrb.mxu0 %v248_v46  ;;  %381 = vmatpush.msrb.mxu3 %v296_v47  ;;  %457 = vst [vmem:[#allocation1 + $0x10] ss:$2 sm:$0xff] %v442_v8  ;;  %v2683_v30 = vld [vmem:[#allocation9 + $0x1e0] sm:$0xff]  ;;  %v2685_v31 = vld [vmem:[#allocation9 + $0x1a8] sm:$0xff]  ;;  %v2721_v41 = vld [vmem:[#allocation9 + $0x1d0] sm:$0xff] }
  0x39   :  { %341 = vmatpush.msrb.mxu1 %v264_v48  ;;  %362 = vmatpush.msrb.mxu2 %v279_v49  ;;  %v2691_v32 = vld [vmem:[%s3867_s1 + $0x8] sm:$0xff]  ;;  %v2696_v33 = vld [vmem:[#allocation9 + $0x188] sm:$0xff]  ;;  %v2745_v45 = vld [vmem:[#allocation9 + $0x1b0] sm:$0xff] }
  0x3a   :  { %322 = vmatpush.msrb.mxu0 %v247_v50  ;;  %382 = vmatpush.msrb.mxu3 %v295_v51  ;;  %v2704_v34 = vld [vmem:[#allocation9 + $0x1c0] sm:$0xff]  ;;  %v2706_v35 = vld [vmem:[#allocation9 + $0x168] sm:$0xff]  ;;  %v2753_v48 = vld [vmem:[#allocation9 + $0x190] sm:$0xff] }
  0x3b   :  { %363 = vmatpush.msrb.mxu2 %v278_v52  ;;  %342 = vmatpush.msrb.mxu1 %v263_v54  ;;  %v2708_v36 = vld [vmem:[#allocation9 + $0x1a0] sm:$0xff]  ;;  %v2712_v37 = vld [vmem:[#allocation9 + $0x148] sm:$0xff]  ;;  %v2760_v51 = vld [vmem:[#allocation9 + $0x170] sm:$0xff] }
  0x3c   :  { %323 = vmatpush.msrb.mxu0 %v246_v53  ;;  %383 = vmatpush.msrb.mxu3 %v294_v56  ;;  %v459_v6 = vld.sshfl [vmem:[#allocation1 + $0x8] sm:$0xff pattern:$0x75316420]  ;;  %v458_v7 = vld.sshfl [vmem:[#allocation1] sm:$0xff pattern:$0x75316420] }
  0x3d   :  { %364 = vmatpush.msrb.mxu2 %v277_v55  ;;  %343 = vmatpush.msrb.mxu1 %v262_v58  ;;  %v2717_v39 = vld [vmem:[#allocation9 + $0x180] sm:$0xff]  ;;  %v2719_v40 = vld [vmem:[#allocation9 + $0x128] sm:$0xff]  ;;  %v2776_v55 = vld [vmem:[#allocation9 + $0x150] sm:$0xff] }
  0x3e   :  { %324 = vmatpush.msrb.mxu0 %v245_v57  ;;  %384 = vmatpush.msrb.mxu3 %v293_v60  ;;  %v2726_v42 = vld [vmem:[%s3867_s1 + $0x10] sm:$0xff]  ;;  %v2767_v53 = vld [vmem:[%s3867_s1 + $0x18] sm:$0xff] }
  0x3f   :  { %365 = vmatpush.msrb.mxu2 %v276_v59  ;;  %344 = vmatpush.msrb.mxu1 %v261_v62  ;;  %v460_v18 = vld.sshfl [vmem:[#allocation1 + $0x10] sm:$0xff pattern:$0x75316420]  ;;  %v2791_v58 = vld [vmem:[#allocation9 + $0x130] sm:$0xff] }
  0x40   :  { %325 = vmatpush.msrb.mxu0 %v244_v61  ;;  %385 = vmatpush.msrb.mxu3 %v292_v0  ;;  %v2733_v43 = vld [vmem:[#allocation9 + $0x160] sm:$0xff]  ;;  %v2735_v44 = vld [vmem:[#allocation9 + $0x108] sm:$0xff]  ;;  %v2799_v61 = vld [vmem:[#allocation9 + $0x110] sm:$0xff] }
  0x41   :  { %366 = vmatpush.msrb.mxu2 %v275_v63  ;;  %345 = vmatpush.msrb.mxu1 %v260_v2  ;;  %v2747_v46 = vld [vmem:[#allocation9 + $0x140] sm:$0xff]  ;;  %v2749_v47 = vld [vmem:[#allocation9 + $0xe8] sm:$0xff]  ;;  %v2809_v0 = vld [vmem:[%s3867_s1 + $0x20] sm:$0xff] }
  0x42   :  { %326 = vmatpush.msrb.mxu0 %v243_v1  ;;  %386 = vmatpush.msrb.mxu3 %v291_v3  ;;  %v2755_v49 = vld [vmem:[#allocation9 + $0x120] sm:$0xff]  ;;  %v2757_v50 = vld [vmem:[#allocation9 + $0xc8] sm:$0xff]  ;;  %v2813_v1 = vld [vmem:[#allocation9 + $0xf0] sm:$0xff] }
  0x43   :  { %346 = vmatpush.msrb.mxu1 %v259_v4  ;;  %2109 = vmatpush.msk.msra.mxu2 %vm487_vm1, %v459_v6  ;;  %3979 = vst [vmem:[#allocation16_spill] sm:$0xff] %v2757_v50  ;;  %v2762_v52 = vld [vmem:[#allocation9 + $0x100] sm:$0xff]  ;;  %v2771_v54 = vld [vmem:[#allocation9 + $0xa8] sm:$0xff]  ;;  %v2827_v5 = vld [vmem:[#allocation9 + $0xd0] sm:$0xff] }
  0x44   :  { %2118 = vmatpush.msk.msra.mxu3 %vm487_vm1, %v460_v18  ;;  %3980 = vst [vmem:[#allocation17_spill] sm:$0xff] %v2771_v54  ;;  %v2778_v56 = vld [vmem:[#allocation9 + $0xe0] sm:$0xff]  ;;  %v2783_v57 = vld [vmem:[#allocation9 + $0x88] sm:$0xff]  ;;  %v2839_v8 = vld [vmem:[#allocation9 + $0xb0] sm:$0xff] }
  0x45   :  { %2100 = vmatpush.msk.msra.mxu1 %vm487_vm1, %v458_v7  ;;  %3981 = vst [vmem:[#allocation18_spill] sm:$0xff] %v2783_v57  ;;  %v2793_v59 = vld [vmem:[#allocation9 + $0xc0] sm:$0xff]  ;;  %v2795_v60 = vld [vmem:[#allocation9 + $0x68] sm:$0xff]  ;;  %v2874_v18 = vld [vmem:[#allocation9 + $0x50] sm:$0xff] }
  0x46   :  { %3982 = vst [vmem:[#allocation19_spill] sm:$0xff] %v2795_v60  ;;  %v2802_v62 = vld [vmem:[#allocation9 + $0xa0] sm:$0xff]  ;;  %v2804_v63 = vld [vmem:[#allocation9 + $0x48] sm:$0xff] }
  0x47   :  { %3983 = vst [vmem:[#allocation20_spill] sm:$0xff] %v2802_v62  ;;  %v407_v2 = vld [vmem:[%s3873_s7 + $0x78] sm:$0xff]  ;;  %v2820_v3 = vld [vmem:[#allocation9 + $0x80] sm:$0xff] }
  0x48   :  { %3984 = vst [vmem:[#allocation21_spill] sm:$0xff] %v2804_v63  ;;  %v2822_v4 = vld [vmem:[#allocation9 + $0x28] sm:$0xff]  ;;  %412 = vmatpush.msra.mxu0 %v407_v2  ;;  %v2829_v6 = vld [vmem:[#allocation9 + $0x60] sm:$0xff] }
  0x49   :  { %3985 = vst [vmem:[#allocation22_spill] sm:$0xff] %v2820_v3  ;;  %v2833_v7 = vld [vmem:[#allocation9 + $0x8] sm:$0xff] }
  0x4a   :  { %3986 = vst [vmem:[#allocation23_spill] sm:$0xff] %v2822_v4  ;;  %v406_v9 = vld [vmem:[%s3873_s7 + $0x70] sm:$0xff] }
  0x4b   :  { %3987 = vst [vmem:[#allocation24_spill] sm:$0xff] %v2827_v5  ;;  %413 = vmatpush.msra.mxu0 %v406_v9  ;;  %v398_v2 = vld [vmem:[%s3873_s7 + $0x30] sm:$0xff]  ;;  %v2931_v9 = vld [vmem:[%s3867_s1 + $0x38] sm:$0xff] }
  0x4c   :  { %3988 = vst [vmem:[#allocation25_spill] sm:$0xff] %v2829_v6 }
  0x4d   :  { %3989 = vst [vmem:[#allocation26_spill] sm:$0xff] %v2833_v7 }
  0x4e   :  { %3990 = vst [vmem:[#allocation27_spill] sm:$0xff] %v2839_v8 }
  0x4f   :  { %3996 = vst [vmem:[#allocation33_spill] sm:$0xff] %v2874_v18 }
  0xa3   :  { %v176_v12 = vpop.f32.mrf.mxu0  ;;  %v196_v13 = vpop.f32.mrf.mxu1 }
  0xa4   :  { %v177_v15 = vadd.f32 %v176_v12, %v147_v10  ;;  %v197_v17 = vadd.f32 %v196_v13, %v148_v11  ;;  %v2844_v10 = vld [vmem:[#allocation9 + $0x40] sm:$0xff]  ;;  %v2852_v12 = vld [vmem:[#allocation9 + $0x90] sm:$0xff] }
  0xa5   :  { %3991 = vst [vmem:[#allocation28_spill] sm:$0xff] %v2844_v10  ;;  %v405_v11 = vld [vmem:[%s3873_s7 + $0x68] sm:$0xff] }
  0xa6   :  { %v239_v19 = vmax.f32 %v177_v15, 0.0  ;;  %v240_v20 = vmax.f32 %v197_v17, 0.0  ;;  %3992 = vst [vmem:[#allocation29_spill] sm:$0xff] %v2852_v12  ;;  %v2854_v13 = vld [vmem:[#allocation9 + $0x20] sm:$0xff]  ;;  %v404_v15 = vld [vmem:[%s3873_s7 + $0x60] sm:$0xff]  ;;  %414 = vmatpush.msra.mxu0 %v405_v11  ;;  %v3883_v11 = vmov 0.0  }
  0xa7   :  { %3993 = vst [vmem:[#allocation30_spill] sm:$0xff] %v2854_v13  ;;  %v2870_v17 = vld [vmem:[#allocation9] sm:$0xff] }
  0xa8   :  { %v216_v21 = vpop.f32.mrf.mxu2  ;;  %v236_v22 = vpop.f32.mrf.mxu3  ;;  %327 = vmatmul.f32.vlgmr.msrb.gmra.mxu0 %v239_v19  ;;  %347 = vmatmul.f32.vlgmr.msrb.gmra.mxu1 %v240_v20  ;;  %3995 = vst [vmem:[#allocation32_spill] sm:$0xff] %v2870_v17  ;;  %v403_v19 = vld [vmem:[%s3873_s7 + $0x58] sm:$0xff] }
  0xa9   :  { %v217_v23 = vadd.f32 %v216_v21, %v149_v14  ;;  %v237_v24 = vadd.f32 %v236_v22, %v150_v16  ;;  %724 = vmatpush.msrb.mxu1 %v2683_v30  ;;  %v2859_v14 = vld [vmem:[%s3867_s1 + $0x28] sm:$0xff]  ;;  %v2868_v16 = vld [vmem:[#allocation9 + $0x70] sm:$0xff]  ;;  %415 = vmatpush.msra.mxu0 %v404_v15  ;;  %v402_v21 = vld [vmem:[%s3873_s7 + $0x50] sm:$0xff] }
  0xaa   :  { %3994 = vst [vmem:[#allocation31_spill] sm:$0xff] %v2868_v16  ;;  %v2886_v20 = vld [vmem:[#allocation9 + $0x30] sm:$0xff]  ;;  %v397_v15 = vld [vmem:[%s3873_s7 + $0x28] sm:$0xff] }
  0xab   :  { %v241_v25 = vmax.f32 %v217_v23, 0.0  ;;  %v242_v26 = vmax.f32 %v237_v24, 0.0  ;;  %725 = vmatpush.msrb.mxu1 %v2704_v34  ;;  %3997 = vst [vmem:[#allocation34_spill] sm:$0xff] %v2886_v20  ;;  %416 = vmatpush.msra.mxu0 %v403_v19  ;;  %v2892_v22 = vld [vmem:[#allocation9 + $0x10] sm:$0xff]  ;;  %v401_v23 = vld [vmem:[%s3873_s7 + $0x48] sm:$0xff]  ;;  %v2902_v24 = vld [vmem:[%s3867_s1 + $0x30] sm:$0xff] }
  0xac   :  { %3998 = vst [vmem:[#allocation35_spill] sm:$0xff] %v2892_v22  ;;  %v396_v19 = vld [vmem:[%s3873_s7 + $0x20] sm:$0xff] }
  0xad   :  { %367 = vmatmul.f32.vlgmr.msrb.gmra.mxu2 %v241_v25  ;;  %387 = vmatmul.f32.vlgmr.msrb.gmra.mxu3 %v242_v26  ;;  %v400_v25 = vld [vmem:[%s3873_s7 + $0x40] sm:$0xff]  ;;  %v399_v26 = vld [vmem:[%s3873_s7 + $0x38] sm:$0xff] }
  0xae   :  { %744 = vmatpush.msrb.mxu2 %v2678_v28  ;;  %764 = vmatpush.msrb.mxu3 %v2714_v38 }
  0xaf   :  { %726 = vmatpush.msrb.mxu1 %v2708_v36  ;;  %417 = vmatpush.msra.mxu0 %v402_v21  ;;  %v395_v21 = vld [vmem:[%s3873_s7 + $0x18] sm:$0xff] }
  0xb0   :  { %2101 = vmatmul.msk.f32.vlgmr.msra.gmra.mxu1 %vm462_vm2, %v2670_v27  ;;  %745 = vmatpush.msrb.mxu2 %v2680_v29 }
  0xb1   :  { %765 = vmatpush.msrb.mxu3 %v2721_v41  ;;  %727 = vmatpush.msrb.mxu1 %v2717_v39 }
  0xb2   :  { %746 = vmatpush.msrb.mxu2 %v2685_v31  ;;  %418 = vmatpush.msra.mxu0 %v401_v23  ;;  %v394_v23 = vld [vmem:[%s3873_s7 + $0x10] sm:$0xff] }
  0xb3   :  { %728 = vmatpush.msrb.mxu1 %v2733_v43  ;;  %766 = vmatpush.msrb.mxu3 %v2745_v45 }
  0xb4   :  { %747 = vmatpush.msrb.mxu2 %v2696_v33  ;;  %419 = vmatpush.msra.mxu0 %v400_v25  ;;  %v393_v25 = vld [vmem:[%s3873_s7 + $0x8] sm:$0xff] }
  0xb5   :  { %2110 = vmatmul.msk.f32.vlgmr.msra.gmra.mxu2 %vm462_vm2, %v2670_v27  ;;  %2119 = vmatmul.msk.f32.vlgmr.msra.gmra.mxu3 %vm462_vm2, %v2670_v27 }
  0xb6   :  { %748 = vmatpush.msrb.mxu2 %v2706_v35  ;;  %729 = vmatpush.msrb.mxu1 %v2747_v46 }
  0xb7   :  { %767 = vmatpush.msrb.mxu3 %v2753_v48  ;;  %420 = vmatpush.msra.mxu0 %v399_v26  ;;  %v392_v26 = vld [vmem:[%s3873_s7] sm:$0xff] }
  0xb8   :  { %2102 = vmatmul.msk.f32.gmra.mxu1 %vm462_vm2, %v2691_v32  ;;  %749 = vmatpush.msrb.mxu2 %v2712_v37 }
  0xb9   :  { %730 = vmatpush.msrb.mxu1 %v2755_v49  ;;  %768 = vmatpush.msrb.mxu3 %v2760_v51 }
  0xba   :  { %750 = vmatpush.msrb.mxu2 %v2719_v40  ;;  %421 = vmatpush.msra.mxu0 %v398_v2  ;;  %v461_v2 = vld.sshfl [vmem:[#allocation1 + $0x18] sm:$0xff pattern:$0x75316420] }
  0xbb   :  { %731 = vmatpush.msrb.mxu1 %v2762_v52  ;;  %769 = vmatpush.msrb.mxu3 %v2776_v55 }
  0xbc   :  { %751 = vmatpush.msrb.mxu2 %v2735_v44  ;;  %422 = vmatpush.msra.mxu0 %v397_v15  ;;  %v2176_v15 = vld [vmem:[#allocation6] ss:$0 sm:$0xff] }
  0xbd   :  { %2111 = vmatmul.msk.f32.gmra.mxu2 %vm462_vm2, %v2691_v32  ;;  %2120 = vmatmul.msk.f32.gmra.mxu3 %vm462_vm2, %v2691_v32 }
  0xbe   :  { %752 = vmatpush.msrb.mxu2 %v2749_v47  ;;  %732 = vmatpush.msrb.mxu1 %v2778_v56 }
  0xbf   :  { %770 = vmatpush.msrb.mxu3 %v2791_v58  ;;  %423 = vmatpush.msra.mxu0 %v396_v19 }
  0xc0   :  { %2103 = vmatmul.msk.f32.gmra.mxu1 %vm462_vm2, %v2726_v42  ;;  %753 = vmatpush.msrb.mxu2 %v2757_v50 }
  0xc1   :  { %733 = vmatpush.msrb.mxu1 %v2793_v59  ;;  %771 = vmatpush.msrb.mxu3 %v2799_v61 }
  0xc2   :  { %754 = vmatpush.msrb.mxu2 %v2771_v54  ;;  %424 = vmatpush.msra.mxu0 %v395_v21 }
  0xc3   :  { %734 = vmatpush.msrb.mxu1 %v2802_v62  ;;  %772 = vmatpush.msrb.mxu3 %v2813_v1 }
  0xc4   :  { %755 = vmatpush.msrb.mxu2 %v2783_v57  ;;  %425 = vmatpush.msra.mxu0 %v394_v23 }
  0xc5   :  { %2112 = vmatmul.msk.f32.gmra.mxu2 %vm462_vm2, %v2726_v42  ;;  %2121 = vmatmul.msk.f32.gmra.mxu3 %vm462_vm2, %v2726_v42 }
  0xc6   :  { %756 = vmatpush.msrb.mxu2 %v2795_v60  ;;  %735 = vmatpush.msrb.mxu1 %v2820_v3 }
  0xc7   :  { %773 = vmatpush.msrb.mxu3 %v2827_v5  ;;  %426 = vmatpush.msra.mxu0 %v393_v25 }
  0xc8   :  { %2104 = vmatmul.msk.f32.gmra.mxu1 %vm462_vm2, %v2767_v53  ;;  %757 = vmatpush.msrb.mxu2 %v2804_v63 }
  0xc9   :  { %736 = vmatpush.msrb.mxu1 %v2829_v6  ;;  %774 = vmatpush.msrb.mxu3 %v2839_v8 }
  0xca   :  { %758 = vmatpush.msrb.mxu2 %v2822_v4  ;;  %427 = vmatpush.msra.mxu0 %v392_v26 }
  0xcb   :  { %737 = vmatpush.msrb.mxu1 %v2844_v10  ;;  %775 = vmatpush.msrb.mxu3 %v2852_v12 }
  0xcc   :  { %759 = vmatpush.msrb.mxu2 %v2833_v7  ;;  %2127 = vmatpush.msk.msrb.mxu0 %vm487_vm1, %v461_v2 }
  0xcd   :  { %2113 = vmatmul.msk.f32.gmra.mxu2 %vm462_vm2, %v2767_v53  ;;  %2122 = vmatmul.msk.f32.gmra.mxu3 %vm462_vm2, %v2767_v53 }
  0xce   :  { %738 = vmatpush.msrb.mxu1 %v2854_v13  ;;  %891 = vmatpush.msra.mxu2 %v2678_v28 }
  0xcf   :  { %776 = vmatpush.msrb.mxu3 %v2868_v16 }
  0xd0   :  { %2105 = vmatmul.msk.f32.gmra.mxu1 %vm462_vm2, %v2809_v0  ;;  %892 = vmatpush.msra.mxu2 %v2680_v29 }
  0xd1   :  { %739 = vmatpush.msrb.mxu1 %v2870_v17  ;;  %777 = vmatpush.msrb.mxu3 %v2874_v18 }
  0xd2   :  { %893 = vmatpush.msra.mxu2 %v2685_v31 }
  0xd3   :  { %871 = vmatpush.msra.mxu1 %v2683_v30  ;;  %778 = vmatpush.msrb.mxu3 %v2886_v20 }
  0xd4   :  { %894 = vmatpush.msra.mxu2 %v2696_v33 }
  0xd5   :  { %2114 = vmatmul.msk.f32.gmra.mxu2 %vm462_vm2, %v2809_v0  ;;  %2123 = vmatmul.msk.f32.gmra.mxu3 %vm462_vm2, %v2809_v0 }
  0xd6   :  { %779 = vmatpush.msrb.mxu3 %v2892_v22  ;;  %872 = vmatpush.msra.mxu1 %v2704_v34 }
  0xd7   :  { %895 = vmatpush.msra.mxu2 %v2706_v35 }
  0xd8   :  { %2106 = vmatmul.msk.f32.gmra.mxu1 %vm462_vm2, %v2859_v14  ;;  %911 = vmatpush.msra.mxu3 %v2714_v38 }
  0xd9   :  { %873 = vmatpush.msra.mxu1 %v2708_v36  ;;  %896 = vmatpush.msra.mxu2 %v2712_v37 }
  0xda   :  { %912 = vmatpush.msra.mxu3 %v2721_v41 }
  0xdb   :  { %874 = vmatpush.msra.mxu1 %v2717_v39  ;;  %897 = vmatpush.msra.mxu2 %v2719_v40 }
  0xdc   :  { %913 = vmatpush.msra.mxu3 %v2745_v45 }
  0xdd   :  { %2115 = vmatmul.msk.f32.gmra.mxu2 %vm462_vm2, %v2859_v14  ;;  %2124 = vmatmul.msk.f32.gmra.mxu3 %vm462_vm2, %v2859_v14 }
  0xde   :  { %914 = vmatpush.msra.mxu3 %v2753_v48  ;;  %875 = vmatpush.msra.mxu1 %v2733_v43 }
  0xdf   :  { %898 = vmatpush.msra.mxu2 %v2735_v44 }
  0xe0   :  { %2107 = vmatmul.msk.f32.gmra.mxu1 %vm462_vm2, %v2902_v24  ;;  %915 = vmatpush.msra.mxu3 %v2760_v51 }
  0xe1   :  { %876 = vmatpush.msra.mxu1 %v2747_v46  ;;  %899 = vmatpush.msra.mxu2 %v2749_v47 }
  0xe2   :  { %916 = vmatpush.msra.mxu3 %v2776_v55 }
  0xe3   :  { %877 = vmatpush.msra.mxu1 %v2755_v49  ;;  %900 = vmatpush.msra.mxu2 %v2757_v50 }
  0xe4   :  { %917 = vmatpush.msra.mxu3 %v2791_v58 }
  0xe5   :  { %2116 = vmatmul.msk.f32.gmra.mxu2 %vm462_vm2, %v2902_v24  ;;  %2125 = vmatmul.msk.f32.gmra.mxu3 %vm462_vm2, %v2902_v24 }
  0xe6   :  { %878 = vmatpush.msra.mxu1 %v2762_v52  ;;  %918 = vmatpush.msra.mxu3 %v2799_v61 }
  0xe7   :  { %901 = vmatpush.msra.mxu2 %v2771_v54 }
  0xe8   :  { %2108 = vmatmul.msk.f32.gmra.mxu1 %vm462_vm2, %v2931_v9  ;;  %919 = vmatpush.msra.mxu3 %v2813_v1 }
  0xe9   :  { %879 = vmatpush.msra.mxu1 %v2778_v56  ;;  %902 = vmatpush.msra.mxu2 %v2783_v57 }
  0xea   :  { %920 = vmatpush.msra.mxu3 %v2827_v5 }
  0xeb   :  { %880 = vmatpush.msra.mxu1 %v2793_v59  ;;  %903 = vmatpush.msra.mxu2 %v2795_v60 }
  0xec   :  { %921 = vmatpush.msra.mxu3 %v2839_v8 }
  0xed   :  { %2117 = vmatmul.msk.f32.gmra.mxu2 %vm462_vm2, %v2931_v9  ;;  %2126 = vmatmul.msk.f32.gmra.mxu3 %vm462_vm2, %v2931_v9 }
  0xee   :  { %881 = vmatpush.msra.mxu1 %v2802_v62  ;;  %922 = vmatpush.msra.mxu3 %v2852_v12 }
  0xef   :  { %904 = vmatpush.msra.mxu2 %v2804_v63 }
  0xf0   :  { %740 = vmatmul.f32.vlgmr.msrb.gmra.mxu1 %v3883_v11  ;;  %923 = vmatpush.msra.mxu3 %v2868_v16 }
  0xf1   :  { %882 = vmatpush.msra.mxu1 %v2820_v3  ;;  %905 = vmatpush.msra.mxu2 %v2822_v4 }
  0xf2   :  { %924 = vmatpush.msra.mxu3 %v2874_v18 }
  0xf3   :  { %883 = vmatpush.msra.mxu1 %v2829_v6  ;;  %906 = vmatpush.msra.mxu2 %v2833_v7 }
  0xf4   :  { %925 = vmatpush.msra.mxu3 %v2886_v20 }
  0xf5   :  { %760 = vmatmul.f32.vlgmr.msrb.gmra.mxu2 %v3883_v11  ;;  %780 = vmatmul.f32.vlgmr.msrb.gmra.mxu3 %v3883_v11 }
  0xf6   :  { %884 = vmatpush.msra.mxu1 %v2844_v10  ;;  %926 = vmatpush.msra.mxu3 %v2892_v22 }
  0xf7   :  { %1038 = vmatpush.msrb.mxu2 %v2678_v28 }
  0xf8   :  { %885 = vmatpush.msra.mxu1 %v2854_v13  ;;  %1058 = vmatpush.msrb.mxu3 %v2714_v38 }
  0xf9   :  { %1039 = vmatpush.msrb.mxu2 %v2680_v29 }
  0xfa   :  { %886 = vmatpush.msra.mxu1 %v2870_v17  ;;  %1059 = vmatpush.msrb.mxu3 %v2721_v41 }
  0xfb   :  { %1040 = vmatpush.msrb.mxu2 %v2685_v31 }
  0xfc   :  { %1018 = vmatpush.msrb.mxu1 %v2683_v30  ;;  %1060 = vmatpush.msrb.mxu3 %v2745_v45 }
  0xfd   :  { %1041 = vmatpush.msrb.mxu2 %v2696_v33 }
  0xfe   :  { %1019 = vmatpush.msrb.mxu1 %v2704_v34  ;;  %1061 = vmatpush.msrb.mxu3 %v2753_v48 }
  0xff   :  { %1042 = vmatpush.msrb.mxu2 %v2706_v35 }
 0x100   :  { %1020 = vmatpush.msrb.mxu1 %v2708_v36  ;;  %1062 = vmatpush.msrb.mxu3 %v2760_v51 }
 0x101   :  { %1043 = vmatpush.msrb.mxu2 %v2712_v37 }
 0x102   :  { %1021 = vmatpush.msrb.mxu1 %v2717_v39  ;;  %1063 = vmatpush.msrb.mxu3 %v2776_v55 }
 0x103   :  { %1044 = vmatpush.msrb.mxu2 %v2719_v40 }
 0x104   :  { %1022 = vmatpush.msrb.mxu1 %v2733_v43  ;;  %1064 = vmatpush.msrb.mxu3 %v2791_v58 }
 0x105   :  { %1045 = vmatpush.msrb.mxu2 %v2735_v44 }
 0x106   :  { %1023 = vmatpush.msrb.mxu1 %v2747_v46  ;;  %1065 = vmatpush.msrb.mxu3 %v2799_v61 }
 0x107   :  { %1046 = vmatpush.msrb.mxu2 %v2749_v47 }
 0x108   :  { %1024 = vmatpush.msrb.mxu1 %v2755_v49  ;;  %1066 = vmatpush.msrb.mxu3 %v2813_v1 }
 0x109   :  { %1047 = vmatpush.msrb.mxu2 %v2757_v50 }
 0x10a   :  { %1025 = vmatpush.msrb.mxu1 %v2762_v52  ;;  %1067 = vmatpush.msrb.mxu3 %v2827_v5 }
 0x10b   :  { %1048 = vmatpush.msrb.mxu2 %v2771_v54 }
 0x10c   :  { %1026 = vmatpush.msrb.mxu1 %v2778_v56  ;;  %1068 = vmatpush.msrb.mxu3 %v2839_v8 }
 0x10d   :  { %1049 = vmatpush.msrb.mxu2 %v2783_v57  ;;  %v3112_v57 = vld [vmem:[#allocation9 + $0xb8] sm:$0xff] }
 0x10e   :  { %1027 = vmatpush.msrb.mxu1 %v2793_v59  ;;  %1069 = vmatpush.msrb.mxu3 %v2852_v12  ;;  %4004 = vst [vmem:[#allocation41_spill] sm:$0xff] %v3112_v57 }
 0x10f   :  { %1050 = vmatpush.msrb.mxu2 %v2795_v60 }
 0x110   :  { %1028 = vmatpush.msrb.mxu1 %v2802_v62  ;;  %1070 = vmatpush.msrb.mxu3 %v2868_v16  ;;  %v3095_v16 = vld [vmem:[#allocation9 + $0xf8] sm:$0xff] }
 0x111   :  { %1051 = vmatpush.msrb.mxu2 %v2804_v63  ;;  %v3047_v63 = vld [vmem:[#allocation9 + $0x1f8] sm:$0xff] }
 0x112   :  { %1029 = vmatpush.msrb.mxu1 %v2820_v3  ;;  %1071 = vmatpush.msrb.mxu3 %v2874_v18  ;;  %v3143_v62 = vld [vmem:[#allocation9 + $0x18] sm:$0xff] }
 0x113   :  { %1052 = vmatpush.msrb.mxu2 %v2822_v4  ;;  %v3086_v4 = vld [vmem:[#allocation9 + $0x138] sm:$0xff]  ;;  %4013 = vst [vmem:[#allocation50_spill] sm:$0xff] %v3143_v62 }
 0x114   :  { %1030 = vmatpush.msrb.mxu1 %v2829_v6  ;;  %1072 = vmatpush.msrb.mxu3 %v2886_v20  ;;  %v3049_v20 = vld [vmem:[#allocation9 + $0x1d8] sm:$0xff] }
 0x115   :  { %1053 = vmatpush.msrb.mxu2 %v2833_v7  ;;  %v3056_v7 = vld [vmem:[#allocation9 + $0x1b8] sm:$0xff] }
 0x116   :  { %1031 = vmatpush.msrb.mxu1 %v2844_v10  ;;  %1073 = vmatpush.msrb.mxu3 %v2892_v22 }
 0x118   :  { %1032 = vmatpush.msrb.mxu1 %v2854_v13 }
 0x11a   :  { %1033 = vmatpush.msrb.mxu1 %v2870_v17 }
 0x125   :  { %v328_v19 = vpop.f32.mrf.mxu0  ;;  %v348_v23 = vpop.f32.mrf.mxu1 }
 0x126   :  { %v329_v21 = vadd.f32 %v2176_v15, %v328_v19  ;;  %v3059_v15 = vld [vmem:[#allocation9 + $0x198] sm:$0xff] }
 0x127   :  { %v3075_v19 = vld [vmem:[#allocation9 + $0x158] sm:$0xff] }
 0x128   :  { %v349_v25 = vadd.f32 %v348_v23, %v329_v21 }
 0x12d   :  { %v3051_v17 = vpop.f32.mrf.mxu1 }
 0x130   :  { %v368_v26 = vpop.f32.mrf.mxu2  ;;  %v388_v2 = vpop.f32.mrf.mxu3 }
 0x131   :  { %v369_v11 = vadd.f32 %v368_v26, %v349_v25 }
 0x133   :  { %v389_v18 = vadd.f32 %v388_v2, %v369_v11 }
 0x135   :  { %v391_v13 = vmax.f32 %v389_v18, 0.0  ;;  %v3064_v18 = vld [vmem:[%s3877_s11] sm:$0xf]  ;;  %v516_v23 = vpop.f32.mrf.mxu1 }
 0x136   :  { %v3071_v11 = vperm.slane %v3064_v18, 0  ;;  %v3078_v21 = vperm.slane %v3064_v18, 1  ;;  %v3099_v60 = vperm.slane %v3064_v18, 2 }
 0x137   :  { %428 = vmatmul.f32.vlgmr.msra.gmra.mxu0 %v391_v13  ;;  %v3067_v13 = vld [vmem:[#allocation9 + $0x178] sm:$0xff] }
 0x138   :  { %784 = vmatpush.msra.mxu0 %v3047_v63  ;;  %v3054_v22 = vpop.f32.mrf.mxu2  ;;  %v3080_v25 = vpop.f32.mrf.mxu3  ;;  %v3084_v26 = vadd.f32 %v516_v23, %v3071_v11  ;;  %v3103_v23 = vld [vmem:[#allocation9 + $0xd8] sm:$0xff] }
 0x139   :  { %4001 = vst [vmem:[#allocation38_spill] sm:$0xff] %v3103_v23 }
 0x13a   :  { %785 = vmatpush.msra.mxu0 %v3049_v20  ;;  %3999 = vst [vmem:[#allocation36_spill] sm:$0xff] %v3084_v26 }
 0x13c   :  { %786 = vmatpush.msra.mxu0 %v3056_v7 }
 0x13e   :  { %787 = vmatpush.msra.mxu0 %v3059_v15 }
 0x13f   :  { %2128 = vmatmul.msk.f32.vlgmr.msrb.gmra.mxu0 %vm462_vm2, %v2670_v27  ;;  %v3092_v27 = vld [vmem:[#allocation9 + $0x118] sm:$0xff] }
 0x140   :  { %788 = vmatpush.msra.mxu0 %v3067_v13  ;;  %v557_v2 = vpop.f32.mrf.mxu2 }
 0x141   :  { %v3089_v10 = vadd.f32 %v557_v2, %v3078_v21  ;;  %v519_v2 = vpop.f32.mrf.mxu1 }
 0x142   :  { %789 = vmatpush.msra.mxu0 %v3075_v19  ;;  %v3107_v26 = vadd.f32 %v519_v2, %v3071_v11  ;;  %v3124_v2 = vld [vmem:[#allocation9 + $0x78] sm:$0xff] }
 0x143   :  { %4000 = vst [vmem:[#allocation37_spill] sm:$0xff] %v3089_v10  ;;  %v598_v10 = vpop.f32.mrf.mxu3 }
 0x144   :  { %790 = vmatpush.msra.mxu0 %v3086_v4  ;;  %4002 = vst [vmem:[#allocation39_spill] sm:$0xff] %v3107_v26  ;;  %v3110_v12 = vadd.f32 %v598_v10, %v3099_v60  ;;  %v3126_v10 = vld [vmem:[#allocation9 + $0x58] sm:$0xff] }
 0x145   :  { %4007 = vst [vmem:[#allocation44_spill] sm:$0xff] %v3124_v2 }
 0x146   :  { %791 = vmatpush.msra.mxu0 %v3092_v27  ;;  %4003 = vst [vmem:[#allocation40_spill] sm:$0xff] %v3110_v12 }
 0x147   :  { %2129 = vmatmul.msk.f32.gmra.mxu0 %vm462_vm2, %v2691_v32  ;;  %v3118_v32 = vld [vmem:[#allocation9 + $0x98] sm:$0xff]  ;;  %4008 = vst [vmem:[#allocation45_spill] sm:$0xff] %v3126_v10 }
 0x148   :  { %792 = vmatpush.msra.mxu0 %v3095_v16  ;;  %v560_v6 = vpop.f32.mrf.mxu2  ;;  %4006 = vst [vmem:[#allocation43_spill] sm:$0xff] %v3118_v32 }
 0x149   :  { %v3115_v3 = vadd.f32 %v560_v6, %v3078_v21  ;;  %v522_v26 = vpop.f32.mrf.mxu1 }
 0x14a   :  { %793 = vmatpush.msra.mxu0 %v3103_v23  ;;  %v3130_v6 = vadd.f32 %v522_v26, %v3071_v11 }
 0x14b   :  { %4005 = vst [vmem:[#allocation42_spill] sm:$0xff] %v3115_v3  ;;  %v601_v12 = vpop.f32.mrf.mxu3 }
 0x14c   :  { %794 = vmatpush.msra.mxu0 %v3112_v57  ;;  %4009 = vst [vmem:[#allocation46_spill] sm:$0xff] %v3130_v6  ;;  %v3133_v8 = vadd.f32 %v601_v12, %v3099_v60 }
 0x14e   :  { %795 = vmatpush.msra.mxu0 %v3118_v32  ;;  %4010 = vst [vmem:[#allocation47_spill] sm:$0xff] %v3133_v8 }
 0x14f   :  { %2130 = vmatmul.msk.f32.gmra.mxu0 %vm462_vm2, %v2726_v42  ;;  %v3141_v42 = vld [vmem:[#allocation9 + $0x38] sm:$0xff] }
 0x150   :  { %796 = vmatpush.msra.mxu0 %v3124_v2  ;;  %v563_v3 = vpop.f32.mrf.mxu2  ;;  %4012 = vst [vmem:[#allocation49_spill] sm:$0xff] %v3141_v42 }
 0x151   :  { %v3136_v54 = vadd.f32 %v563_v3, %v3078_v21  ;;  %v525_v5 = vpop.f32.mrf.mxu1 }
 0x152   :  { %797 = vmatpush.msra.mxu0 %v3126_v10  ;;  %v3147_v26 = vadd.f32 %v525_v5, %v3071_v11 }
 0x153   :  { %4011 = vst [vmem:[#allocation48_spill] sm:$0xff] %v3136_v54  ;;  %v604_v50 = vpop.f32.mrf.mxu3 }
 0x154   :  { %798 = vmatpush.msra.mxu0 %v3141_v42  ;;  %4014 = vst [vmem:[#allocation51_spill] sm:$0xff] %v3147_v26  ;;  %v3150_v3 = vadd.f32 %v604_v50, %v3099_v60 }
 0x156   :  { %4015 = vst [vmem:[#allocation52_spill] sm:$0xff] %v3150_v3  ;;  %799 = vmatpush.msra.mxu0 %v3143_v62 }
 0x157   :  { %2131 = vmatmul.msk.f32.gmra.mxu0 %vm462_vm2, %v2767_v53 }
 0x158   :  { %v566_v12 = vpop.f32.mrf.mxu2  ;;  %931 = vmatpush.msrb.mxu0 %v3047_v63 }
 0x159   :  { %v3153_v54 = vadd.f32 %v566_v12, %v3078_v21  ;;  %v528_v53 = vpop.f32.mrf.mxu1 }
 0x15a   :  { %932 = vmatpush.msrb.mxu0 %v3049_v20  ;;  %v3161_v5 = vadd.f32 %v528_v53, %v3071_v11 }
 0x15b   :  { %4016 = vst [vmem:[#allocation53_spill] sm:$0xff] %v3153_v54  ;;  %v607_v6 = vpop.f32.mrf.mxu3 }
 0x15c   :  { %4017 = vst [vmem:[#allocation54_spill] sm:$0xff] %v3161_v5  ;;  %v3164_v50 = vadd.f32 %v607_v6, %v3099_v60  ;;  %933 = vmatpush.msrb.mxu0 %v3056_v7 }
 0x15e   :  { %4018 = vst [vmem:[#allocation55_spill] sm:$0xff] %v3164_v50  ;;  %934 = vmatpush.msrb.mxu0 %v3059_v15 }
 0x15f   :  { %2132 = vmatmul.msk.f32.gmra.mxu0 %vm462_vm2, %v2809_v0 }
 0x160   :  { %v569_v26 = vpop.f32.mrf.mxu2  ;;  %935 = vmatpush.msrb.mxu0 %v3067_v13 }
 0x161   :  { %v3168_v12 = vadd.f32 %v569_v26, %v3078_v21  ;;  %v531_v0 = vpop.f32.mrf.mxu1 }
 0x162   :  { %936 = vmatpush.msrb.mxu0 %v3075_v19  ;;  %v3176_v5 = vadd.f32 %v531_v0, %v3071_v11 }
 0x163   :  { %4019 = vst [vmem:[#allocation56_spill] sm:$0xff] %v3168_v12  ;;  %v610_v53 = vpop.f32.mrf.mxu3  ;;  %v514_v12 = vadd.f32 %v3051_v17, %v3071_v11 }
 0x164   :  { %4020 = vst [vmem:[#allocation57_spill] sm:$0xff] %v3176_v5  ;;  %v3179_v50 = vadd.f32 %v610_v53, %v3099_v60  ;;  %937 = vmatpush.msrb.mxu0 %v3086_v4 }
 0x166   :  { %4021 = vst [vmem:[#allocation58_spill] sm:$0xff] %v3179_v50  ;;  %938 = vmatpush.msrb.mxu0 %v3092_v27 }
 0x167   :  { %2133 = vmatmul.msk.f32.gmra.mxu0 %vm462_vm2, %v2859_v14 }
 0x168   :  { %v572_v6 = vpop.f32.mrf.mxu2  ;;  %939 = vmatpush.msrb.mxu0 %v3095_v16 }
 0x169   :  { %v3183_v26 = vadd.f32 %v572_v6, %v3078_v21  ;;  %v534_v14 = vpop.f32.mrf.mxu1 }
 0x16a   :  { %940 = vmatpush.msrb.mxu0 %v3103_v23  ;;  %v3191_v5 = vadd.f32 %v534_v14, %v3071_v11 }
 0x16b   :  { %4022 = vst [vmem:[#allocation59_spill] sm:$0xff] %v3183_v26  ;;  %v613_v0 = vpop.f32.mrf.mxu3 }
 0x16c   :  { %4023 = vst [vmem:[#allocation60_spill] sm:$0xff] %v3191_v5  ;;  %v3194_v50 = vadd.f32 %v613_v0, %v3099_v60  ;;  %941 = vmatpush.msrb.mxu0 %v3112_v57  ;;  %v4027_v0 = vmov 0.0  }
 0x16e   :  { %4024 = vst [vmem:[#allocation61_spill] sm:$0xff] %v3194_v50  ;;  %942 = vmatpush.msrb.mxu0 %v3118_v32  ;;  %v555_v50 = vadd.f32 %v3054_v22, %v3078_v21 }
 0x16f   :  { %2134 = vmatmul.msk.f32.gmra.mxu0 %vm462_vm2, %v2902_v24 }
 0x170   :  { %v575_v53 = vpop.f32.mrf.mxu2  ;;  %943 = vmatpush.msrb.mxu0 %v3124_v2 }
 0x171   :  { %v3198_v6 = vadd.f32 %v575_v53, %v3078_v21  ;;  %v741_v54 = vpop.f32.mrf.mxu1 }
 0x172   :  { %944 = vmatpush.msrb.mxu0 %v3126_v10  ;;  %v804_v8 = vadd.f32 %v741_v54, %v514_v12 }
 0x173   :  { %4025 = vst [vmem:[#allocation62_spill] sm:$0xff] %v3198_v6  ;;  %v616_v24 = vpop.f32.mrf.mxu3 }
 0x174   :  { %v3206_v14 = vadd.f32 %v616_v24, %v3099_v60  ;;  %945 = vmatpush.msrb.mxu0 %v3141_v42  ;;  %v448_v24 = vperm.slane %v3064_v18, 3 }
 0x176   :  { %4026 = vst [vmem:[#allocation63_spill] sm:$0xff] %v3206_v14  ;;  %946 = vmatpush.msrb.mxu0 %v3143_v62 }
 0x177   :  { %2135 = vmatmul.msk.f32.gmra.mxu0 %vm462_vm2, %v2931_v9 }
 0x178   :  { %v761_v26 = vpop.f32.mrf.mxu2 }
 0x179   :  { %v805_v3 = vadd.f32 %v761_v26, %v555_v50 }
 0x17b   :  { %v2137_v18 = vmul.f32 -1.442695, %v805_v3 }
 0x17d   :  { %2178 = vpow2.f32 %v2137_v18 }
 0x17f   :  { %800 = vmatmul.f32.vlgmr.msra.gmra.mxu0 %v4027_v0 }
 0x180   :  { %1078 = vmatpush.msra.mxu0 %v3047_v63 }
 0x182   :  { %1079 = vmatpush.msra.mxu0 %v3049_v20 }
 0x184   :  { %1080 = vmatpush.msra.mxu0 %v3056_v7 }
 0x186   :  { %1081 = vmatpush.msra.mxu0 %v3059_v15 }
 0x188   :  { %1082 = vmatpush.msra.mxu0 %v3067_v13 }
 0x18a   :  { %1083 = vmatpush.msra.mxu0 %v3075_v19 }
 0x18c   :  { %1084 = vmatpush.msra.mxu0 %v3086_v4 }
 0x18e   :  { %1085 = vmatpush.msra.mxu0 %v3092_v27 }
 0x190   :  { %1086 = vmatpush.msra.mxu0 %v3095_v16 }
 0x192   :  { %1087 = vmatpush.msra.mxu0 %v3103_v23 }
 0x194   :  { %1088 = vmatpush.msra.mxu0 %v3112_v57 }
 0x196   :  { %1089 = vmatpush.msra.mxu0 %v3118_v32 }
 0x198   :  { %1090 = vmatpush.msra.mxu0 %v3124_v2 }
 0x19a   :  { %1091 = vmatpush.msra.mxu0 %v3126_v10 }
 0x19c   :  { %1092 = vmatpush.msra.mxu0 %v3141_v42  ;;  %v2136_v42 = vmul.f32 -1.442695, %v804_v8 }
 0x19e   :  { %1093 = vmatpush.msra.mxu0 %v3143_v62  ;;  %2180 = vpow2.f32 %v2136_v42 }
 0x1b4   :  { %v3227_v9 = vpop.f32.mrf.mxu0 }
 0x1b5   :  { %4028 = vst [vmem:[#allocation64_spill] sm:$0xff] %v3227_v9 }
 0x1bc   :  { %v636_v53 = vpop.f32.mrf.mxu0 }
 0x1c4   :  { %v639_v0 = vpop.f32.mrf.mxu0 }
 0x1c5   :  { %v3230_v14 = vadd.f32 %v639_v0, %v448_v24  ;;  %v596_v0 = vadd.f32 %v3080_v25, %v3099_v60 }
 0x1c7   :  { %4029 = vst [vmem:[#allocation65_spill] sm:$0xff] %v3230_v14  ;;  %v2179_v14 = vpop.eup %2178 }
 0x1c8   :  { %v2181_v17 = vpop.eup %2180  ;;  %v818_v50 = vadd.f32 1.0, %v2179_v14 }
 0x1c9   :  { %v817_v12 = vadd.f32 1.0, %v2181_v17 }
 0x1ca   :  { %vm840_vm3 = vweird.f32 %v818_v50 }
 0x1cb   :  { %vm825_vm5 = vweird.f32 %v817_v12 }
 0x1cc   :  { %v642_v6 = vpop.f32.mrf.mxu0 }
 0x1cd   :  { %v3232_v5 = vadd.f32 %v642_v6, %v448_v24  ;;  %v781_v6 = vpop.f32.mrf.mxu3 }
 0x1ce   :  { %v806_v21 = vadd.f32 %v781_v6, %v596_v0 }
 0x1cf   :  { %4030 = vst [vmem:[#allocation66_spill] sm:$0xff] %v3232_v5 }
 0x1d0   :  { %v2138_v11 = vmul.f32 -1.442695, %v806_v21 }
 0x1d2   :  { %2182 = vpow2.f32 %v2138_v11 }
 0x1d3   :  { %2184 = vrcp.f32 %v818_v50 }
 0x1d4   :  { %v645_v9 = vpop.f32.mrf.mxu0  ;;  %2186 = vrcp.f32 %v817_v12 }
 0x1d5   :  { %v3238_v62 = vadd.f32 %v645_v9, %v448_v24 }
 0x1d7   :  { %4031 = vst [vmem:[#allocation67_spill] sm:$0xff] %v3238_v62 }
 0x1d8   :  { %v2183_v8 = vpop.eup %2182 }
 0x1d9   :  { %v2185_v25 = vpop.eup %2184  ;;  %v819_v9 = vadd.f32 1.0, %v2183_v8 }
 0x1da   :  { %v2187_v42 = vpop.eup %2186  ;;  %vm841_vm4 = vweird.f32 %v2185_v25 }
 0x1db   :  { %v821_v18 = vmul.f32 %v2187_v42, %v817_v12  ;;  %2188 = vrcp.f32 %v819_v9  ;;  %vm826_vm6 = vweird.f32 %v2187_v42  ;;  %vm842_vm7 = vmor %vm840_vm3, %vm841_vm4  ;;  %vm855_vm11 = vweird.f32 %v819_v9 }
 0x1dc   :  { %v648_v5 = vpop.f32.mrf.mxu0  ;;  %vm827_vm8 = vmor %vm825_vm5, %vm826_vm6 }
 0x1dd   :  { %v3242_v22 = vadd.f32 %v648_v5, %v448_v24  ;;  %v836_v5 = vmul.f32 %v2185_v25, %v818_v50  ;;  %v822_v21 = vsub.f32 1.0, %v821_v18 }
 0x1df   :  { %4032 = vst [vmem:[#allocation68_spill] sm:$0xff] %v3242_v22  ;;  %v837_v0 = vsub.f32 1.0, %v836_v5  ;;  %v823_v11 = vmul.f32 %v2187_v42, %v822_v21  ;;  %v637_v22 = vadd.f32 %v636_v53, %v448_v24  ;;  %v831_v5 = vand.u32 2147483648, %v817_v12 }
 0x1e1   :  { %v838_v17 = vmul.f32 %v2185_v25, %v837_v0  ;;  %v824_v2 = vadd.f32 %v2187_v42, %v823_v11  ;;  %v832_v21 = vor.u32 1.1754944e-38, %v831_v5 }
 0x1e3   :  { %v828_v32 = vsel %vm827_vm8, %v2187_v42, %v824_v2 }
 0x1e4   :  { %v651_v54 = vpop.f32.mrf.mxu0 }
 0x1e5   :  { %v3244_v26 = vadd.f32 %v651_v54, %v448_v24  ;;  %v2189_v54 = vpop.eup %2188 }
 0x1e6   :  { %v851_v8 = vmul.f32 %v2189_v54, %v819_v9  ;;  %vm856_vm12 = vweird.f32 %v2189_v54 }
 0x1e7   :  { %4033 = vst [vmem:[#allocation69_spill] sm:$0xff] %v3244_v26  ;;  %v846_v26 = vand.u32 2147483648, %v818_v50  ;;  %vm857_vm13 = vmor %vm855_vm11, %vm856_vm12 }
 0x1e8   :  { %v852_v0 = vsub.f32 1.0, %v851_v8 }
 0x1ec   :  { %v654_v60 = vpop.f32.mrf.mxu0 }
 0x1ed   :  { %v3246_v3 = vadd.f32 %v654_v60, %v448_v24  ;;  %v839_v60 = vadd.f32 %v2185_v25, %v838_v17  ;;  %v853_v17 = vmul.f32 %v2189_v54, %v852_v0 }
 0x1ef   :  { %4034 = vst [vmem:[#allocation70_spill] sm:$0xff] %v3246_v3  ;;  %v844_v3 = vand.u32 2147483647, %v818_v50  ;;  %v843_v18 = vsel %vm842_vm7, %v2185_v25, %v839_v60  ;;  %v4065_v60 = vld [vmem:[#allocation40_spill] sm:$0xff] }
 0x1f1   :  { %vm845_vm9 = vcmp.eq.f32.partialorder %v844_v3, 8.507059e+37 }
 0x1f4   :  { %v657_v6 = vpop.f32.mrf.mxu0 }
 0x1f5   :  { %v3248_v14 = vadd.f32 %v657_v6, %v448_v24  ;;  %v829_v6 = vand.u32 2147483647, %v817_v12  ;;  %v854_v12 = vadd.f32 %v2189_v54, %v853_v17 }
 0x1f7   :  { %4035 = vst [vmem:[#allocation71_spill] sm:$0xff] %v3248_v14  ;;  %v847_v14 = vor.u32 1.1754944e-38, %v846_v26  ;;  %vm830_vm10 = vcmp.eq.f32.partialorder %v829_v6, 8.507059e+37  ;;  %v859_v26 = vand.u32 2147483647, %v819_v9  ;;  %v858_v25 = vsel %vm857_vm13, %v2189_v54, %v854_v12  ;;  %v4066_v12 = vld [vmem:[#allocation65_spill] sm:$0xff] }
 0x1f8   :  { %v833_v57 = vsel %vm830_vm10, %v832_v21, %v828_v32 }
 0x1f9   :  { %v848_v53 = vsel %vm845_vm9, %v847_v14, %v843_v18  ;;  %vm860_vm14 = vcmp.eq.f32.partialorder %v859_v26, 8.507059e+37  ;;  %v4064_v14 = vld [vmem:[#allocation37_spill] sm:$0xff] }
 0x1fa   :  { %v866_v50 = vmul.f32 0.0, %v848_v53 }
 0x1fc   :  { %v801_v62 = vpop.f32.mrf.mxu0 }
 0x1fd   :  { %v807_v10 = vadd.f32 %v801_v62, %v637_v22  ;;  %v861_v22 = vand.u32 2147483648, %v819_v9 }
 0x1ff   :  { %2190 = vtanh.f32 %v807_v10  ;;  %v862_v10 = vor.u32 1.1754944e-38, %v861_v22 }
 0x201   :  { %v863_v3 = vsel %vm860_vm14, %v862_v10, %v858_v25 }
 0x205   :  { %v2191_v24 = vpop.eup %2190 }
 0x206   :  { %v867_v23 = vmul.f32 %v2191_v24, %v833_v57  ;;  %v4060_v57 = vld [vmem:[#allocation26_spill] sm:$0xff] }
 0x208   :  { %v3250_v62 = vadd.f32 %v867_v23, %v866_v50 }
 0x20a   :  { %2192 = vtanh.f32 %v3250_v62 }
 0x210   :  { %v2193_v2 = vpop.eup %2192 }
 0x211   :  { %v870_v42 = vmul.f32 %v2193_v2, %v863_v3 }
 0x213   :  { %887 = vmatmul.f32.vlgmr.msra.gmra.mxu1 %v870_v42  ;;  %907 = vmatmul.f32.vlgmr.msra.gmra.mxu2 %v870_v42 }
 0x214   :  { %927 = vmatmul.f32.vlgmr.msra.gmra.mxu3 %v870_v42  ;;  %947 = vmatmul.f32.vlgmr.msrb.gmra.mxu0 %v870_v42 }
 0x215   :  { %1165 = vmatpush.msra.mxu1 %v2683_v30  ;;  %1185 = vmatpush.msra.mxu2 %v2678_v28  ;;  %v4036_v28 = vld [vmem:[#allocation16_spill] sm:$0xff]  ;;  %v4038_v30 = vld [vmem:[#allocation38_spill] sm:$0xff] }
 0x216   :  { %1205 = vmatpush.msra.mxu3 %v2714_v38  ;;  %1225 = vmatpush.msrb.mxu0 %v3047_v63  ;;  %v4045_v38 = vld [vmem:[#allocation29_spill] sm:$0xff] }
 0x217   :  { %1166 = vmatpush.msra.mxu1 %v2704_v34  ;;  %1186 = vmatpush.msra.mxu2 %v2680_v29  ;;  %v4037_v29 = vld [vmem:[#allocation24_spill] sm:$0xff]  ;;  %v4041_v34 = vld [vmem:[#allocation27_spill] sm:$0xff] }
 0x218   :  { %1206 = vmatpush.msra.mxu3 %v2721_v41  ;;  %1226 = vmatpush.msrb.mxu0 %v3049_v20  ;;  %v4048_v41 = vld [vmem:[#allocation19_spill] sm:$0xff] }
 0x219   :  { %1167 = vmatpush.msra.mxu1 %v2708_v36  ;;  %1187 = vmatpush.msra.mxu2 %v2685_v31  ;;  %v4039_v31 = vld [vmem:[#allocation20_spill] sm:$0xff]  ;;  %v4043_v36 = vld [vmem:[#allocation22_spill] sm:$0xff] }
 0x21a   :  { %1207 = vmatpush.msra.mxu3 %v2745_v45  ;;  %1227 = vmatpush.msrb.mxu0 %v3056_v7  ;;  %v4051_v45 = vld [vmem:[#allocation28_spill] sm:$0xff] }
 0x21b   :  { %1168 = vmatpush.msra.mxu1 %v2717_v39  ;;  %1188 = vmatpush.msra.mxu2 %v2696_v33  ;;  %v4040_v33 = vld [vmem:[#allocation17_spill] sm:$0xff]  ;;  %v4046_v39 = vld [vmem:[#allocation43_spill] sm:$0xff] }
 0x21c   :  { %1208 = vmatpush.msra.mxu3 %v2753_v48  ;;  %1228 = vmatpush.msrb.mxu0 %v3059_v15  ;;  %v4054_v48 = vld [vmem:[#allocation45_spill] sm:$0xff] }
 0x21d   :  { %1169 = vmatpush.msra.mxu1 %v2733_v43  ;;  %1189 = vmatpush.msra.mxu2 %v2706_v35  ;;  %v4042_v35 = vld [vmem:[#allocation41_spill] sm:$0xff]  ;;  %v4049_v43 = vld [vmem:[#allocation31_spill] sm:$0xff] }
 0x21e   :  { %1209 = vmatpush.msra.mxu3 %v2760_v51  ;;  %1229 = vmatpush.msrb.mxu0 %v3067_v13  ;;  %v4056_v51 = vld [vmem:[#allocation23_spill] sm:$0xff] }
 0x21f   :  { %1170 = vmatpush.msra.mxu1 %v2747_v46  ;;  %1190 = vmatpush.msra.mxu2 %v2712_v37  ;;  %v4044_v37 = vld [vmem:[#allocation18_spill] sm:$0xff]  ;;  %v4052_v46 = vld [vmem:[#allocation21_spill] sm:$0xff] }
 0x220   :  { %1210 = vmatpush.msra.mxu3 %v2776_v55  ;;  %1230 = vmatpush.msrb.mxu0 %v3075_v19  ;;  %v4058_v55 = vld [vmem:[#allocation49_spill] sm:$0xff] }
 0x221   :  { %1171 = vmatpush.msra.mxu1 %v2755_v49  ;;  %1191 = vmatpush.msra.mxu2 %v2719_v40  ;;  %v4047_v40 = vld [vmem:[#allocation25_spill] sm:$0xff]  ;;  %v4055_v49 = vld [vmem:[#allocation30_spill] sm:$0xff] }
 0x222   :  { %1211 = vmatpush.msra.mxu3 %v2791_v58  ;;  %1231 = vmatpush.msrb.mxu0 %v3086_v4  ;;  %v4061_v58 = vld [vmem:[#allocation35_spill] sm:$0xff] }
 0x223   :  { %1172 = vmatpush.msra.mxu1 %v2762_v52  ;;  %1192 = vmatpush.msra.mxu2 %v2735_v44  ;;  %v4050_v44 = vld [vmem:[#allocation44_spill] sm:$0xff]  ;;  %v4057_v52 = vld [vmem:[#allocation34_spill] sm:$0xff] }
 0x224   :  { %1212 = vmatpush.msra.mxu3 %v2799_v61  ;;  %1232 = vmatpush.msrb.mxu0 %v3092_v27 }
 0x225   :  { %1173 = vmatpush.msra.mxu1 %v2778_v56  ;;  %1193 = vmatpush.msra.mxu2 %v2749_v47  ;;  %v4053_v47 = vld [vmem:[#allocation33_spill] sm:$0xff]  ;;  %v4059_v56 = vld [vmem:[#allocation32_spill] sm:$0xff] }
 0x226   :  { %1213 = vmatpush.msra.mxu3 %v2813_v1  ;;  %1233 = vmatpush.msrb.mxu0 %v3095_v16  ;;  %v4063_v1 = vld [vmem:[#allocation36_spill] sm:$0xff] }
 0x227   :  { %1174 = vmatpush.msra.mxu1 %v2793_v59  ;;  %1194 = vmatpush.msra.mxu2 %v4036_v28  ;;  %v4062_v59 = vld [vmem:[#allocation50_spill] sm:$0xff] }
 0x228   :  { %1214 = vmatpush.msra.mxu3 %v4037_v29  ;;  %1234 = vmatpush.msrb.mxu0 %v4038_v30 }
 0x229   :  { %1175 = vmatpush.msra.mxu1 %v4039_v31  ;;  %1195 = vmatpush.msra.mxu2 %v4040_v33 }
 0x22a   :  { %1215 = vmatpush.msra.mxu3 %v4041_v34  ;;  %1235 = vmatpush.msrb.mxu0 %v4042_v35 }
 0x22b   :  { %1176 = vmatpush.msra.mxu1 %v4043_v36  ;;  %1196 = vmatpush.msra.mxu2 %v4044_v37 }
 0x22c   :  { %1216 = vmatpush.msra.mxu3 %v4045_v38  ;;  %1236 = vmatpush.msrb.mxu0 %v4046_v39 }
 0x22d   :  { %1177 = vmatpush.msra.mxu1 %v4047_v40  ;;  %1197 = vmatpush.msra.mxu2 %v4048_v41 }
 0x22e   :  { %1217 = vmatpush.msra.mxu3 %v4049_v43  ;;  %1237 = vmatpush.msrb.mxu0 %v4050_v44 }
 0x22f   :  { %1178 = vmatpush.msra.mxu1 %v4051_v45  ;;  %1198 = vmatpush.msra.mxu2 %v4052_v46 }
 0x230   :  { %1218 = vmatpush.msra.mxu3 %v4053_v47  ;;  %1238 = vmatpush.msrb.mxu0 %v4054_v48 }
 0x231   :  { %1179 = vmatpush.msra.mxu1 %v4055_v49  ;;  %1199 = vmatpush.msra.mxu2 %v4056_v51 }
 0x232   :  { %1219 = vmatpush.msra.mxu3 %v4057_v52  ;;  %1239 = vmatpush.msrb.mxu0 %v4058_v55 }
 0x233   :  { %1180 = vmatpush.msra.mxu1 %v4059_v56  ;;  %1200 = vmatpush.msra.mxu2 %v4060_v57 }
 0x234   :  { %1220 = vmatpush.msra.mxu3 %v4061_v58  ;;  %1240 = vmatpush.msrb.mxu0 %v4062_v59 }
 0x290   :  { %v888_v61 = vpop.f32.mrf.mxu1 }
 0x291   :  { %v951_v23 = vadd.f32 %v888_v61, %v4063_v1  ;;  %v948_v53 = vpop.f32.mrf.mxu0 }
 0x292   :  { %v954_v26 = vadd.f32 %v948_v53, %v4066_v12  ;;  %v3345_v53 = vld [vmem:[#allocation9 + $0x1a0] sm:$0xff]  ;;  %v3361_v12 = vld [vmem:[#allocation9 + $0x190] sm:$0xff] }
 0x293   :  { %v2139_v32 = vmul.f32 -1.442695, %v951_v23 }
 0x295   :  { %2194 = vpow2.f32 %v2139_v32 }
 0x296   :  { %v908_v9 = vpop.f32.mrf.mxu2 }
 0x297   :  { %v952_v54 = vadd.f32 %v908_v9, %v4064_v14  ;;  %v928_v11 = vpop.f32.mrf.mxu3 }
 0x298   :  { %v953_v8 = vadd.f32 %v928_v11, %v4065_v60 }
 0x299   :  { %v2140_v5 = vmul.f32 -1.442695, %v952_v54 }
 0x29a   :  { %v2141_v6 = vmul.f32 -1.442695, %v953_v8 }
 0x29b   :  { %v2195_v18 = vpop.eup %2194  ;;  %2196 = vpow2.f32 %v2140_v5  ;;  %v3328_v5 = vld [vmem:[#allocation9 + $0x1e8] sm:$0xff] }
 0x29c   :  { %v964_v0 = vadd.f32 1.0, %v2195_v18  ;;  %2198 = vpow2.f32 %v2141_v6  ;;  %v3331_v6 = vld [vmem:[#allocation9 + $0x1f0] sm:$0xff]  ;;  %v3335_v18 = vld [vmem:[#allocation9 + $0x1c0] sm:$0xff] }
 0x29e   :  { %2200 = vrcp.f32 %v964_v0  ;;  %v978_v2 = vand.u32 2147483648, %v964_v0  ;;  %v976_v42 = vand.u32 2147483647, %v964_v0  ;;  %vm972_vm0 = vweird.f32 %v964_v0 }
 0x2a0   :  { %v979_v34 = vor.u32 1.1754944e-38, %v978_v2  ;;  %vm977_vm3 = vcmp.eq.f32.partialorder %v976_v42, 8.507059e+37  ;;  %v3375_v2 = vld [vmem:[#allocation9 + $0x140] sm:$0xff]  ;;  %v3381_v42 = vld [vmem:[#allocation9 + $0x150] sm:$0xff] }
 0x2a1   :  { %v2197_v21 = vpop.eup %2196 }
 0x2a2   :  { %v2199_v24 = vpop.eup %2198  ;;  %v965_v17 = vadd.f32 1.0, %v2197_v21  ;;  %v3341_v21 = vld [vmem:[#allocation9 + $0x1d0] sm:$0xff] }
 0x2a3   :  { %v966_v50 = vadd.f32 1.0, %v2199_v24  ;;  %v3348_v24 = vld [vmem:[#allocation9 + $0x1a8] sm:$0xff] }
 0x2a4   :  { %v2201_v22 = vpop.eup %2200  ;;  %2202 = vrcp.f32 %v965_v17  ;;  %v993_v43 = vand.u32 2147483648, %v965_v17  ;;  %v991_v47 = vand.u32 2147483647, %v965_v17  ;;  %vm987_vm5 = vweird.f32 %v965_v17 }
 0x2a5   :  { %v968_v10 = vmul.f32 %v2201_v22, %v964_v0  ;;  %2204 = vrcp.f32 %v966_v50  ;;  %vm973_vm15 = vweird.f32 %v2201_v22  ;;  %v1008_v32 = vand.u32 2147483648, %v966_v50  ;;  %v3338_v0 = vld [vmem:[#allocation9 + $0x1c8] sm:$0xff] }
 0x2a6   :  { %2206 = vtanh.f32 %v954_v26  ;;  %vm974_vm1 = vmor %vm972_vm0, %vm973_vm15  ;;  %v994_v52 = vor.u32 1.1754944e-38, %v993_v43  ;;  %vm992_vm7 = vcmp.eq.f32.partialorder %v991_v47, 8.507059e+37  ;;  %vm1002_vm9 = vweird.f32 %v966_v50  ;;  %v3365_v26 = vld [vmem:[#allocation9 + $0x160] sm:$0xff]  ;;  %v3418_v43 = vld [vmem:[#allocation9 + $0xc8] sm:$0xff] }
 0x2a7   :  { %v969_v25 = vsub.f32 1.0, %v968_v10  ;;  %v1006_v9 = vand.u32 2147483647, %v966_v50  ;;  %v1009_v54 = vor.u32 1.1754944e-38, %v1008_v32  ;;  %v3368_v10 = vld [vmem:[#allocation9 + $0x168] sm:$0xff] }
 0x2a8   :  { %v3428_v47 = vld [vmem:[#allocation9 + $0xa8] sm:$0xff] }
 0x2a9   :  { %v970_v3 = vmul.f32 %v2201_v22, %v969_v25  ;;  %vm1007_vm11 = vcmp.eq.f32.partialorder %v1006_v9, 8.507059e+37  ;;  %v3371_v25 = vld [vmem:[#allocation9 + $0x170] sm:$0xff]  ;;  %4068 = vst [vmem:[#allocation24_spill] sm:$0xff] %v3428_v47  ;;  %v3458_v32 = vld [vmem:[#allocation9 + $0x48] sm:$0xff] }
 0x2aa   :  { %v2203_v28 = vpop.eup %2202  ;;  %4077 = vst [vmem:[#allocation31_spill] sm:$0xff] %v3458_v32  ;;  %v3461_v9 = vld [vmem:[#allocation9 + $0x50] sm:$0xff] }
 0x2ab   :  { %v2205_v29 = vpop.eup %2204  ;;  %v971_v31 = vadd.f32 %v2201_v22, %v970_v3  ;;  %v983_v33 = vmul.f32 %v2203_v28, %v965_v17  ;;  %vm988_vm4 = vweird.f32 %v2203_v28  ;;  %v3351_v17 = vld [vmem:[#allocation9 + $0x1b0] sm:$0xff]  ;;  %v3378_v3 = vld [vmem:[#allocation9 + $0x148] sm:$0xff]  ;;  %4078 = vst [vmem:[#allocation28_spill] sm:$0xff] %v3461_v9 }
 0x2ac   :  { %v998_v36 = vmul.f32 %v2205_v29, %v966_v50  ;;  %v2207_v40 = vpop.eup %2206  ;;  %vm989_vm6 = vmor %vm987_vm5, %vm988_vm4  ;;  %vm1003_vm8 = vweird.f32 %v2205_v29  ;;  %v3355_v50 = vld [vmem:[#allocation9 + $0x180] sm:$0xff] }
 0x2ad   :  { %v975_v37 = vsel %vm974_vm1, %v2201_v22, %v971_v31  ;;  %v984_v38 = vsub.f32 1.0, %v983_v33  ;;  %vm1004_vm10 = vmor %vm1002_vm9, %vm1003_vm8  ;;  %v3358_v22 = vld [vmem:[#allocation9 + $0x188] sm:$0xff]  ;;  %v3391_v31 = vld [vmem:[#allocation9 + $0x130] sm:$0xff] }
 0x2ae   :  { %v980_v41 = vsel %vm977_vm3, %v979_v34, %v975_v37  ;;  %v999_v49 = vsub.f32 1.0, %v998_v36  ;;  %v3395_v33 = vld [vmem:[#allocation9 + $0x100] sm:$0xff]  ;;  %v3398_v34 = vld [vmem:[#allocation9 + $0x108] sm:$0xff]  ;;  %v3401_v36 = vld [vmem:[#allocation9 + $0x110] sm:$0xff] }
 0x2af   :  { %v1014_v45 = vmul.f32 %v2207_v40, %v980_v41  ;;  %v985_v46 = vmul.f32 %v2203_v28, %v984_v38  ;;  %v3405_v37 = vld [vmem:[#allocation9 + $0xe0] sm:$0xff]  ;;  %v3408_v38 = vld [vmem:[#allocation9 + $0xe8] sm:$0xff]  ;;  %v3411_v40 = vld [vmem:[#allocation9 + $0xf0] sm:$0xff] }
 0x2b0   :  { %v1000_v58 = vmul.f32 %v2205_v29, %v999_v49  ;;  %v3415_v41 = vld [vmem:[#allocation9 + $0xc0] sm:$0xff]  ;;  %v3431_v49 = vld [vmem:[#allocation9 + $0xb0] sm:$0xff] }
 0x2b1   :  { %v986_v51 = vadd.f32 %v2203_v28, %v985_v46  ;;  %v3425_v46 = vld [vmem:[#allocation9 + $0xa0] sm:$0xff]  ;;  %4069 = vst [vmem:[#allocation20_spill] sm:$0xff] %v3431_v49 }
 0x2b2   :  { %v1001_v23 = vadd.f32 %v2205_v29, %v1000_v58  ;;  %4067 = vst [vmem:[#allocation16_spill] sm:$0xff] %v3425_v46  ;;  %v3448_v58 = vld [vmem:[#allocation9 + $0x68] sm:$0xff] }
 0x2b3   :  { %v990_v56 = vsel %vm989_vm6, %v2203_v28, %v986_v51  ;;  %v3385_v28 = vld [vmem:[#allocation9 + $0x120] sm:$0xff]  ;;  %4074 = vst [vmem:[#allocation29_spill] sm:$0xff] %v3448_v58 }
 0x2b4   :  { %v995_v57 = vsel %vm992_vm7, %v994_v52, %v990_v56  ;;  %v1005_v14 = vsel %vm1004_vm10, %v2205_v29, %v1001_v23  ;;  %v3388_v29 = vld [vmem:[#allocation9 + $0x128] sm:$0xff]  ;;  %v3435_v51 = vld [vmem:[#allocation9 + $0x80] sm:$0xff]  ;;  %v3441_v56 = vld [vmem:[#allocation9 + $0x90] sm:$0xff] }
 0x2b5   :  { %v1013_v61 = vmul.f32 %v995_v57, %v3250_v62  ;;  %v1010_v60 = vsel %vm1007_vm11, %v1009_v54, %v1005_v14  ;;  %v3325_v62 = vld [vmem:[#allocation9 + $0x1e0] sm:$0xff]  ;;  %4070 = vst [vmem:[#allocation17_spill] sm:$0xff] %v3435_v51  ;;  %v3438_v52 = vld [vmem:[#allocation9 + $0x88] sm:$0xff] }
 0x2b6   :  { %4071 = vst [vmem:[#allocation27_spill] sm:$0xff] %v3438_v52  ;;  %v3445_v57 = vld [vmem:[#allocation9 + $0x60] sm:$0xff]  ;;  %v3468_v54 = vld [vmem:[#allocation9 + $0x28] sm:$0xff] }
 0x2b7   :  { %v3322_v1 = vadd.f32 %v1014_v45, %v1013_v61  ;;  %v3421_v45 = vld [vmem:[#allocation9 + $0xd0] sm:$0xff]  ;;  %4072 = vst [vmem:[#allocation22_spill] sm:$0xff] %v3441_v56  ;;  %v3455_v23 = vld [vmem:[#allocation9 + $0x40] sm:$0xff] }
 0x2b8   :  { %4073 = vst [vmem:[#allocation18_spill] sm:$0xff] %v3445_v57  ;;  %v3451_v61 = vld [vmem:[#allocation9 + $0x70] sm:$0xff]  ;;  %v3465_v14 = vld [vmem:[#allocation9 + $0x20] sm:$0xff] }
 0x2b9   :  { %2208 = vtanh.f32 %v3322_v1  ;;  %4075 = vst [vmem:[#allocation25_spill] sm:$0xff] %v3451_v61 }
 0x2ba   :  { %4076 = vst [vmem:[#allocation19_spill] sm:$0xff] %v3455_v23 }
 0x2bb   :  { %4079 = vst [vmem:[#allocation21_spill] sm:$0xff] %v3465_v14 }
 0x2bc   :  { %4080 = vst [vmem:[#allocation33_spill] sm:$0xff] %v3468_v54 }
 0x2bf   :  { %v2209_v11 = vpop.eup %2208 }
 0x2c0   :  { %v1017_v8 = vmul.f32 %v2209_v11, %v1010_v60  ;;  %v3471_v11 = vld [vmem:[#allocation9 + $0x30] sm:$0xff]  ;;  %v3475_v60 = vld [vmem:[#allocation9] sm:$0xff] }
 0x2c1   :  { %4081 = vst [vmem:[#allocation45_spill] sm:$0xff] %v3471_v11 }
 0x2c2   :  { %1034 = vmatmul.f32.vlgmr.msrb.gmra.mxu1 %v1017_v8  ;;  %1054 = vmatmul.f32.vlgmr.msrb.gmra.mxu2 %v1017_v8  ;;  %4082 = vst [vmem:[#allocation30_spill] sm:$0xff] %v3475_v60 }
 0x2c3   :  { %1074 = vmatmul.f32.vlgmr.msrb.gmra.mxu3 %v1017_v8  ;;  %1094 = vmatmul.f32.vlgmr.msra.gmra.mxu0 %v1017_v8  ;;  %v3478_v8 = vld [vmem:[#allocation9 + $0x8] sm:$0xff] }
 0x2c4   :  { %1312 = vmatpush.msrb.mxu1 %v3325_v62  ;;  %1332 = vmatpush.msrb.mxu2 %v3328_v5  ;;  %4083 = vst [vmem:[#allocation23_spill] sm:$0xff] %v3478_v8 }
 0x2c5   :  { %1352 = vmatpush.msrb.mxu3 %v3331_v6  ;;  %1372 = vmatpush.msra.mxu0 %v3047_v63 }
 0x2c6   :  { %1313 = vmatpush.msrb.mxu1 %v3335_v18  ;;  %1333 = vmatpush.msrb.mxu2 %v3338_v0 }
 0x2c7   :  { %1353 = vmatpush.msrb.mxu3 %v3341_v21  ;;  %1373 = vmatpush.msra.mxu0 %v3049_v20 }
 0x2c8   :  { %1314 = vmatpush.msrb.mxu1 %v3345_v53  ;;  %1334 = vmatpush.msrb.mxu2 %v3348_v24 }
 0x2c9   :  { %1354 = vmatpush.msrb.mxu3 %v3351_v17  ;;  %1374 = vmatpush.msra.mxu0 %v3056_v7 }
 0x2ca   :  { %1315 = vmatpush.msrb.mxu1 %v3355_v50  ;;  %1335 = vmatpush.msrb.mxu2 %v3358_v22 }
 0x2cb   :  { %1355 = vmatpush.msrb.mxu3 %v3361_v12  ;;  %1375 = vmatpush.msra.mxu0 %v3059_v15 }
 0x2cc   :  { %1316 = vmatpush.msrb.mxu1 %v3365_v26  ;;  %1336 = vmatpush.msrb.mxu2 %v3368_v10 }
 0x2cd   :  { %1356 = vmatpush.msrb.mxu3 %v3371_v25  ;;  %1376 = vmatpush.msra.mxu0 %v3067_v13 }
 0x2ce   :  { %1317 = vmatpush.msrb.mxu1 %v3375_v2  ;;  %1337 = vmatpush.msrb.mxu2 %v3378_v3 }
 0x2cf   :  { %1357 = vmatpush.msrb.mxu3 %v3381_v42  ;;  %1377 = vmatpush.msra.mxu0 %v3075_v19 }
 0x2d0   :  { %1318 = vmatpush.msrb.mxu1 %v3385_v28  ;;  %1338 = vmatpush.msrb.mxu2 %v3388_v29 }
 0x2d1   :  { %1358 = vmatpush.msrb.mxu3 %v3391_v31  ;;  %1378 = vmatpush.msra.mxu0 %v3086_v4 }
 0x2d2   :  { %1319 = vmatpush.msrb.mxu1 %v3395_v33  ;;  %1339 = vmatpush.msrb.mxu2 %v3398_v34 }
 0x2d3   :  { %1359 = vmatpush.msrb.mxu3 %v3401_v36  ;;  %1379 = vmatpush.msra.mxu0 %v3092_v27 }
 0x2d4   :  { %1320 = vmatpush.msrb.mxu1 %v3405_v37  ;;  %1340 = vmatpush.msrb.mxu2 %v3408_v38 }
 0x2d5   :  { %1360 = vmatpush.msrb.mxu3 %v3411_v40  ;;  %1380 = vmatpush.msra.mxu0 %v3095_v16 }
 0x2d6   :  { %1321 = vmatpush.msrb.mxu1 %v3415_v41  ;;  %1341 = vmatpush.msrb.mxu2 %v3418_v43 }
 0x2d7   :  { %1361 = vmatpush.msrb.mxu3 %v3421_v45  ;;  %1381 = vmatpush.msra.mxu0 %v4038_v30 }
 0x2d8   :  { %1322 = vmatpush.msrb.mxu1 %v3425_v46  ;;  %1342 = vmatpush.msrb.mxu2 %v3428_v47 }
 0x2d9   :  { %1362 = vmatpush.msrb.mxu3 %v3431_v49  ;;  %1382 = vmatpush.msra.mxu0 %v4042_v35 }
 0x2da   :  { %1323 = vmatpush.msrb.mxu1 %v3435_v51  ;;  %1343 = vmatpush.msrb.mxu2 %v3438_v52 }
 0x2db   :  { %1363 = vmatpush.msrb.mxu3 %v3441_v56  ;;  %1383 = vmatpush.msra.mxu0 %v4046_v39 }
 0x2dc   :  { %1324 = vmatpush.msrb.mxu1 %v3445_v57  ;;  %1344 = vmatpush.msrb.mxu2 %v3448_v58 }
 0x2dd   :  { %1364 = vmatpush.msrb.mxu3 %v3451_v61  ;;  %1384 = vmatpush.msra.mxu0 %v4050_v44 }
 0x2de   :  { %1325 = vmatpush.msrb.mxu1 %v3455_v23  ;;  %1345 = vmatpush.msrb.mxu2 %v3458_v32  ;;  %v4086_v32 = vld [vmem:[#allocation42_spill] sm:$0xff] }
 0x2df   :  { %1365 = vmatpush.msrb.mxu3 %v3461_v9  ;;  %1385 = vmatpush.msra.mxu0 %v4054_v48  ;;  %v3481_v48 = vld [vmem:[#allocation9 + $0x10] sm:$0xff] }
 0x2e0   :  { %1326 = vmatpush.msrb.mxu1 %v3465_v14  ;;  %1346 = vmatpush.msrb.mxu2 %v3468_v54  ;;  %4084 = vst [vmem:[#allocation34_spill] sm:$0xff] %v3481_v48  ;;  %v4085_v14 = vld [vmem:[#allocation39_spill] sm:$0xff] }
 0x2e1   :  { %1366 = vmatpush.msrb.mxu3 %v3471_v11  ;;  %1386 = vmatpush.msra.mxu0 %v4058_v55 }
 0x2e2   :  { %1327 = vmatpush.msrb.mxu1 %v3475_v60  ;;  %1347 = vmatpush.msrb.mxu2 %v3478_v8  ;;  %v4087_v60 = vld [vmem:[#allocation47_spill] sm:$0xff] }
 0x2e3   :  { %1367 = vmatpush.msrb.mxu3 %v3481_v48  ;;  %1387 = vmatpush.msra.mxu0 %v4062_v59 }
 0x33f   :  { %v1035_v54 = vpop.f32.mrf.mxu1 }
 0x340   :  { %v1098_v9 = vadd.f32 %v1035_v54, %v4085_v14  ;;  %v1095_v59 = vpop.f32.mrf.mxu0  ;;  %v4088_v54 = vld [vmem:[#allocation66_spill] sm:$0xff] }
 0x342   :  { %v2142_v11 = vmul.f32 -1.442695, %v1098_v9 }
 0x344   :  { %2210 = vpow2.f32 %v2142_v11  ;;  %v1101_v11 = vadd.f32 %v1095_v59, %v4088_v54 }
 0x345   :  { %v1055_v55 = vpop.f32.mrf.mxu2 }
 0x346   :  { %v1099_v23 = vadd.f32 %v1055_v55, %v4086_v32  ;;  %v1075_v44 = vpop.f32.mrf.mxu3 }
 0x347   :  { %v1100_v61 = vadd.f32 %v1075_v44, %v4087_v60 }
 0x348   :  { %v2143_v58 = vmul.f32 -1.442695, %v1099_v23 }
 0x349   :  { %v2144_v57 = vmul.f32 -1.442695, %v1100_v61 }
 0x34a   :  { %v2211_v8 = vpop.eup %2210  ;;  %2212 = vpow2.f32 %v2143_v58 }
 0x34b   :  { %v1111_v39 = vadd.f32 1.0, %v2211_v8  ;;  %2214 = vpow2.f32 %v2144_v57 }
 0x34d   :  { %2216 = vrcp.f32 %v1111_v39  ;;  %v1125_v44 = vand.u32 2147483648, %v1111_v39  ;;  %v1123_v58 = vand.u32 2147483647, %v1111_v39  ;;  %vm1119_vm13 = vweird.f32 %v1111_v39 }
 0x34f   :  { %vm1124_vm15 = vcmp.eq.f32.partialorder %v1123_v58, 8.507059e+37 }
 0x350   :  { %v2213_v48 = vpop.eup %2212 }
 0x351   :  { %v2215_v56 = vpop.eup %2214  ;;  %v1112_v52 = vadd.f32 1.0, %v2213_v48  ;;  %v1126_v48 = vor.u32 1.1754944e-38, %v1125_v44 }
 0x352   :  { %v1113_v14 = vadd.f32 1.0, %v2215_v56 }
 0x353   :  { %v2217_v9 = vpop.eup %2216  ;;  %2218 = vrcp.f32 %v1112_v52  ;;  %v1140_v49 = vand.u32 2147483648, %v1112_v52  ;;  %vm1134_vm1 = vweird.f32 %v1112_v52 }
 0x354   :  { %v1115_v55 = vmul.f32 %v2217_v9, %v1111_v39  ;;  %2220 = vrcp.f32 %v1113_v14  ;;  %vm1120_vm12 = vweird.f32 %v2217_v9  ;;  %vm1149_vm6 = vweird.f32 %v1113_v14 }
 0x355   :  { %2222 = vtanh.f32 %v1101_v11  ;;  %vm1121_vm14 = vmor %vm1119_vm13, %vm1120_vm12  ;;  %v1138_v11 = vand.u32 2147483647, %v1112_v52 }
 0x356   :  { %v1116_v32 = vsub.f32 1.0, %v1115_v55 }
 0x357   :  { %vm1139_vm4 = vcmp.eq.f32.partialorder %v1138_v11, 8.507059e+37  ;;  %v4108_v11 = vld [vmem:[#allocation45_spill] sm:$0xff] }
 0x358   :  { %v1117_v61 = vmul.f32 %v2217_v9, %v1116_v32 }
 0x359   :  { %v2219_v23 = vpop.eup %2218 }
 0x35a   :  { %v2221_v57 = vpop.eup %2220  ;;  %v1118_v60 = vadd.f32 %v2217_v9, %v1117_v61  ;;  %v1130_v8 = vmul.f32 %v2219_v23, %v1112_v52  ;;  %vm1135_vm0 = vweird.f32 %v2219_v23  ;;  %v1141_v61 = vor.u32 1.1754944e-38, %v1140_v49 }
 0x35b   :  { %v1145_v56 = vmul.f32 %v2221_v57, %v1113_v14  ;;  %v2223_v54 = vpop.eup %2222  ;;  %vm1136_vm3 = vmor %vm1134_vm1, %vm1135_vm0  ;;  %vm1150_vm5 = vweird.f32 %v2221_v57 }
 0x35c   :  { %v1122_v51 = vsel %vm1121_vm14, %v2217_v9, %v1118_v60  ;;  %v1131_v59 = vsub.f32 1.0, %v1130_v8  ;;  %vm1151_vm7 = vmor %vm1149_vm6, %vm1150_vm5  ;;  %v4102_v8 = vld [vmem:[#allocation19_spill] sm:$0xff] }
 0x35d   :  { %v1127_v35 = vsel %vm1124_vm15, %v1126_v48, %v1122_v51  ;;  %v1146_v32 = vsub.f32 1.0, %v1145_v56  ;;  %v1155_v51 = vand.u32 2147483648, %v1113_v14  ;;  %v4103_v48 = vld [vmem:[#allocation31_spill] sm:$0xff]  ;;  %v4104_v56 = vld [vmem:[#allocation28_spill] sm:$0xff] }
 0x35e   :  { %v1161_v55 = vmul.f32 %v2223_v54, %v1127_v35  ;;  %v1132_v47 = vmul.f32 %v2219_v23, %v1131_v59  ;;  %v1153_v35 = vand.u32 2147483647, %v1113_v14  ;;  %v4100_v14 = vld [vmem:[#allocation25_spill] sm:$0xff]  ;;  %v3548_v59 = vld [vmem:[#allocation9 + $0x58] sm:$0xff] }
 0x35f   :  { %v1147_v44 = vmul.f32 %v2221_v57, %v1146_v32  ;;  %v1156_v52 = vor.u32 1.1754944e-38, %v1155_v51  ;;  %4105 = vst [vmem:[#allocation32_spill] sm:$0xff] %v3548_v59  ;;  %v4106_v54 = vld [vmem:[#allocation21_spill] sm:$0xff]  ;;  %v4114_v51 = vld [vmem:[#allocation46_spill] sm:$0xff] }
 0x360   :  { %v1133_v46 = vadd.f32 %v2219_v23, %v1132_v47  ;;  %vm1154_vm8 = vcmp.eq.f32.partialorder %v1153_v35, 8.507059e+37  ;;  %v4109_v32 = vld [vmem:[#allocation49_spill] sm:$0xff] }
 0x361   :  { %v1148_v60 = vadd.f32 %v2221_v57, %v1147_v44  ;;  %v4112_v44 = vld [vmem:[#allocation34_spill] sm:$0xff] }
 0x362   :  { %v1137_v39 = vsel %vm1136_vm3, %v2219_v23, %v1133_v46 }
 0x363   :  { %v1142_v30 = vsel %vm1139_vm4, %v1141_v61, %v1137_v39  ;;  %v1152_v47 = vsel %vm1151_vm7, %v2221_v57, %v1148_v60  ;;  %v4101_v57 = vld [vmem:[#allocation44_spill] sm:$0xff]  ;;  %v4110_v61 = vld [vmem:[#allocation30_spill] sm:$0xff]  ;;  %v4111_v39 = vld [vmem:[#allocation23_spill] sm:$0xff] }
 0x364   :  { %v1160_v9 = vmul.f32 %v1142_v30, %v3322_v1  ;;  %v1157_v46 = vsel %vm1154_vm8, %v1156_v52, %v1152_v47  ;;  %v4098_v30 = vld [vmem:[#allocation18_spill] sm:$0xff]  ;;  %v4099_v1 = vld [vmem:[#allocation29_spill] sm:$0xff] }
 0x366   :  { %v3490_v58 = vadd.f32 %v1161_v55, %v1160_v9  ;;  %v4107_v55 = vld [vmem:[#allocation33_spill] sm:$0xff]  ;;  %v4113_v9 = vld [vmem:[#allocation50_spill] sm:$0xff] }
 0x368   :  { %2224 = vtanh.f32 %v3490_v58 }
 0x36e   :  { %v2225_v49 = vpop.eup %2224 }
 0x36f   :  { %v1164_v23 = vmul.f32 %v2225_v49, %v1157_v46  ;;  %v4115_v49 = vld [vmem:[#allocation48_spill] sm:$0xff] }
 0x371   :  { %1181 = vmatmul.f32.vlgmr.msra.gmra.mxu1 %v1164_v23  ;;  %1201 = vmatmul.f32.vlgmr.msra.gmra.mxu2 %v1164_v23 }
 0x372   :  { %1221 = vmatmul.f32.vlgmr.msra.gmra.mxu3 %v1164_v23  ;;  %1241 = vmatmul.f32.vlgmr.msrb.gmra.mxu0 %v1164_v23 }
 0x373   :  { %1459 = vmatpush.msra.mxu1 %v3325_v62  ;;  %1479 = vmatpush.msra.mxu2 %v3328_v5 }
 0x374   :  { %1499 = vmatpush.msra.mxu3 %v3331_v6  ;;  %1519 = vmatpush.msrb.mxu0 %v3047_v63  ;;  %v4089_v63 = vld [vmem:[#allocation38_spill] sm:$0xff] }
 0x375   :  { %1460 = vmatpush.msra.mxu1 %v3335_v18  ;;  %1480 = vmatpush.msra.mxu2 %v3338_v0 }
 0x376   :  { %1500 = vmatpush.msra.mxu3 %v3341_v21  ;;  %1520 = vmatpush.msrb.mxu0 %v3049_v20  ;;  %v4092_v20 = vld [vmem:[#allocation20_spill] sm:$0xff] }
 0x377   :  { %1461 = vmatpush.msra.mxu1 %v3345_v53  ;;  %1481 = vmatpush.msra.mxu2 %v3348_v24 }
 0x378   :  { %1501 = vmatpush.msra.mxu3 %v3351_v17  ;;  %1521 = vmatpush.msrb.mxu0 %v3056_v7  ;;  %v4091_v7 = vld [vmem:[#allocation24_spill] sm:$0xff] }
 0x379   :  { %1462 = vmatpush.msra.mxu1 %v3355_v50  ;;  %1482 = vmatpush.msra.mxu2 %v3358_v22 }
 0x37a   :  { %1502 = vmatpush.msra.mxu3 %v3361_v12  ;;  %1522 = vmatpush.msrb.mxu0 %v3059_v15  ;;  %v4093_v15 = vld [vmem:[#allocation41_spill] sm:$0xff] }
 0x37b   :  { %1463 = vmatpush.msra.mxu1 %v3365_v26  ;;  %1483 = vmatpush.msra.mxu2 %v3368_v10 }
 0x37c   :  { %1503 = vmatpush.msra.mxu3 %v3371_v25  ;;  %1523 = vmatpush.msrb.mxu0 %v3067_v13  ;;  %v4094_v13 = vld [vmem:[#allocation17_spill] sm:$0xff] }
 0x37d   :  { %1464 = vmatpush.msra.mxu1 %v3375_v2  ;;  %1484 = vmatpush.msra.mxu2 %v3378_v3 }
 0x37e   :  { %1504 = vmatpush.msra.mxu3 %v3381_v42  ;;  %1524 = vmatpush.msrb.mxu0 %v3075_v19  ;;  %v4095_v19 = vld [vmem:[#allocation27_spill] sm:$0xff] }
 0x37f   :  { %1465 = vmatpush.msra.mxu1 %v3385_v28  ;;  %1485 = vmatpush.msra.mxu2 %v3388_v29 }
 0x380   :  { %1505 = vmatpush.msra.mxu3 %v3391_v31  ;;  %1525 = vmatpush.msrb.mxu0 %v3086_v4  ;;  %v4090_v4 = vld [vmem:[#allocation16_spill] sm:$0xff] }
 0x381   :  { %1466 = vmatpush.msra.mxu1 %v3395_v33  ;;  %1486 = vmatpush.msra.mxu2 %v3398_v34 }
 0x382   :  { %1506 = vmatpush.msra.mxu3 %v3401_v36  ;;  %1526 = vmatpush.msrb.mxu0 %v3092_v27  ;;  %v4097_v27 = vld [vmem:[#allocation43_spill] sm:$0xff] }
 0x383   :  { %1467 = vmatpush.msra.mxu1 %v3405_v37  ;;  %1487 = vmatpush.msra.mxu2 %v3408_v38 }
 0x384   :  { %1507 = vmatpush.msra.mxu3 %v3411_v40  ;;  %1527 = vmatpush.msrb.mxu0 %v3095_v16  ;;  %v4096_v16 = vld [vmem:[#allocation22_spill] sm:$0xff] }
 0x385   :  { %1468 = vmatpush.msra.mxu1 %v3415_v41  ;;  %1488 = vmatpush.msra.mxu2 %v3418_v43 }
 0x386   :  { %1508 = vmatpush.msra.mxu3 %v3421_v45  ;;  %1528 = vmatpush.msrb.mxu0 %v4089_v63  ;;  %v4116_v63 = vld [vmem:[#allocation52_spill] sm:$0xff] }
 0x387   :  { %1469 = vmatpush.msra.mxu1 %v4090_v4  ;;  %1489 = vmatpush.msra.mxu2 %v4091_v7 }
 0x388   :  { %1509 = vmatpush.msra.mxu3 %v4092_v20  ;;  %1529 = vmatpush.msrb.mxu0 %v4093_v15 }
 0x389   :  { %1470 = vmatpush.msra.mxu1 %v4094_v13  ;;  %1490 = vmatpush.msra.mxu2 %v4095_v19 }
 0x38a   :  { %1510 = vmatpush.msra.mxu3 %v4096_v16  ;;  %1530 = vmatpush.msrb.mxu0 %v4097_v27 }
 0x38b   :  { %1471 = vmatpush.msra.mxu1 %v4098_v30  ;;  %1491 = vmatpush.msra.mxu2 %v4099_v1 }
 0x38c   :  { %1511 = vmatpush.msra.mxu3 %v4100_v14  ;;  %1531 = vmatpush.msrb.mxu0 %v4101_v57 }
 0x38d   :  { %1472 = vmatpush.msra.mxu1 %v4102_v8  ;;  %1492 = vmatpush.msra.mxu2 %v4103_v48 }
 0x38e   :  { %1512 = vmatpush.msra.mxu3 %v4104_v56  ;;  %1532 = vmatpush.msrb.mxu0 %v3548_v59 }
 0x38f   :  { %1473 = vmatpush.msra.mxu1 %v4106_v54  ;;  %1493 = vmatpush.msra.mxu2 %v4107_v55 }
 0x390   :  { %1513 = vmatpush.msra.mxu3 %v4108_v11  ;;  %1533 = vmatpush.msrb.mxu0 %v4109_v32 }
 0x391   :  { %1474 = vmatpush.msra.mxu1 %v4110_v61  ;;  %1494 = vmatpush.msra.mxu2 %v4111_v39 }
 0x392   :  { %1514 = vmatpush.msra.mxu3 %v4112_v44  ;;  %1534 = vmatpush.msrb.mxu0 %v4113_v9 }
 0x3ee   :  { %v1182_v60 = vpop.f32.mrf.mxu1 }
 0x3ef   :  { %v1245_v35 = vadd.f32 %v1182_v60, %v4114_v51  ;;  %v1242_v9 = vpop.f32.mrf.mxu0 }
 0x3f1   :  { %v2145_v47 = vmul.f32 -1.442695, %v1245_v35  ;;  %v4117_v35 = vld [vmem:[#allocation67_spill] sm:$0xff] }
 0x3f3   :  { %2226 = vpow2.f32 %v2145_v47  ;;  %v1248_v47 = vadd.f32 %v1242_v9, %v4117_v35 }
 0x3f4   :  { %v1202_v52 = vpop.f32.mrf.mxu2 }
 0x3f5   :  { %v1246_v46 = vadd.f32 %v1202_v52, %v4115_v49  ;;  %v1222_v23 = vpop.f32.mrf.mxu3 }
 0x3f6   :  { %v1247_v15 = vadd.f32 %v1222_v23, %v4116_v63 }
 0x3f7   :  { %v2146_v27 = vmul.f32 -1.442695, %v1246_v46 }
 0x3f8   :  { %v2147_v57 = vmul.f32 -1.442695, %v1247_v15 }
 0x3f9   :  { %v2227_v32 = vpop.eup %2226  ;;  %2228 = vpow2.f32 %v2146_v27 }
 0x3fa   :  { %v1258_v39 = vadd.f32 1.0, %v2227_v32  ;;  %2230 = vpow2.f32 %v2147_v57 }
 0x3fc   :  { %2232 = vrcp.f32 %v1258_v39  ;;  %v1272_v23 = vand.u32 2147483648, %v1258_v39  ;;  %v1270_v63 = vand.u32 2147483647, %v1258_v39  ;;  %vm1266_vm10 = vweird.f32 %v1258_v39 }
 0x3fe   :  { %vm1271_vm12 = vcmp.eq.f32.partialorder %v1270_v63, 8.507059e+37 }
 0x3ff   :  { %v2229_v44 = vpop.eup %2228 }
 0x400   :  { %v2231_v61 = vpop.eup %2230  ;;  %v1259_v11 = vadd.f32 1.0, %v2229_v44  ;;  %v1273_v44 = vor.u32 1.1754944e-38, %v1272_v23 }
 0x401   :  { %v1260_v60 = vadd.f32 1.0, %v2231_v61 }
 0x402   :  { %v2233_v51 = vpop.eup %2232  ;;  %2234 = vrcp.f32 %v1259_v11  ;;  %v1287_v59 = vand.u32 2147483648, %v1259_v11  ;;  %vm1281_vm14 = vweird.f32 %v1259_v11 }
 0x403   :  { %v1262_v52 = vmul.f32 %v2233_v51, %v1258_v39  ;;  %2236 = vrcp.f32 %v1260_v60  ;;  %vm1267_vm9 = vweird.f32 %v2233_v51  ;;  %vm1296_vm3 = vweird.f32 %v1260_v60 }
 0x404   :  { %2238 = vtanh.f32 %v1248_v47  ;;  %vm1268_vm11 = vmor %vm1266_vm10, %vm1267_vm9  ;;  %v1285_v47 = vand.u32 2147483647, %v1259_v11 }
 0x405   :  { %v1263_v49 = vsub.f32 1.0, %v1262_v52 }
 0x406   :  { %vm1286_vm0 = vcmp.eq.f32.partialorder %v1285_v47, 8.507059e+37  ;;  %v3630_v47 = vld [vmem:[#allocation9 + $0xb8] sm:$0xff] }
 0x407   :  { %v1264_v46 = vmul.f32 %v2233_v51, %v1263_v49  ;;  %4119 = vst [vmem:[#allocation35_spill] sm:$0xff] %v3630_v47 }
 0x408   :  { %v2235_v15 = vpop.eup %2234 }
 0x409   :  { %v2237_v27 = vpop.eup %2236  ;;  %v1265_v57 = vadd.f32 %v2233_v51, %v1264_v46  ;;  %v1277_v32 = vmul.f32 %v2235_v15, %v1259_v11  ;;  %vm1282_vm13 = vweird.f32 %v2235_v15  ;;  %v1288_v46 = vor.u32 1.1754944e-38, %v1287_v59 }
 0x40a   :  { %v1292_v61 = vmul.f32 %v2237_v27, %v1260_v60  ;;  %v2239_v35 = vpop.eup %2238  ;;  %vm1283_vm15 = vmor %vm1281_vm14, %vm1282_vm13  ;;  %vm1297_vm1 = vweird.f32 %v2237_v27 }
 0x40b   :  { %v1269_v55 = vsel %vm1268_vm11, %v2233_v51, %v1265_v57  ;;  %v1278_v9 = vsub.f32 1.0, %v1277_v32  ;;  %vm1298_vm4 = vmor %vm1296_vm3, %vm1297_vm1  ;;  %v3594_v32 = vld [vmem:[#allocation9 + $0x178] sm:$0xff] }
 0x40c   :  { %v1274_v54 = vsel %vm1271_vm12, %v1273_v44, %v1269_v55  ;;  %v1293_v49 = vsub.f32 1.0, %v1292_v61  ;;  %v1302_v55 = vand.u32 2147483648, %v1260_v60  ;;  %v3600_v44 = vld [vmem:[#allocation9 + $0x158] sm:$0xff] }
 0x40d   :  { %v1308_v52 = vmul.f32 %v2239_v35, %v1274_v54  ;;  %v1279_v56 = vmul.f32 %v2235_v15, %v1278_v9  ;;  %v1300_v54 = vand.u32 2147483647, %v1260_v60  ;;  %v3582_v60 = vld [vmem:[#allocation9 + $0x1b8] sm:$0xff] }
 0x40e   :  { %v1294_v23 = vmul.f32 %v2237_v27, %v1293_v49  ;;  %v1303_v11 = vor.u32 1.1754944e-38, %v1302_v55  ;;  %v3606_v61 = vld [vmem:[#allocation9 + $0x138] sm:$0xff]  ;;  %v4126_v55 = vld [vmem:[#allocation21_spill] sm:$0xff] }
 0x40f   :  { %v1280_v48 = vadd.f32 %v2235_v15, %v1279_v56  ;;  %vm1301_vm5 = vcmp.eq.f32.partialorder %v1300_v54, 8.507059e+37  ;;  %v3612_v9 = vld [vmem:[#allocation9 + $0x118] sm:$0xff]  ;;  %v4127_v54 = vld [vmem:[#allocation33_spill] sm:$0xff] }
 0x410   :  { %v1295_v57 = vadd.f32 %v2237_v27, %v1294_v23  ;;  %v3618_v35 = vld [vmem:[#allocation9 + $0xf8] sm:$0xff] }
 0x411   :  { %v1284_v39 = vsel %vm1283_vm15, %v2235_v15, %v1280_v48  ;;  %v3636_v49 = vld [vmem:[#allocation9 + $0x98] sm:$0xff] }
 0x412   :  { %v1289_v8 = vsel %vm1286_vm0, %v1288_v46, %v1284_v39  ;;  %v1299_v56 = vsel %vm1298_vm4, %v2237_v27, %v1295_v57  ;;  %v3588_v27 = vld [vmem:[#allocation9 + $0x198] sm:$0xff]  ;;  %4120 = vst [vmem:[#allocation36_spill] sm:$0xff] %v3636_v49  ;;  %v4125_v57 = vld [vmem:[#allocation32_spill] sm:$0xff] }
 0x413   :  { %v1307_v51 = vmul.f32 %v1289_v8, %v3490_v58  ;;  %v1304_v48 = vsel %vm1301_vm5, %v1303_v11, %v1299_v56  ;;  %v3570_v58 = vld [vmem:[#allocation9 + $0x1f8] sm:$0xff]  ;;  %v4128_v56 = vld [vmem:[#allocation45_spill] sm:$0xff] }
 0x414   :  { %v3576_v8 = vld [vmem:[#allocation9 + $0x1d8] sm:$0xff] }
 0x415   :  { %v3564_v63 = vadd.f32 %v1308_v52, %v1307_v51  ;;  %v3624_v52 = vld [vmem:[#allocation9 + $0xd8] sm:$0xff]  ;;  %v4124_v51 = vld [vmem:[#allocation28_spill] sm:$0xff] }
 0x416   :  { %4118 = vst [vmem:[#allocation26_spill] sm:$0xff] %v3624_v52  ;;  %v3642_v46 = vld [vmem:[#allocation9 + $0x78] sm:$0xff] }
 0x417   :  { %2240 = vtanh.f32 %v3564_v63  ;;  %4121 = vst [vmem:[#allocation37_spill] sm:$0xff] %v3642_v46  ;;  %v4122_v39 = vld [vmem:[#allocation19_spill] sm:$0xff] }
 0x418   :  { %v4123_v23 = vld [vmem:[#allocation31_spill] sm:$0xff] }
 0x419   :  { %v3652_v11 = vld [vmem:[#allocation9 + $0x38] sm:$0xff] }
 0x41a   :  { %4129 = vst [vmem:[#allocation40_spill] sm:$0xff] %v3652_v11 }
 0x41d   :  { %v2241_v59 = vpop.eup %2240 }
 0x41e   :  { %v1311_v15 = vmul.f32 %v2241_v59, %v1304_v48  ;;  %v4130_v59 = vld [vmem:[#allocation30_spill] sm:$0xff]  ;;  %v4131_v48 = vld [vmem:[#allocation23_spill] sm:$0xff] }
 0x420   :  { %1328 = vmatmul.f32.vlgmr.msrb.gmra.mxu1 %v1311_v15  ;;  %1348 = vmatmul.f32.vlgmr.msrb.gmra.mxu2 %v1311_v15 }
 0x421   :  { %1368 = vmatmul.f32.vlgmr.msrb.gmra.mxu3 %v1311_v15  ;;  %1388 = vmatmul.f32.vlgmr.msra.gmra.mxu0 %v1311_v15  ;;  %v4132_v15 = vld [vmem:[#allocation34_spill] sm:$0xff] }
 0x422   :  { %1606 = vmatpush.msrb.mxu1 %v3325_v62  ;;  %1626 = vmatpush.msrb.mxu2 %v3328_v5 }
 0x423   :  { %1646 = vmatpush.msrb.mxu3 %v3331_v6  ;;  %1666 = vmatpush.msra.mxu0 %v3570_v58 }
 0x424   :  { %1607 = vmatpush.msrb.mxu1 %v3335_v18  ;;  %1627 = vmatpush.msrb.mxu2 %v3338_v0 }
 0x425   :  { %1647 = vmatpush.msrb.mxu3 %v3341_v21  ;;  %1667 = vmatpush.msra.mxu0 %v3576_v8 }
 0x426   :  { %1608 = vmatpush.msrb.mxu1 %v3345_v53  ;;  %1628 = vmatpush.msrb.mxu2 %v3348_v24 }
 0x427   :  { %1648 = vmatpush.msrb.mxu3 %v3351_v17  ;;  %1668 = vmatpush.msra.mxu0 %v3582_v60 }
 0x428   :  { %1609 = vmatpush.msrb.mxu1 %v3355_v50  ;;  %1629 = vmatpush.msrb.mxu2 %v3358_v22 }
 0x429   :  { %1649 = vmatpush.msrb.mxu3 %v3361_v12  ;;  %1669 = vmatpush.msra.mxu0 %v3588_v27 }
 0x42a   :  { %1610 = vmatpush.msrb.mxu1 %v3365_v26  ;;  %1630 = vmatpush.msrb.mxu2 %v3368_v10 }
 0x42b   :  { %1650 = vmatpush.msrb.mxu3 %v3371_v25  ;;  %1670 = vmatpush.msra.mxu0 %v3594_v32 }
 0x42c   :  { %1611 = vmatpush.msrb.mxu1 %v3375_v2  ;;  %1631 = vmatpush.msrb.mxu2 %v3378_v3 }
 0x42d   :  { %1651 = vmatpush.msrb.mxu3 %v3381_v42  ;;  %1671 = vmatpush.msra.mxu0 %v3600_v44 }
 0x42e   :  { %1612 = vmatpush.msrb.mxu1 %v3385_v28  ;;  %1632 = vmatpush.msrb.mxu2 %v3388_v29 }
 0x42f   :  { %1652 = vmatpush.msrb.mxu3 %v3391_v31  ;;  %1672 = vmatpush.msra.mxu0 %v3606_v61 }
 0x430   :  { %1613 = vmatpush.msrb.mxu1 %v3395_v33  ;;  %1633 = vmatpush.msrb.mxu2 %v3398_v34 }
 0x431   :  { %1653 = vmatpush.msrb.mxu3 %v3401_v36  ;;  %1673 = vmatpush.msra.mxu0 %v3612_v9 }
 0x432   :  { %1614 = vmatpush.msrb.mxu1 %v3405_v37  ;;  %1634 = vmatpush.msrb.mxu2 %v3408_v38 }
 0x433   :  { %1654 = vmatpush.msrb.mxu3 %v3411_v40  ;;  %1674 = vmatpush.msra.mxu0 %v3618_v35 }
 0x434   :  { %1615 = vmatpush.msrb.mxu1 %v3415_v41  ;;  %1635 = vmatpush.msrb.mxu2 %v3418_v43 }
 0x435   :  { %1655 = vmatpush.msrb.mxu3 %v3421_v45  ;;  %1675 = vmatpush.msra.mxu0 %v3624_v52 }
 0x436   :  { %1616 = vmatpush.msrb.mxu1 %v4090_v4  ;;  %1636 = vmatpush.msrb.mxu2 %v4091_v7 }
 0x437   :  { %1656 = vmatpush.msrb.mxu3 %v4092_v20  ;;  %1676 = vmatpush.msra.mxu0 %v3630_v47 }
 0x438   :  { %1617 = vmatpush.msrb.mxu1 %v4094_v13  ;;  %1637 = vmatpush.msrb.mxu2 %v4095_v19 }
 0x439   :  { %1657 = vmatpush.msrb.mxu3 %v4096_v16  ;;  %1677 = vmatpush.msra.mxu0 %v3636_v49 }
 0x43a   :  { %1618 = vmatpush.msrb.mxu1 %v4098_v30  ;;  %1638 = vmatpush.msrb.mxu2 %v4099_v1 }
 0x43b   :  { %1658 = vmatpush.msrb.mxu3 %v4100_v14  ;;  %1678 = vmatpush.msra.mxu0 %v3642_v46 }
 0x43c   :  { %1619 = vmatpush.msrb.mxu1 %v4122_v39  ;;  %1639 = vmatpush.msrb.mxu2 %v4123_v23  ;;  %v3658_v23 = vld [vmem:[#allocation9 + $0x18] sm:$0xff] }
 0x43d   :  { %1659 = vmatpush.msrb.mxu3 %v4124_v51  ;;  %1679 = vmatpush.msra.mxu0 %v4125_v57  ;;  %4133 = vst [vmem:[#allocation65_spill] sm:$0xff] %v3658_v23  ;;  %v4135_v51 = vld [vmem:[#allocation53_spill] sm:$0xff] }
 0x43e   :  { %1620 = vmatpush.msrb.mxu1 %v4126_v55  ;;  %1640 = vmatpush.msrb.mxu2 %v4127_v54  ;;  %v4134_v55 = vld [vmem:[#allocation51_spill] sm:$0xff] }
 0x43f   :  { %1660 = vmatpush.msrb.mxu3 %v4128_v56  ;;  %1680 = vmatpush.msra.mxu0 %v3652_v11  ;;  %v4136_v11 = vld [vmem:[#allocation55_spill] sm:$0xff] }
 0x440   :  { %1621 = vmatpush.msrb.mxu1 %v4130_v59  ;;  %1641 = vmatpush.msrb.mxu2 %v4131_v48 }
 0x441   :  { %1661 = vmatpush.msrb.mxu3 %v4132_v15  ;;  %1681 = vmatpush.msra.mxu0 %v3658_v23 }
 0x49d   :  { %v1329_v57 = vpop.f32.mrf.mxu1 }
 0x49e   :  { %v1392_v39 = vadd.f32 %v1329_v57, %v4134_v55  ;;  %v1389_v23 = vpop.f32.mrf.mxu0  ;;  %v4137_v55 = vld [vmem:[#allocation68_spill] sm:$0xff] }
 0x4a0   :  { %v2148_v54 = vmul.f32 -1.442695, %v1392_v39 }
 0x4a2   :  { %2242 = vpow2.f32 %v2148_v54  ;;  %v1395_v54 = vadd.f32 %v1389_v23, %v4137_v55 }
 0x4a3   :  { %v1349_v56 = vpop.f32.mrf.mxu2 }
 0x4a4   :  { %v1393_v46 = vadd.f32 %v1349_v56, %v4135_v51  ;;  %v1369_v1 = vpop.f32.mrf.mxu3 }
 0x4a5   :  { %v1394_v30 = vadd.f32 %v1369_v1, %v4136_v11 }
 0x4a6   :  { %v2149_v59 = vmul.f32 -1.442695, %v1393_v46 }
 0x4a7   :  { %v2150_v14 = vmul.f32 -1.442695, %v1394_v30 }
 0x4a8   :  { %v2243_v48 = vpop.eup %2242  ;;  %2244 = vpow2.f32 %v2149_v59 }
 0x4a9   :  { %v1405_v15 = vadd.f32 1.0, %v2243_v48  ;;  %2246 = vpow2.f32 %v2150_v14 }
 0x4ab   :  { %2248 = vrcp.f32 %v1405_v15  ;;  %v1419_v1 = vand.u32 2147483648, %v1405_v15  ;;  %v1417_v46 = vand.u32 2147483647, %v1405_v15  ;;  %vm1413_vm7 = vweird.f32 %v1405_v15 }
 0x4ad   :  { %vm1418_vm9 = vcmp.eq.f32.partialorder %v1417_v46, 8.507059e+37 }
 0x4ae   :  { %v2245_v49 = vpop.eup %2244 }
 0x4af   :  { %v2247_v19 = vpop.eup %2246  ;;  %v1406_v13 = vadd.f32 1.0, %v2245_v49  ;;  %v1420_v49 = vor.u32 1.1754944e-38, %v1419_v1 }
 0x4b0   :  { %v1407_v57 = vadd.f32 1.0, %v2247_v19 }
 0x4b1   :  { %v2249_v39 = vpop.eup %2248  ;;  %2250 = vrcp.f32 %v1406_v13  ;;  %v1434_v7 = vand.u32 2147483648, %v1406_v13  ;;  %vm1428_vm11 = vweird.f32 %v1406_v13 }
 0x4b2   :  { %v1409_v51 = vmul.f32 %v2249_v39, %v1405_v15  ;;  %2252 = vrcp.f32 %v1407_v57  ;;  %vm1414_vm6 = vweird.f32 %v2249_v39  ;;  %vm1443_vm15 = vweird.f32 %v1407_v57 }
 0x4b3   :  { %2254 = vtanh.f32 %v1395_v54  ;;  %vm1415_vm8 = vmor %vm1413_vm7, %vm1414_vm6  ;;  %v1432_v54 = vand.u32 2147483647, %v1406_v13 }
 0x4b4   :  { %v1410_v56 = vsub.f32 1.0, %v1409_v51 }
 0x4b5   :  { %vm1433_vm13 = vcmp.eq.f32.partialorder %v1432_v54, 8.507059e+37 }
 0x4b6   :  { %v1411_v30 = vmul.f32 %v2249_v39, %v1410_v56 }
 0x4b7   :  { %v2251_v11 = vpop.eup %2250 }
 0x4b8   :  { %v2253_v14 = vpop.eup %2252  ;;  %v1412_v59 = vadd.f32 %v2249_v39, %v1411_v30  ;;  %v1424_v48 = vmul.f32 %v2251_v11, %v1406_v13  ;;  %vm1429_vm10 = vweird.f32 %v2251_v11  ;;  %v1435_v30 = vor.u32 1.1754944e-38, %v1434_v7 }
 0x4b9   :  { %v1439_v19 = vmul.f32 %v2253_v14, %v1407_v57  ;;  %v2255_v55 = vpop.eup %2254  ;;  %vm1430_vm12 = vmor %vm1428_vm11, %vm1429_vm10  ;;  %vm1444_vm14 = vweird.f32 %v2253_v14 }
 0x4ba   :  { %v1416_v16 = vsel %vm1415_vm8, %v2249_v39, %v1412_v59  ;;  %v1425_v23 = vsub.f32 1.0, %v1424_v48  ;;  %vm1445_vm0 = vmor %vm1443_vm15, %vm1444_vm14 }
 0x4bb   :  { %v1421_v47 = vsel %vm1418_vm9, %v1420_v49, %v1416_v16  ;;  %v1440_v56 = vsub.f32 1.0, %v1439_v19  ;;  %v1449_v16 = vand.u32 2147483648, %v1407_v57  ;;  %v4166_v19 = vld [vmem:[#allocation69_spill] sm:$0xff] }
 0x4bc   :  { %v1455_v51 = vmul.f32 %v2255_v55, %v1421_v47  ;;  %v1426_v4 = vmul.f32 %v2251_v11, %v1425_v23  ;;  %v1447_v47 = vand.u32 2147483647, %v1407_v57 }
 0x4bd   :  { %v1441_v1 = vmul.f32 %v2253_v14, %v1440_v56  ;;  %v1450_v13 = vor.u32 1.1754944e-38, %v1449_v16 }
 0x4be   :  { %v1427_v20 = vadd.f32 %v2251_v11, %v1426_v4  ;;  %vm1448_vm1 = vcmp.eq.f32.partialorder %v1447_v47, 8.507059e+37 }
 0x4bf   :  { %v1442_v59 = vadd.f32 %v2253_v14, %v1441_v1 }
 0x4c0   :  { %v1431_v15 = vsel %vm1430_vm12, %v2251_v11, %v1427_v20 }
 0x4c1   :  { %v1436_v52 = vsel %vm1433_vm13, %v1435_v30, %v1431_v15  ;;  %v1446_v4 = vsel %vm1445_vm0, %v2253_v14, %v1442_v59 }
 0x4c2   :  { %v1454_v39 = vmul.f32 %v1436_v52, %v3564_v63  ;;  %v1451_v20 = vsel %vm1448_vm1, %v1450_v13, %v1446_v4  ;;  %v4164_v63 = vld [vmem:[#allocation56_spill] sm:$0xff] }
 0x4c4   :  { %v3666_v46 = vadd.f32 %v1455_v51, %v1454_v39 }
 0x4c6   :  { %2256 = vtanh.f32 %v3666_v46 }
 0x4cc   :  { %v2257_v7 = vpop.eup %2256 }
 0x4cd   :  { %v1458_v11 = vmul.f32 %v2257_v7, %v1451_v20 }
 0x4cf   :  { %1475 = vmatmul.f32.vlgmr.msra.gmra.mxu1 %v1458_v11  ;;  %1495 = vmatmul.f32.vlgmr.msra.gmra.mxu2 %v1458_v11 }
 0x4d0   :  { %1515 = vmatmul.f32.vlgmr.msra.gmra.mxu3 %v1458_v11  ;;  %1535 = vmatmul.f32.vlgmr.msrb.gmra.mxu0 %v1458_v11 }
 0x4d1   :  { %1793 = vmatpush.msra.mxu3 %v3331_v6  ;;  %1753 = vmatpush.msra.mxu1 %v3325_v62  ;;  %v4138_v62 = vld [vmem:[#allocation26_spill] sm:$0xff]  ;;  %v4140_v6 = vld [vmem:[#allocation16_spill] sm:$0xff] }
 0x4d2   :  { %1773 = vmatpush.msra.mxu2 %v3328_v5  ;;  %1813 = vmatpush.msrb.mxu0 %v3570_v58  ;;  %v4139_v5 = vld [vmem:[#allocation20_spill] sm:$0xff] }
 0x4d3   :  { %1794 = vmatpush.msra.mxu3 %v3341_v21  ;;  %1754 = vmatpush.msra.mxu1 %v3335_v18  ;;  %v4141_v18 = vld [vmem:[#allocation24_spill] sm:$0xff]  ;;  %v4143_v21 = vld [vmem:[#allocation22_spill] sm:$0xff] }
 0x4d4   :  { %1774 = vmatpush.msra.mxu2 %v3338_v0  ;;  %1814 = vmatpush.msrb.mxu0 %v3576_v8  ;;  %v4142_v0 = vld [vmem:[#allocation35_spill] sm:$0xff] }
 0x4d5   :  { %1795 = vmatpush.msra.mxu3 %v3351_v17  ;;  %1755 = vmatpush.msra.mxu1 %v3345_v53  ;;  %v4144_v53 = vld [vmem:[#allocation17_spill] sm:$0xff]  ;;  %v4146_v17 = vld [vmem:[#allocation36_spill] sm:$0xff] }
 0x4d6   :  { %1775 = vmatpush.msra.mxu2 %v3348_v24  ;;  %1815 = vmatpush.msrb.mxu0 %v3582_v60  ;;  %v4145_v24 = vld [vmem:[#allocation27_spill] sm:$0xff]  ;;  %v4165_v60 = vld [vmem:[#allocation58_spill] sm:$0xff] }
 0x4d7   :  { %1796 = vmatpush.msra.mxu3 %v3361_v12  ;;  %1756 = vmatpush.msra.mxu1 %v3355_v50  ;;  %v4147_v50 = vld [vmem:[#allocation25_spill] sm:$0xff] }
 0x4d8   :  { %1776 = vmatpush.msra.mxu2 %v3358_v22  ;;  %1816 = vmatpush.msrb.mxu0 %v3588_v27  ;;  %v4148_v22 = vld [vmem:[#allocation18_spill] sm:$0xff]  ;;  %v4149_v12 = vld [vmem:[#allocation29_spill] sm:$0xff] }
 0x4d9   :  { %1797 = vmatpush.msra.mxu3 %v3371_v25  ;;  %1757 = vmatpush.msra.mxu1 %v3365_v26  ;;  %v4150_v26 = vld [vmem:[#allocation37_spill] sm:$0xff]  ;;  %v4152_v25 = vld [vmem:[#allocation19_spill] sm:$0xff] }
 0x4da   :  { %1777 = vmatpush.msra.mxu2 %v3368_v10  ;;  %1817 = vmatpush.msrb.mxu0 %v3594_v32  ;;  %v4151_v10 = vld [vmem:[#allocation28_spill] sm:$0xff] }
 0x4db   :  { %1798 = vmatpush.msra.mxu3 %v3381_v42  ;;  %1758 = vmatpush.msra.mxu1 %v3375_v2  ;;  %v4153_v2 = vld [vmem:[#allocation31_spill] sm:$0xff]  ;;  %v4155_v42 = vld [vmem:[#allocation45_spill] sm:$0xff] }
 0x4dc   :  { %1778 = vmatpush.msra.mxu2 %v3378_v3  ;;  %1818 = vmatpush.msrb.mxu0 %v3600_v44  ;;  %v4154_v3 = vld [vmem:[#allocation32_spill] sm:$0xff] }
 0x4dd   :  { %1799 = vmatpush.msra.mxu3 %v3391_v31  ;;  %1759 = vmatpush.msra.mxu1 %v3385_v28  ;;  %v4156_v28 = vld [vmem:[#allocation21_spill] sm:$0xff]  ;;  %v4158_v31 = vld [vmem:[#allocation40_spill] sm:$0xff] }
 0x4de   :  { %1779 = vmatpush.msra.mxu2 %v3388_v29  ;;  %1819 = vmatpush.msrb.mxu0 %v3606_v61  ;;  %v4157_v29 = vld [vmem:[#allocation33_spill] sm:$0xff] }
 0x4df   :  { %1800 = vmatpush.msra.mxu3 %v3401_v36  ;;  %1760 = vmatpush.msra.mxu1 %v3395_v33  ;;  %v4159_v33 = vld [vmem:[#allocation34_spill] sm:$0xff]  ;;  %v4161_v36 = vld [vmem:[#allocation23_spill] sm:$0xff] }
 0x4e0   :  { %1780 = vmatpush.msra.mxu2 %v3398_v34  ;;  %1820 = vmatpush.msrb.mxu0 %v3612_v9  ;;  %v4160_v34 = vld [vmem:[#allocation30_spill] sm:$0xff] }
 0x4e1   :  { %1801 = vmatpush.msra.mxu3 %v3411_v40  ;;  %1761 = vmatpush.msra.mxu1 %v3405_v37  ;;  %v4162_v37 = vld [vmem:[#allocation65_spill] sm:$0xff]  ;;  %v4163_v40 = vld [vmem:[#allocation54_spill] sm:$0xff] }
 0x4e2   :  { %1781 = vmatpush.msra.mxu2 %v3408_v38  ;;  %1821 = vmatpush.msrb.mxu0 %v3618_v35 }
 0x4e3   :  { %1802 = vmatpush.msra.mxu3 %v3421_v45  ;;  %1762 = vmatpush.msra.mxu1 %v3415_v41 }
 0x4e4   :  { %1782 = vmatpush.msra.mxu2 %v3418_v43  ;;  %1822 = vmatpush.msrb.mxu0 %v4138_v62 }
 0x4e5   :  { %1803 = vmatpush.msra.mxu3 %v4139_v5  ;;  %1763 = vmatpush.msra.mxu1 %v4140_v6 }
 0x4e6   :  { %1783 = vmatpush.msra.mxu2 %v4141_v18  ;;  %1823 = vmatpush.msrb.mxu0 %v4142_v0 }
 0x4e7   :  { %1804 = vmatpush.msra.mxu3 %v4143_v21  ;;  %1764 = vmatpush.msra.mxu1 %v4144_v53 }
 0x4e8   :  { %1784 = vmatpush.msra.mxu2 %v4145_v24  ;;  %1824 = vmatpush.msrb.mxu0 %v4146_v17 }
 0x4e9   :  { %1805 = vmatpush.msra.mxu3 %v4147_v50  ;;  %1765 = vmatpush.msra.mxu1 %v4148_v22 }
 0x4ea   :  { %1785 = vmatpush.msra.mxu2 %v4149_v12  ;;  %1825 = vmatpush.msrb.mxu0 %v4150_v26 }
 0x4eb   :  { %1806 = vmatpush.msra.mxu3 %v4151_v10  ;;  %1766 = vmatpush.msra.mxu1 %v4152_v25 }
 0x4ec   :  { %1786 = vmatpush.msra.mxu2 %v4153_v2  ;;  %1826 = vmatpush.msrb.mxu0 %v4154_v3 }
 0x4ed   :  { %1807 = vmatpush.msra.mxu3 %v4155_v42  ;;  %1767 = vmatpush.msra.mxu1 %v4156_v28 }
 0x4ee   :  { %1787 = vmatpush.msra.mxu2 %v4157_v29  ;;  %1827 = vmatpush.msrb.mxu0 %v4158_v31  ;;  %v4167_v29 = vld [vmem:[#allocation57_spill] sm:$0xff] }
 0x4ef   :  { %1808 = vmatpush.msra.mxu3 %v4159_v33  ;;  %1768 = vmatpush.msra.mxu1 %v4160_v34  ;;  %v1914_v34 = vld [vmem:[#allocation10 + $0x70] sm:$0xff] }
 0x4f0   :  { %1788 = vmatpush.msra.mxu2 %v4161_v36  ;;  %1828 = vmatpush.msrb.mxu0 %v4162_v37  ;;  %v1912_v36 = vld [vmem:[#allocation10 + $0x60] sm:$0xff] }
 0x54c   :  { %v1476_v38 = vpop.f32.mrf.mxu1 }
 0x54d   :  { %v1539_v41 = vadd.f32 %v1476_v38, %v4163_v40  ;;  %v1536_v52 = vpop.f32.mrf.mxu0  ;;  %v1910_v38 = vld [vmem:[#allocation10 + $0x50] sm:$0xff]  ;;  %v4168_v40 = vld [vmem:[#allocation59_spill] sm:$0xff] }
 0x54e   :  { %v1542_v23 = vadd.f32 %v1536_v52, %v4166_v19 }
 0x54f   :  { %v2151_v43 = vmul.f32 -1.442695, %v1539_v41 }
 0x551   :  { %2258 = vpow2.f32 %v2151_v43 }
 0x552   :  { %v1496_v45 = vpop.f32.mrf.mxu2 }
 0x553   :  { %v1540_v58 = vadd.f32 %v1496_v45, %v4164_v63  ;;  %v1516_v8 = vpop.f32.mrf.mxu3  ;;  %v4169_v45 = vld [vmem:[#allocation61_spill] sm:$0xff] }
 0x554   :  { %v1541_v27 = vadd.f32 %v1516_v8, %v4165_v60 }
 0x555   :  { %v2152_v32 = vmul.f32 -1.442695, %v1540_v58  ;;  %v1908_v58 = vld [vmem:[#allocation10 + $0x40] sm:$0xff] }
 0x556   :  { %v2153_v44 = vmul.f32 -1.442695, %v1541_v27  ;;  %v1906_v27 = vld [vmem:[#allocation10 + $0x30] sm:$0xff] }
 0x557   :  { %v2259_v61 = vpop.eup %2258  ;;  %2260 = vpow2.f32 %v2152_v32 }
 0x558   :  { %v1552_v9 = vadd.f32 1.0, %v2259_v61  ;;  %2262 = vpow2.f32 %v2153_v44  ;;  %v1904_v61 = vld [vmem:[#allocation10 + $0x20] sm:$0xff] }
 0x55a   :  { %2264 = vrcp.f32 %v1552_v9  ;;  %v1566_v54 = vand.u32 2147483648, %v1552_v9  ;;  %v1564_v30 = vand.u32 2147483647, %v1552_v9  ;;  %vm1560_vm4 = vweird.f32 %v1552_v9 }
 0x55c   :  { %v1567_v16 = vor.u32 1.1754944e-38, %v1566_v54  ;;  %vm1565_vm6 = vcmp.eq.f32.partialorder %v1564_v30, 8.507059e+37 }
 0x55d   :  { %v2261_v35 = vpop.eup %2260 }
 0x55e   :  { %v2263_v57 = vpop.eup %2262  ;;  %v1553_v14 = vadd.f32 1.0, %v2261_v35 }
 0x55f   :  { %v1554_v48 = vadd.f32 1.0, %v2263_v57 }
 0x560   :  { %v2265_v49 = vpop.eup %2264  ;;  %2266 = vrcp.f32 %v1553_v14  ;;  %v1581_v11 = vand.u32 2147483648, %v1553_v14  ;;  %v1579_v6 = vand.u32 2147483647, %v1553_v14  ;;  %vm1575_vm8 = vweird.f32 %v1553_v14 }
 0x561   :  { %v1556_v55 = vmul.f32 %v2265_v49, %v1552_v9  ;;  %2268 = vrcp.f32 %v1554_v48  ;;  %vm1561_vm3 = vweird.f32 %v2265_v49  ;;  %v1596_v26 = vand.u32 2147483648, %v1554_v48  ;;  %v1902_v9 = vld [vmem:[#allocation10 + $0x10] sm:$0xff] }
 0x562   :  { %2270 = vtanh.f32 %v1542_v23  ;;  %vm1562_vm5 = vmor %vm1560_vm4, %vm1561_vm3  ;;  %v1582_v21 = vor.u32 1.1754944e-38, %v1581_v11  ;;  %vm1580_vm10 = vcmp.eq.f32.partialorder %v1579_v6, 8.507059e+37  ;;  %vm1590_vm12 = vweird.f32 %v1554_v48  ;;  %v4170_v23 = vld [vmem:[#allocation70_spill] sm:$0xff] }
 0x563   :  { %v1557_v51 = vsub.f32 1.0, %v1556_v55  ;;  %v1594_v10 = vand.u32 2147483647, %v1554_v48  ;;  %v1597_v2 = vor.u32 1.1754944e-38, %v1596_v26 }
 0x565   :  { %v1558_v56 = vmul.f32 %v2265_v49, %v1557_v51  ;;  %vm1595_vm14 = vcmp.eq.f32.partialorder %v1594_v10, 8.507059e+37 }
 0x566   :  { %v2267_v15 = vpop.eup %2266 }
 0x567   :  { %v2269_v1 = vpop.eup %2268  ;;  %v1559_v39 = vadd.f32 %v2265_v49, %v1558_v56  ;;  %v1571_v59 = vmul.f32 %v2267_v15, %v1553_v14  ;;  %vm1576_vm7 = vweird.f32 %v2267_v15 }
 0x568   :  { %v1586_v47 = vmul.f32 %v2269_v1, %v1554_v48  ;;  %v2271_v7 = vpop.eup %2270  ;;  %vm1577_vm9 = vmor %vm1575_vm8, %vm1576_vm7  ;;  %vm1591_vm11 = vweird.f32 %v2269_v1 }
 0x569   :  { %v1563_v4 = vsel %vm1562_vm5, %v2265_v49, %v1559_v39  ;;  %v1572_v13 = vsub.f32 1.0, %v1571_v59  ;;  %vm1592_vm13 = vmor %vm1590_vm12, %vm1591_vm11  ;;  %v1900_v49 = vld [vmem:[#allocation10] sm:$0xff]  ;;  %vm1988_vm12 = vcmask 523264  }
 0x56a   :  { %v1568_v20 = vsel %vm1565_vm6, %v1567_v16, %v1563_v4  ;;  %v1587_v18 = vsub.f32 1.0, %v1586_v47 }
 0x56b   :  { %v1602_v62 = vmul.f32 %v2271_v7, %v1568_v20  ;;  %v1573_v5 = vmul.f32 %v2267_v15, %v1572_v13 }
 0x56c   :  { %v1588_v17 = vmul.f32 %v2269_v1, %v1587_v18 }
 0x56d   :  { %v1574_v0 = vadd.f32 %v2267_v15, %v1573_v5 }
 0x56e   :  { %v1589_v12 = vadd.f32 %v2269_v1, %v1588_v17 }
 0x56f   :  { %v1578_v53 = vsel %vm1577_vm9, %v2267_v15, %v1574_v0 }
 0x570   :  { %v1583_v24 = vsel %vm1580_vm10, %v1582_v21, %v1578_v53  ;;  %v1593_v25 = vsel %vm1592_vm13, %v2269_v1, %v1589_v12 }
 0x571   :  { %v1601_v50 = vmul.f32 %v1583_v24, %v3666_v46  ;;  %v1598_v42 = vsel %vm1595_vm14, %v1597_v2, %v1593_v25 }
 0x573   :  { %v3738_v22 = vadd.f32 %v1602_v62, %v1601_v50 }
 0x575   :  { %2272 = vtanh.f32 %v3738_v22 }
 0x57b   :  { %v2273_v3 = vpop.eup %2272 }
 0x57c   :  { %v1605_v28 = vmul.f32 %v2273_v3, %v1598_v42 }
 0x57e   :  { %1622 = vmatmul.f32.vlgmr.msrb.gmra.mxu1 %v1605_v28  ;;  %1642 = vmatmul.f32.vlgmr.msrb.gmra.mxu2 %v1605_v28 }
 0x57f   :  { %1662 = vmatmul.f32.vlgmr.msrb.gmra.mxu3 %v1605_v28  ;;  %1682 = vmatmul.f32.vlgmr.msra.gmra.mxu0 %v1605_v28 }
 0x580   :  { %2000 = vmatpush.msrb.mxu3 %v1914_v34  ;;  %v4171_v34 = vld [vmem:[#allocation64_spill] sm:$0xff] }
 0x582   :  { %2001 = vmatpush.msrb.mxu3 %v1912_v36 }
 0x584   :  { %2002 = vmatpush.msrb.mxu3 %v1910_v38  ;;  %v1909_v38 = vld [vmem:[#allocation10 + $0x48] sm:$0xff] }
 0x586   :  { %2003 = vmatpush.msrb.mxu3 %v1908_v58  ;;  %v1946_v58 = vld [vmem:[%s3879_s13 + $0xf0] sm:$0xff] }
 0x587   :  { %1948 = vmatpush.msrb.mxu1 %v1946_v58 }
 0x588   :  { %2004 = vmatpush.msrb.mxu3 %v1906_v27  ;;  %v1945_v27 = vld [vmem:[%s3879_s13 + $0xe8] sm:$0xff] }
 0x58a   :  { %2005 = vmatpush.msrb.mxu3 %v1904_v61  ;;  %v1940_v61 = vld [vmem:[%s3879_s13 + $0xc0] sm:$0xff] }
 0x58c   :  { %2006 = vmatpush.msrb.mxu3 %v1902_v9  ;;  %v1941_v9 = vld [vmem:[%s3879_s13 + $0xc8] sm:$0xff] }
 0x58e   :  { %2007 = vmatpush.msrb.mxu3 %v1900_v49  ;;  %v1934_v49 = vld [vmem:[%s3879_s13 + $0x90] sm:$0xff] }
 0x5fb   :  { %v1623_v46 = vpop.f32.mrf.mxu1 }
 0x5fc   :  { %v1686_v31 = vadd.f32 %v1623_v46, %v4167_v29  ;;  %v1683_v52 = vpop.f32.mrf.mxu0 }
 0x5fd   :  { %v1689_v55 = vadd.f32 %v1683_v52, %v4170_v23  ;;  %v1939_v52 = vld [vmem:[%s3879_s13 + $0xb8] sm:$0xff]  ;;  %v4172_v23 = vld [vmem:[#allocation60_spill] sm:$0xff] }
 0x5fe   :  { %v2154_v33 = vmul.f32 -1.442695, %v1686_v31  ;;  %v2177_v31 = vld [vmem:[#allocation7] ss:$0 sm:$0xff] }
 0x5ff   :  { %v430_v36 = vadd.f32 %v2177_v31, %v4171_v34 }
 0x600   :  { %2274 = vpow2.f32 %v2154_v33  ;;  %v1915_v33 = vld [vmem:[#allocation10 + $0x78] sm:$0xff] }
 0x601   :  { %v1643_v37 = vpop.f32.mrf.mxu2 }
 0x602   :  { %v1687_v41 = vadd.f32 %v1643_v37, %v4168_v40  ;;  %v1663_v43 = vpop.f32.mrf.mxu3  ;;  %v1911_v37 = vld [vmem:[#allocation10 + $0x58] sm:$0xff]  ;;  %v432_v40 = vmax.f32 %v430_v36, 0.0 }
 0x603   :  { %v1688_v63 = vadd.f32 %v1663_v43, %v4169_v45  ;;  %v1905_v43 = vld [vmem:[#allocation10 + $0x28] sm:$0xff]  ;;  %v1903_v45 = vld [vmem:[#allocation10 + $0x18] sm:$0xff] }
 0x604   :  { %v2155_v8 = vmul.f32 -1.442695, %v1687_v41  ;;  %v1907_v41 = vld [vmem:[#allocation10 + $0x38] sm:$0xff] }
 0x605   :  { %v2156_v60 = vmul.f32 -1.442695, %v1688_v63  ;;  %v1901_v63 = vld [vmem:[#allocation10 + $0x8] sm:$0xff] }
 0x606   :  { %v2275_v32 = vpop.eup %2274  ;;  %2276 = vpow2.f32 %v2155_v8  ;;  %v1947_v8 = vld [vmem:[%s3879_s13 + $0xf8] sm:$0xff] }
 0x607   :  { %v1699_v44 = vadd.f32 1.0, %v2275_v32  ;;  %2278 = vpow2.f32 %v2156_v60  ;;  %1968 = vmatpush.msrb.mxu2 %v1947_v8  ;;  %v1944_v60 = vld [vmem:[%s3879_s13 + $0xe0] sm:$0xff]  ;;  %v1942_v32 = vld [vmem:[%s3879_s13 + $0xd0] sm:$0xff] }
 0x608   :  { %1949 = vmatpush.msrb.mxu1 %v1944_v60 }
 0x609   :  { %2280 = vrcp.f32 %v1699_v44  ;;  %v1713_v56 = vand.u32 2147483648, %v1699_v44  ;;  %v1711_v15 = vand.u32 2147483647, %v1699_v44  ;;  %vm1707_vm0 = vweird.f32 %v1699_v44  ;;  %1969 = vmatpush.msrb.mxu2 %v1945_v27 }
 0x60a   :  { %1950 = vmatpush.msrb.mxu1 %v1942_v32 }
 0x60b   :  { %v1714_v47 = vor.u32 1.1754944e-38, %v1713_v56  ;;  %vm1712_vm3 = vcmp.eq.f32.partialorder %v1711_v15, 8.507059e+37  ;;  %v1931_v15 = vld [vmem:[%s3879_s13 + $0x78] sm:$0xff] }
 0x60c   :  { %v2277_v35 = vpop.eup %2276  ;;  %1951 = vmatpush.msrb.mxu1 %v1940_v61 }
 0x60d   :  { %v2279_v57 = vpop.eup %2278  ;;  %v1700_v14 = vadd.f32 1.0, %v2277_v35  ;;  %v1938_v35 = vld [vmem:[%s3879_s13 + $0xb0] sm:$0xff] }
 0x60e   :  { %v1701_v48 = vadd.f32 1.0, %v2279_v57  ;;  %1952 = vmatpush.msrb.mxu1 %v1938_v35  ;;  %v1936_v57 = vld [vmem:[%s3879_s13 + $0xa0] sm:$0xff] }
 0x60f   :  { %v2281_v19 = vpop.eup %2280  ;;  %2282 = vrcp.f32 %v1700_v14  ;;  %v1728_v62 = vand.u32 2147483648, %v1700_v14  ;;  %v1726_v18 = vand.u32 2147483647, %v1700_v14  ;;  %vm1722_vm5 = vweird.f32 %v1700_v14 }
 0x610   :  { %v1703_v51 = vmul.f32 %v2281_v19, %v1699_v44  ;;  %2284 = vrcp.f32 %v1701_v48  ;;  %vm1708_vm15 = vweird.f32 %v2281_v19  ;;  %v1743_v25 = vand.u32 2147483648, %v1701_v48  ;;  %v1943_v44 = vld [vmem:[%s3879_s13 + $0xd8] sm:$0xff]  ;;  %1953 = vmatpush.msrb.mxu1 %v1936_v57 }
 0x611   :  { %2286 = vtanh.f32 %v1689_v55  ;;  %vm1709_vm1 = vmor %vm1707_vm0, %vm1708_vm15  ;;  %v1729_v53 = vor.u32 1.1754944e-38, %v1728_v62  ;;  %vm1727_vm7 = vcmp.eq.f32.partialorder %v1726_v18, 8.507059e+37  ;;  %vm1737_vm9 = vweird.f32 %v1701_v48  ;;  %1970 = vmatpush.msrb.mxu2 %v1943_v44  ;;  %v1924_v62 = vld [vmem:[%s3879_s13 + $0x40] sm:$0xff] }
 0x612   :  { %v1704_v54 = vsub.f32 1.0, %v1703_v51  ;;  %v1741_v2 = vand.u32 2147483647, %v1701_v48  ;;  %v1744_v42 = vor.u32 1.1754944e-38, %v1743_v25  ;;  %1954 = vmatpush.msrb.mxu1 %v1934_v49  ;;  %v1932_v51 = vld [vmem:[%s3879_s13 + $0x80] sm:$0xff] }
 0x613   :  { %1971 = vmatpush.msrb.mxu2 %v1941_v9  ;;  %v1916_v25 = vld [vmem:[%s3879_s13] sm:$0xff] }
 0x614   :  { %v1705_v30 = vmul.f32 %v2281_v19, %v1704_v54  ;;  %vm1742_vm11 = vcmp.eq.f32.partialorder %v1741_v2, 8.507059e+37  ;;  %v1933_v54 = vld [vmem:[%s3879_s13 + $0x88] sm:$0xff]  ;;  %1955 = vmatpush.msrb.mxu1 %v1932_v51 }
 0x615   :  { %v2283_v1 = vpop.eup %2282  ;;  %1972 = vmatpush.msrb.mxu2 %v1939_v52  ;;  %v1917_v2 = vld [vmem:[%s3879_s13 + $0x8] sm:$0xff] }
 0x616   :  { %v2285_v39 = vpop.eup %2284  ;;  %v1706_v59 = vadd.f32 %v2281_v19, %v1705_v30  ;;  %v1718_v16 = vmul.f32 %v2283_v1, %v1700_v14  ;;  %vm1723_vm4 = vweird.f32 %v2283_v1  ;;  %v1937_v14 = vld [vmem:[%s3879_s13 + $0xa8] sm:$0xff]  ;;  %v1930_v30 = vld [vmem:[%s3879_s13 + $0x70] sm:$0xff] }
 0x617   :  { %v1733_v4 = vmul.f32 %v2285_v39, %v1701_v48  ;;  %v2287_v20 = vpop.eup %2286  ;;  %vm1724_vm6 = vmor %vm1722_vm5, %vm1723_vm4  ;;  %vm1738_vm8 = vweird.f32 %v2285_v39  ;;  %1973 = vmatpush.msrb.mxu2 %v1937_v14  ;;  %1956 = vmatpush.msrb.mxu1 %v1930_v30 }
 0x618   :  { %v1710_v13 = vsel %vm1709_vm1, %v2281_v19, %v1706_v59  ;;  %v1719_v7 = vsub.f32 1.0, %v1718_v16  ;;  %vm1739_vm10 = vmor %vm1737_vm9, %vm1738_vm8  ;;  %v1935_v19 = vld [vmem:[%s3879_s13 + $0x98] sm:$0xff]  ;;  %v1926_v16 = vld [vmem:[%s3879_s13 + $0x50] sm:$0xff] }
 0x619   :  { %v1715_v11 = vsel %vm1712_vm3, %v1714_v47, %v1710_v13  ;;  %v1734_v0 = vsub.f32 1.0, %v1733_v4  ;;  %1974 = vmatpush.msrb.mxu2 %v1935_v19  ;;  %v1927_v47 = vld [vmem:[%s3879_s13 + $0x58] sm:$0xff] }
 0x61a   :  { %v1749_v5 = vmul.f32 %v2287_v20, %v1715_v11  ;;  %v1720_v6 = vmul.f32 %v2283_v1, %v1719_v7  ;;  %v4173_v4 = vld [vmem:[#allocation62_spill] sm:$0xff]  ;;  %v4174_v20 = vld [vmem:[#allocation63_spill] sm:$0xff] }
 0x61b   :  { %v1735_v50 = vmul.f32 %v2285_v39, %v1734_v0  ;;  %1975 = vmatpush.msrb.mxu2 %v1933_v54  ;;  %v1922_v0 = vld [vmem:[%s3879_s13 + $0x30] sm:$0xff] }
 0x61c   :  { %v1721_v21 = vadd.f32 %v2283_v1, %v1720_v6 }
 0x61d   :  { %v1736_v10 = vadd.f32 %v2285_v39, %v1735_v50  ;;  %1976 = vmatpush.msrb.mxu2 %v1931_v15  ;;  %v1921_v50 = vld [vmem:[%s3879_s13 + $0x28] sm:$0xff] }
 0x61e   :  { %v1725_v24 = vsel %vm1724_vm6, %v2283_v1, %v1721_v21  ;;  %v1928_v1 = vld [vmem:[%s3879_s13 + $0x60] sm:$0xff]  ;;  %v1923_v21 = vld [vmem:[%s3879_s13 + $0x38] sm:$0xff] }
 0x61f   :  { %v1730_v17 = vsel %vm1727_vm7, %v1729_v53, %v1725_v24  ;;  %v1740_v3 = vsel %vm1739_vm10, %v2285_v39, %v1736_v10  ;;  %v1929_v39 = vld [vmem:[%s3879_s13 + $0x68] sm:$0xff]  ;;  %1957 = vmatpush.msrb.mxu1 %v1928_v1  ;;  %v1919_v10 = vld [vmem:[%s3879_s13 + $0x18] sm:$0xff] }
 0x620   :  { %v1748_v12 = vmul.f32 %v1730_v17, %v3738_v22  ;;  %v1745_v46 = vsel %vm1742_vm11, %v1744_v42, %v1740_v3  ;;  %v1913_v22 = vld [vmem:[#allocation10 + $0x68] sm:$0xff]  ;;  %1977 = vmatpush.msrb.mxu2 %v1929_v39  ;;  %v1920_v17 = vld [vmem:[%s3879_s13 + $0x20] sm:$0xff] }
 0x621   :  { %1958 = vmatpush.msrb.mxu1 %v1926_v16 }
 0x622   :  { %v3746_v26 = vadd.f32 %v1749_v5, %v1748_v12  ;;  %v1925_v5 = vld [vmem:[%s3879_s13 + $0x48] sm:$0xff]  ;;  %1978 = vmatpush.msrb.mxu2 %v1927_v47  ;;  %v1918_v12 = vld [vmem:[%s3879_s13 + $0x10] sm:$0xff] }
 0x623   :  { %1959 = vmatpush.msrb.mxu1 %v1924_v62 }
 0x624   :  { %2288 = vtanh.f32 %v3746_v26  ;;  %1979 = vmatpush.msrb.mxu2 %v1925_v5 }
 0x625   :  { %1960 = vmatpush.msrb.mxu1 %v1922_v0 }
 0x626   :  { %1980 = vmatpush.msrb.mxu2 %v1923_v21 }
 0x627   :  { %1961 = vmatpush.msrb.mxu1 %v1920_v17 }
 0x628   :  { %1981 = vmatpush.msrb.mxu2 %v1921_v50 }
 0x629   :  { %1962 = vmatpush.msrb.mxu1 %v1918_v12 }
 0x62a   :  { %v2289_v28 = vpop.eup %2288  ;;  %1982 = vmatpush.msrb.mxu2 %v1919_v10 }
 0x62b   :  { %v1752_v29 = vmul.f32 %v2289_v28, %v1745_v46  ;;  %1963 = vmatpush.msrb.mxu1 %v1916_v25 }
 0x62c   :  { %1983 = vmatpush.msrb.mxu2 %v1917_v2 }
 0x62d   :  { %1769 = vmatmul.f32.vlgmr.msra.gmra.mxu1 %v1752_v29  ;;  %1789 = vmatmul.f32.vlgmr.msra.gmra.mxu2 %v1752_v29 }
 0x62e   :  { %1809 = vmatmul.f32.vlgmr.msra.gmra.mxu3 %v1752_v29  ;;  %1829 = vmatmul.f32.vlgmr.msrb.gmra.mxu0 %v1752_v29 }
 0x62f   :  { %2020 = vmatpush.msra.mxu3 %v1915_v33  ;;  %v4175_v33 = vld [vmem:[#allocation71_spill] sm:$0xff] }
 0x631   :  { %2021 = vmatpush.msra.mxu3 %v1913_v22 }
 0x633   :  { %2022 = vmatpush.msra.mxu3 %v1911_v37 }
 0x635   :  { %2023 = vmatpush.msra.mxu3 %v1909_v38 }
 0x636   :  { %2160 = vmatmul.msk.f32.vlgmr.msrb.gmra.mxu3 %vm1988_vm12, %v432_v40 }
 0x637   :  { %2024 = vmatpush.msra.mxu3 %v1907_v41 }
 0x639   :  { %2025 = vmatpush.msra.mxu3 %v1905_v43 }
 0x63b   :  { %2026 = vmatpush.msra.mxu3 %v1903_v45 }
 0x63d   :  { %2027 = vmatpush.msra.mxu3 %v1901_v63 }
 0x63e   :  { %2161 = vmatmul.msk.f32.vlgmr.msra.gmra.mxu3 %vm1988_vm12, %v432_v40  ;;  %vm2080_vm12 = vcmask 7168  }
 0x6aa   :  { %v1770_v48 = vpop.f32.mrf.mxu1 }
 0x6ab   :  { %v1833_v55 = vadd.f32 %v1770_v48, %v4172_v23  ;;  %v1830_v42 = vpop.f32.mrf.mxu0 }
 0x6ac   :  { %v1836_v22 = vadd.f32 %v1830_v42, %v4175_v33 }
 0x6ad   :  { %v2157_v56 = vmul.f32 -1.442695, %v1833_v55 }
 0x6af   :  { %2290 = vpow2.f32 %v2157_v56 }
 0x6b0   :  { %v1790_v59 = vpop.f32.mrf.mxu2 }
 0x6b1   :  { %v1834_v13 = vadd.f32 %v1790_v59, %v4173_v4  ;;  %v1810_v7 = vpop.f32.mrf.mxu3 }
 0x6b2   :  { %v1835_v11 = vadd.f32 %v1810_v7, %v4174_v20 }
 0x6b3   :  { %v2158_v6 = vmul.f32 -1.442695, %v1834_v13 }
 0x6b4   :  { %v2159_v18 = vmul.f32 -1.442695, %v1835_v11 }
 0x6b5   :  { %v2291_v53 = vpop.eup %2290  ;;  %2292 = vpow2.f32 %v2158_v6 }
 0x6b6   :  { %v1846_v24 = vadd.f32 1.0, %v2291_v53  ;;  %2294 = vpow2.f32 %v2159_v18 }
 0x6b8   :  { %2296 = vrcp.f32 %v1846_v24  ;;  %v1860_v37 = vand.u32 2147483648, %v1846_v24  ;;  %v1858_v40 = vand.u32 2147483647, %v1846_v24  ;;  %vm1854_vm14 = vweird.f32 %v1846_v24 }
 0x6b9   :  { %v2009_v47 = vpop.f32.mrf.mxu3 }
 0x6ba   :  { %v1861_v58 = vor.u32 1.1754944e-38, %v1860_v37  ;;  %vm1859_vm0 = vcmp.eq.f32.partialorder %v1858_v40, 8.507059e+37 }
 0x6bb   :  { %v2293_v3 = vpop.eup %2292 }
 0x6bc   :  { %v2295_v28 = vpop.eup %2294  ;;  %v1847_v46 = vadd.f32 1.0, %v2293_v3 }
 0x6bd   :  { %v1848_v29 = vadd.f32 1.0, %v2295_v28 }
 0x6be   :  { %v2297_v31 = vpop.eup %2296  ;;  %2298 = vrcp.f32 %v1847_v46  ;;  %v1875_v61 = vand.u32 2147483648, %v1847_v46  ;;  %v1873_v52 = vand.u32 2147483647, %v1847_v46  ;;  %vm1869_vm3 = vweird.f32 %v1847_v46 }
 0x6bf   :  { %v1850_v34 = vmul.f32 %v2297_v31, %v1846_v24  ;;  %2300 = vrcp.f32 %v1848_v29  ;;  %vm1855_vm13 = vweird.f32 %v2297_v31  ;;  %v1890_v56 = vand.u32 2147483648, %v1848_v29 }
 0x6c0   :  { %2302 = vtanh.f32 %v1836_v22  ;;  %vm1856_vm15 = vmor %vm1854_vm14, %vm1855_vm13  ;;  %v1876_v48 = vor.u32 1.1754944e-38, %v1875_v61  ;;  %vm1874_vm5 = vcmp.eq.f32.partialorder %v1873_v52, 8.507059e+37  ;;  %vm1884_vm7 = vweird.f32 %v1848_v29 }
 0x6c1   :  { %v1851_v36 = vsub.f32 1.0, %v1850_v34  ;;  %v1888_v30 = vand.u32 2147483647, %v1848_v29  ;;  %v1891_v1 = vor.u32 1.1754944e-38, %v1890_v56  ;;  %v2029_v13 = vpop.f32.mrf.mxu3  ;;  %vm2082_vm13 = vcmask 15360  }
 0x6c3   :  { %v1852_v38 = vmul.f32 %v2297_v31, %v1851_v36  ;;  %vm1889_vm9 = vcmp.eq.f32.partialorder %v1888_v30, 8.507059e+37 }
 0x6c4   :  { %v2299_v41 = vpop.eup %2298 }
 0x6c5   :  { %v2301_v43 = vpop.eup %2300  ;;  %v1853_v45 = vadd.f32 %v2297_v31, %v1852_v38  ;;  %v1865_v63 = vmul.f32 %v2299_v41, %v1847_v46  ;;  %vm1870_vm1 = vweird.f32 %v2299_v41  ;;  %v2058_v46 = vld [vmem:[%s3868_s2] sm:$0xff] }
 0x6c6   :  { %v1880_v8 = vmul.f32 %v2301_v43, %v1848_v29  ;;  %v2303_v32 = vpop.eup %2302  ;;  %vm1871_vm4 = vmor %vm1869_vm3, %vm1870_vm1  ;;  %vm1885_vm6 = vweird.f32 %v2301_v43 }
 0x6c7   :  { %v1857_v60 = vsel %vm1856_vm15, %v2297_v31, %v1853_v45  ;;  %v1866_v27 = vsub.f32 1.0, %v1865_v63  ;;  %vm1886_vm8 = vmor %vm1884_vm7, %vm1885_vm6 }
 0x6c8   :  { %v1862_v44 = vsel %vm1859_vm0, %v1861_v58, %v1857_v60  ;;  %v1881_v57 = vsub.f32 1.0, %v1880_v8 }
 0x6c9   :  { %v1896_v9 = vmul.f32 %v2303_v32, %v1862_v44  ;;  %v1867_v35 = vmul.f32 %v2299_v41, %v1866_v27 }
 0x6ca   :  { %v1882_v23 = vmul.f32 %v2301_v43, %v1881_v57 }
 0x6cb   :  { %v1868_v14 = vadd.f32 %v2299_v41, %v1867_v35 }
 0x6cc   :  { %v1883_v54 = vadd.f32 %v2301_v43, %v1882_v23 }
 0x6cd   :  { %v1872_v49 = vsel %vm1871_vm4, %v2299_v41, %v1868_v14 }
 0x6ce   :  { %v1877_v19 = vsel %vm1874_vm5, %v1876_v48, %v1872_v49  ;;  %v1887_v15 = vsel %vm1886_vm8, %v2301_v43, %v1883_v54 }
 0x6cf   :  { %v1895_v55 = vmul.f32 %v1877_v19, %v3746_v26  ;;  %v1892_v59 = vsel %vm1889_vm9, %v1891_v1, %v1887_v15  ;;  %v2032_v26 = vld [vmem:[%s3880_s14] sm:$0x3] }
 0x6d0   :  { %v2035_v4 = vperm.slane %v2032_v26, 1  ;;  %v2034_v3 = vperm.slane %v2032_v26, 0 }
 0x6d1   :  { %v1897_v51 = vadd.f32 %v1896_v9, %v1895_v55 }
 0x6d3   :  { %2304 = vtanh.f32 %v1897_v51 }
 0x6d9   :  { %v2305_v39 = vpop.eup %2304 }
 0x6da   :  { %v1899_v16 = vmul.f32 %v2305_v39, %v1892_v59 }
 0x6dc   :  { %1964 = vmatmul.f32.vlgmr.msrb.gmra.mxu1 %v1899_v16  ;;  %1984 = vmatmul.f32.vlgmr.msrb.gmra.mxu2 %v1899_v16 }
 0x759   :  { %v1965_v50 = vpop.f32.mrf.mxu1 }
 0x75a   :  { %v2010_v2 = vadd.f32 %v2009_v47, %v1965_v50 }
 0x75c   :  { %v2038_v31 = vadd.f32 %v2034_v3, %v2010_v2 }
 0x75f   :  { %v1985_v7 = vpop.f32.mrf.mxu2 }
 0x760   :  { %v2030_v20 = vadd.f32 %v2029_v13, %v1985_v7 }
 0x762   :  { %v2039_v11 = vadd.f32 %v2035_v4, %v2030_v20 }
 0x764   :  { %v2043_v62 = vand.u32 2147483647, %v2039_v11  ;;  %v2040_v25 = vmax.f32 %v2039_v11, 0.0  ;;  %vm2041_vm11 = vcmp.ne.f32.partialorder %v2039_v11, %v2039_v11 }
 0x766   :  { %v2044_v5 = vsub.f32 0.0, %v2043_v62 }
 0x768   :  { %v2045_v6 = vmul.f32 1.442695, %v2044_v5 }
 0x76a   :  { %2306 = vpow2.f32 %v2045_v6 }
 0x770   :  { %v2307_v18 = vpop.eup %2306 }
 0x771   :  { %v2047_v0 = vadd.f32 1.0, %v2307_v18  ;;  %v2050_v21 = vmul.f32 -0.5, %v2307_v18  ;;  %v2053_v24 = vand.u32 2147483647, %v2307_v18 }
 0x773   :  { %2308 = vlog2.f32 %v2047_v0  ;;  %v2051_v53 = vadd.f32 1.0, %v2050_v21  ;;  %vm2054_vm10 = vcmp.lt.f32.partialorder %v2053_v24, 0.0004427343 }
 0x775   :  { %v2052_v10 = vmul.f32 %v2307_v18, %v2051_v53 }
 0x779   :  { %v2309_v17 = vpop.eup %2308 }
 0x77a   :  { %v2049_v12 = vmul.f32 0.6931472, %v2309_v17 }
 0x77c   :  { %v2055_v42 = vsel %vm2054_vm10, %v2052_v10, %v2049_v12 }
 0x77d   :  { %v2056_v28 = vadd.f32 %v2055_v42, %v2040_v25 }
 0x77f   :  { %v2057_v29 = vsel %vm2041_vm11, %v2039_v11, %v2056_v28 }
 0x780   :  { %v2059_v33 = vmul.f32 %v2058_v46, %v2057_v29  ;;  %v2065_v34 = vmul.f32 %v2057_v29, %v2057_v29 }
 0x782   :  { %v2060_v22 = vadd.f32 %v2059_v33, %v2038_v31 }
 0x784   :  { %2310 = vtanh.f32 %v2060_v22 }
 0x785   :  { %2312 = vlog2.f32 %v2057_v29 }
 0x786   :  { %2314 = vrcp.f32 %v2065_v34 }
 0x78a   :  { %v2311_v36 = vpop.eup %2310 }
 0x78b   :  { %v2067_v37 = vsub.f32 %v2311_v36, %v2038_v31  ;;  %2062 = vst.msk [vmem:[%s3881_s15] sm:$0xff] %vm462_vm2, %v2311_v36  ;;  %v2313_v40 = vpop.eup %2312 }
 0x78c   :  { %v2315_v43 = vpop.eup %2314  ;;  %v2064_v45 = vmul.f32 0.6931472, %v2313_v40 }
 0x78d   :  { %v2068_v38 = vmul.f32 -0.5, %v2067_v37 }
 0x78e   :  { %v2073_v27 = vadd.f32 1.4189385, %v2064_v45 }
 0x78f   :  { %v2069_v41 = vmul.f32 %v2068_v38, %v2067_v37 }
 0x790   :  { %v2077_v32 = vsel %vm462_vm2, %v2073_v27, 0.0 }
 0x791   :  { %v2070_v63 = vmul.f32 %v2315_v43, %v2069_v41 }
 0x793   :  { %v2071_v58 = vsub.f32 %v2070_v63, %v2064_v45 }
 0x795   :  { %v2162_v8 = vadd.f32 -0.9189385, %v2071_v58 }
 0x797   :  { %v2074_v60 = vsel %vm462_vm2, %v2162_v8, 0.0 }
 0x798   :  { %2075 = vadd.xlane.f32.xlu0 %v2074_v60 }
 0x7a0   :  { %2078 = vadd.xlane.f32.xlu0 %v2077_v32 }
 0x80b   :  { %v2076_v44 = vpop.xlane.xlu0 %2075 }
 0x813   :  { %v2079_v61 = vpop.xlane.xlu0 %2078 }
 0x814   :  { %v2081_v9 = vsel %vm2080_vm12, %v2076_v44, %v2079_v61 }
 0x815   :  { %2083 = vst.msk [vmem:[%s3882_s16] sm:$0xff] %vm2082_vm13, %v2081_v9 }
 0x816   :  { %2092 = vsyncpa [#allocation3], 1 }
 0x817   :  { %2093 = vsyncpa [#allocation5], 1 }
 0x818   :  { %2094 = vsyncpa [#allocation8], 1 }
 0x819   :  { %2095 = vsyncpa [#allocation11], 1 }

</bundles_post_ra>
